<compile_context>
chip_gen: v7x
topology: tpu7x:2x2x1
jax: 0.10.0
libtpu: 0.0.40
codegen_flags: <defaults>
</compile_context>

<pallas_src>
import jax
import jax.numpy as jnp
from jax.experimental import pallas as pl
from jax.experimental.pallas import tpu as pltpu

LANE = 128            # lane width of a vreg (fast axis)
SUBLANE_BF16 = 16     # bf16 packs 16 rows per vreg (second-minor axis)
MAX_TM = 256          # batch tile: multiple of the 256-row MXU on v6e/v7x


def _round_up(x: int, m: int) -> int:
    return ((x + m - 1) // m) * m


# ---------------------------------------------------------------------------
# Kernel body.  Grid = (batch_tiles, num_hidden + 2); the layer axis is the
# inner ("arbitrary") axis:
#   l == 0          : Linear(input_len -> hidden), no activation
#   0 < l < L-1     : Linear(hidden -> hidden) + ReLU   (streamed weight stack)
#   l == L-1        : Linear(hidden -> num_classes_pad), no activation
# All matmuls are bf16 x bf16 on the MXU with f32 accumulation; the hidden
# activation lives in a bf16 VMEM scratch between layer steps.
# ---------------------------------------------------------------------------
def _mlp_body(x_ref, w0_ref, b0_ref, wh_ref, bh_ref, wo_ref, bo_ref, o_ref, h_ref):
    l = pl.program_id(1)
    n_l = pl.num_programs(1)

    @pl.when(l == 0)
    def _():
        acc = jnp.dot(x_ref[...], w0_ref[...], preferred_element_type=jnp.float32)
        h_ref[...] = (acc + b0_ref[...]).astype(h_ref.dtype)

    if wh_ref is not None:
        @pl.when((l > 0) & (l < n_l - 1))
        def _():
            acc = jnp.dot(h_ref[...], wh_ref[0], preferred_element_type=jnp.float32)
            h_ref[...] = jnp.maximum(acc + bh_ref[0], 0.0).astype(h_ref.dtype)

    @pl.when(l == n_l - 1)
    def _():
        acc = jnp.dot(h_ref[...], wo_ref[...], preferred_element_type=jnp.float32)
        o_ref[...] = (acc + bo_ref[...]).astype(o_ref.dtype)


def _make_mlp_kernel(has_hidden: bool):
    if has_hidden:
        def kernel(x_ref, w0_ref, b0_ref, wh_ref, bh_ref, wo_ref, bo_ref, o_ref, h_ref):
            _mlp_body(x_ref, w0_ref, b0_ref, wh_ref, bh_ref, wo_ref, bo_ref, o_ref, h_ref)
    else:
        def kernel(x_ref, w0_ref, b0_ref, wo_ref, bo_ref, o_ref, h_ref):
            _mlp_body(x_ref, w0_ref, b0_ref, None, None, wo_ref, bo_ref, o_ref, h_ref)
    return kernel


def _vmem_limit_bytes() -> int:
    # Generation-aware scoped-VMEM limit: ~80% of physical per-TC VMEM, capped.
    try:
        cap = pltpu.get_tpu_info().vmem_capacity_bytes
        return min(int(cap * 0.8), 100 << 20)
    except Exception:
        return 32 << 20   # safe on every generation


# ---------------------------------------------------------------------------
# Parameter construction (deterministic, PyTorch-like uniform(-1/sqrt(fan_in), .)).
# Master params are fp32; the wrapper casts weights to bf16 for the kernel.
# ---------------------------------------------------------------------------
def init_mlp_params(key, input_shape, num_classes, hidden_factor=1, depth=1):
    input_len = 1
    for s in input_shape:
        input_len *= int(s)
    hidden_size = int(input_len * hidden_factor)

    def linear_init(k, fan_in, fan_out):
        kw, kb = jax.random.split(k)
        bound = 1.0 / (fan_in ** 0.5)
        w = jax.random.uniform(kw, (fan_in, fan_out), jnp.float32, -bound, bound)
        b = jax.random.uniform(kb, (1, fan_out), jnp.float32, -bound, bound)
        return w, b

    keys = jax.random.split(key, depth + 1)
    return {
        "num_classes": num_classes,
        # first Linear(input_len -> hidden); no activation after it (matches module)
        "first": linear_init(keys[0], input_len, hidden_size),
        # MLP_Block: (depth - 1) x [Linear(hidden, hidden) + ReLU]
        "block": [linear_init(keys[1 + i], hidden_size, hidden_size)
                  for i in range(depth - 1)],
        # final Linear(hidden -> num_classes), no activation
        "out": linear_init(keys[depth], hidden_size, num_classes),
    }


# ---------------------------------------------------------------------------
# Forward pass: flatten, pad M (->mult of 16 / tile 256) and N (->mult of 128),
# one fused pallas_call with a (batch_tile, layer) grid, slice padding off.
# ---------------------------------------------------------------------------
def mlp_forward(x_nchw, params):
    num_classes = params["num_classes"]
    B = x_nchw.shape[0]
    x = x_nchw.reshape(B, -1).astype(jnp.bfloat16)          # nn.Flatten (row-major)

    # Batch padding / tiling: multiple of 16 (bf16 sublane packing), tile <= 256.
    b16 = _round_up(max(B, SUBLANE_BF16), SUBLANE_BF16)
    tm = b16 if b16 <= MAX_TM else MAX_TM
    b_pad = _round_up(b16, tm)
    if b_pad != B:
        x = jnp.pad(x, ((0, b_pad - B), (0, 0)))

    n_pad = _round_up(num_classes, LANE)

    w0, b0 = params["first"]
    w0 = w0.astype(jnp.bfloat16)
    b0 = b0.astype(jnp.float32)

    wo, bo = params["out"]
    wo = jnp.pad(wo, ((0, 0), (0, n_pad - wo.shape[1]))).astype(jnp.bfloat16)
    bo = jnp.pad(bo, ((0, 0), (0, n_pad - bo.shape[1]))).astype(jnp.float32)

    block = params["block"]
    nh = len(block)                      # number of hidden Linear+ReLU layers
    d_in = x.shape[1]
    hidden = w0.shape[1]
    n_layer_steps = nh + 2               # first + hidden... + output
    grid = (b_pad // tm, n_layer_steps)

    # Resident-across-layers inputs (constant block index -> DMA'd once per M tile
    # for x, once overall for the weights/biases).
    in_specs = [
        pl.BlockSpec((tm, d_in), lambda m, l: (m, 0)),        # x (bf16)
        pl.BlockSpec((d_in, hidden), lambda m, l: (0, 0)),    # w0 (bf16)
        pl.BlockSpec((1, hidden), lambda m, l: (0, 0)),       # b0 (f32)
    ]
    args = [x, w0, b0]

    if nh > 0:
        # Stack hidden-layer weights/biases and stream one layer per grid step.
        wh = jnp.stack([w.astype(jnp.bfloat16) for w, _ in block], axis=0)  # (nh, H, H)
        bh = jnp.stack([b.astype(jnp.float32) for _, b in block], axis=0)   # (nh, 1, H)

        def _hid_idx(m, l):
            # Used only for 0 < l < L-1; clamp keeps it in range (and keeps the
            # block index constant at the ends -> no redundant DMA there).
            return (jnp.maximum(jnp.minimum(l - 1, nh - 1), 0), 0, 0)

        in_specs += [
            pl.BlockSpec((1, hidden, hidden), _hid_idx),      # streamed weights
            pl.BlockSpec((1, 1, hidden), _hid_idx),           # streamed biases
        ]
        args += [wh, bh]

    in_specs += [
        pl.BlockSpec((hidden, n_pad), lambda m, l: (0, 0)),   # wo (bf16)
        pl.BlockSpec((1, n_pad), lambda m, l: (0, 0)),        # bo (f32)
    ]
    args += [wo, bo]

    out_padded = pl.pallas_call(
        _make_mlp_kernel(nh > 0),
        out_shape=jax.ShapeDtypeStruct((b_pad, n_pad), jnp.float32),
        grid=grid,
        in_specs=in_specs,
        out_specs=pl.BlockSpec((tm, n_pad), lambda m, l: (m, 0)),
        scratch_shapes=[pltpu.VMEM((tm, hidden), jnp.bfloat16)],   # resident activation
        compiler_params=pltpu.CompilerParams(
            dimension_semantics=("parallel", "arbitrary"),
            vmem_limit_bytes=_vmem_limit_bytes(),
        ),
    )(*args)

    return out_padded[:B, :num_classes]


# Pure-JAX reference (fp32 params) for a sanity check.
def mlp_reference(x_nchw, params):
    B = x_nchw.shape[0]
    h = x_nchw.reshape(B, -1).astype(jnp.float32)
    w, b = params["first"]
    h = h @ w + b
    for w, b in params["block"]:
        h = jnp.maximum(h @ w + b, 0.0)
    w, b = params["out"]
    return h @ w + b


if __name__ == "__main__":
    # Small shapes consistent with the module: input_shape=(4,16,16), batch=2.
    B = 2
    input_shape = (4, 16, 16)   # C, H, W -> input_len = 1024
    num_classes = 10
    hidden_factor = 1

    key = jax.random.PRNGKey(0)
    k_x, k_p = jax.random.split(key)
    x = jax.random.normal(k_x, (B,) + input_shape, dtype=jnp.float32)

    # depth=1: no hidden block (no streamed stack); depth=2,3: exercise layer streaming.
    for depth in (1, 2, 3):
        params = init_mlp_params(jax.random.fold_in(k_p, depth), input_shape,
                                 num_classes, hidden_factor, depth)
        out = mlp_forward(x, params)
        jax.block_until_ready(out)
        assert out.shape == (B, num_classes)

        ref = mlp_reference(x, params)
        assert jnp.all(jnp.isfinite(out))
        # Loose tolerance: kernel uses bf16 weights/activations (f32 accumulate),
        # reference is fp32.
        assert jnp.allclose(out, ref, atol=5e-2, rtol=5e-2), f"mismatch at depth={depth}"

    print("KERNEL_OK")
</pallas_src>

<mosaic_0001>
module attributes {stable_mosaic.version = 11 : i64} {
  func.func @kernel(%arg0: i32, %arg1: i32, %arg2: memref<16x1024xbf16, #tpu.memory_space<vmem>>, %arg3: memref<1024x1024xbf16, #tpu.memory_space<vmem>>, %arg4: memref<1x1024xf32, #tpu.memory_space<vmem>>, %arg5: memref<1024x128xbf16, #tpu.memory_space<vmem>>, %arg6: memref<1x128xf32, #tpu.memory_space<vmem>>, %arg7: memref<16x128xf32, #tpu.memory_space<vmem>>, %arg8: memref<16x1024xbf16, #tpu.memory_space<vmem>>) attributes {dimension_semantics = [#tpu.dimension_semantics<parallel>, #tpu.dimension_semantics<arbitrary>], iteration_bounds = array<i64: 1, 2>, scalar_prefetch = 0 : i64, scratch_operands = 1 : i64, tpu.core_type = #tpu.core_type<tc>, window_params = [{transform_indices = @transform_0, window_bounds = array<i64: 16, 1024>}, {pipeline_mode = #tpu.pipeline_mode<synchronous>, transform_indices = @transform_1, window_bounds = array<i64: 1024, 1024>}, {pipeline_mode = #tpu.pipeline_mode<synchronous>, transform_indices = @transform_2, window_bounds = array<i64: 1, 1024>}, {pipeline_mode = #tpu.pipeline_mode<synchronous>, transform_indices = @transform_3, window_bounds = array<i64: 1024, 128>}, {pipeline_mode = #tpu.pipeline_mode<synchronous>, transform_indices = @transform_4, window_bounds = array<i64: 1, 128>}, {transform_indices = @transform_5, window_bounds = array<i64: 16, 128>}]} {
    %c0_i32 = arith.constant 0 : i32
    %0 = arith.cmpi eq, %arg1, %c0_i32 : i32
    %1 = arith.extui %0 : i1 to i32
    %c0_i32_0 = arith.constant 0 : i32
    %2 = arith.cmpi ne, %1, %c0_i32_0 : i32
    scf.if %2 {
      %c0 = arith.constant 0 : index
      %c0_2 = arith.constant 0 : index
      %6 = vector.load %arg2[%c0, %c0_2] : memref<16x1024xbf16, #tpu.memory_space<vmem>>, vector<16x1024xbf16>
      %c0_3 = arith.constant 0 : index
      %c0_4 = arith.constant 0 : index
      %7 = vector.load %arg3[%c0_3, %c0_4] : memref<1024x1024xbf16, #tpu.memory_space<vmem>>, vector<1024x1024xbf16>
      %cst = arith.constant dense<0.000000e+00> : vector<16x1024xf32>
      %8 = tpu.matmul %6, %7, %cst {dimension_numbers = #tpu.dot_dimension_numbers<[1], [0], [0], [1], [0, 0, 1, 1], [], []>} : vector<16x1024xbf16>, vector<1024x1024xbf16>, vector<16x1024xf32> -> vector<16x1024xf32>
      %c0_5 = arith.constant 0 : index
      %c0_6 = arith.constant 0 : index
      %9 = vector.load %arg4[%c0_5, %c0_6] : memref<1x1024xf32, #tpu.memory_space<vmem>>, vector<1x1024xf32>
      %10 = vector.broadcast %9 : vector<1x1024xf32> to vector<16x1024xf32>
      %11 = arith.addf %8, %10 : vector<16x1024xf32>
      %12 = arith.truncf %11 : vector<16x1024xf32> to vector<16x1024xbf16>
      %c0_7 = arith.constant 0 : index
      %c0_8 = arith.constant 0 : index
      %13 = vector.load %arg8[%c0_7, %c0_8] : memref<16x1024xbf16, #tpu.memory_space<vmem>>, vector<16x1024xbf16>
      tpu.vector_store %arg8[%c0_7, %c0_8], %12 {strides = array<i32>} : memref<16x1024xbf16, #tpu.memory_space<vmem>>, vector<16x1024xbf16>,
    } else {
    }
    %c1_i32 = arith.constant 1 : i32
    %3 = arith.cmpi eq, %arg1, %c1_i32 : i32
    %4 = arith.extui %3 : i1 to i32
    %c0_i32_1 = arith.constant 0 : i32
    %5 = arith.cmpi ne, %4, %c0_i32_1 : i32
    scf.if %5 {
      %c0 = arith.constant 0 : index
      %c0_2 = arith.constant 0 : index
      %6 = vector.load %arg8[%c0, %c0_2] : memref<16x1024xbf16, #tpu.memory_space<vmem>>, vector<16x1024xbf16>
      %c0_3 = arith.constant 0 : index
      %c0_4 = arith.constant 0 : index
      %7 = vector.load %arg5[%c0_3, %c0_4] : memref<1024x128xbf16, #tpu.memory_space<vmem>>, vector<1024x128xbf16>
      %cst = arith.constant dense<0.000000e+00> : vector<16x128xf32>
      %8 = tpu.matmul %6, %7, %cst {dimension_numbers = #tpu.dot_dimension_numbers<[1], [0], [0], [1], [0, 0, 1, 1], [], []>} : vector<16x1024xbf16>, vector<1024x128xbf16>, vector<16x128xf32> -> vector<16x128xf32>
      %c0_5 = arith.constant 0 : index
      %c0_6 = arith.constant 0 : index
      %9 = vector.load %arg6[%c0_5, %c0_6] : memref<1x128xf32, #tpu.memory_space<vmem>>, vector<1x128xf32>
      %10 = vector.broadcast %9 : vector<1x128xf32> to vector<16x128xf32>
      %11 = arith.addf %8, %10 : vector<16x128xf32>
      %c0_7 = arith.constant 0 : index
      %c0_8 = arith.constant 0 : index
      %12 = vector.load %arg7[%c0_7, %c0_8] : memref<16x128xf32, #tpu.memory_space<vmem>>, vector<16x128xf32>
      tpu.vector_store %arg7[%c0_7, %c0_8], %11 {strides = array<i32>} : memref<16x128xf32, #tpu.memory_space<vmem>>, vector<16x128xf32>,
    } else {
    }
    return
  }
  func.func @transform_0(%arg0: i32, %arg1: i32) -> (i32, i32) {
    %c0_i32 = arith.constant 0 : i32
    %c0_i32_0 = arith.constant 0 : i32
    return %arg0, %c0_i32 : i32, i32
  }
  func.func @transform_1(%arg0: i32, %arg1: i32) -> (i32, i32) {
    %c0_i32 = arith.constant 0 : i32
    %c0_i32_0 = arith.constant 0 : i32
    %c0_i32_1 = arith.constant 0 : i32
    return %c0_i32, %c0_i32_0 : i32, i32
  }
  func.func @transform_2(%arg0: i32, %arg1: i32) -> (i32, i32) {
    %c0_i32 = arith.constant 0 : i32
    %c0_i32_0 = arith.constant 0 : i32
    %c0_i32_1 = arith.constant 0 : i32
    return %c0_i32, %c0_i32_0 : i32, i32
  }
  func.func @transform_3(%arg0: i32, %arg1: i32) -> (i32, i32) {
    %c0_i32 = arith.constant 0 : i32
    %c0_i32_0 = arith.constant 0 : i32
    %c0_i32_1 = arith.constant 0 : i32
    return %c0_i32, %c0_i32_0 : i32, i32
  }
  func.func @transform_4(%arg0: i32, %arg1: i32) -> (i32, i32) {
    %c0_i32 = arith.constant 0 : i32
    %c0_i32_0 = arith.constant 0 : i32
    %c0_i32_1 = arith.constant 0 : i32
    return %c0_i32, %c0_i32_0 : i32, i32
  }
  func.func @transform_5(%arg0: i32, %arg1: i32) -> (i32, i32) {
    %c0_i32 = arith.constant 0 : i32
    %c0_i32_0 = arith.constant 0 : i32
    return %arg0, %c0_i32 : i32, i32
  }
}

</mosaic_0001>

<bundles_post_ra>
// kernel: tpu_custom_call.1
= control target key start
LH: loop header
LB: loop body
LE: loop exit
PB: predicated region body
PF: predicated region fallthrough
CT: control target
= control target key end

     0   :  { %10 = vsyncpa [#allocation4], 0  ;;  %s6415_s0 = inlined_call_operand.hbm [shape: bf16[16,1024], index: 0, kind: input, shape index: {}]   ;;  %s6416_s1 = inlined_call_operand.hbm [shape: bf16[1024,1024], index: 1, kind: input, shape index: {}]   ;;  %s6417_s2 = inlined_call_operand.hbm [shape: f32[1,1024], index: 2, kind: input, shape index: {}]   ;;  %s6418_s3 = inlined_call_operand.hbm [shape: bf16[1024,128], index: 3, kind: input, shape index: {}]   ;;  %s6419_s4 = inlined_call_operand.hbm [shape: f32[1,128], index: 4, kind: input, shape index: {}]   ;;  %s6420_s5 = inlined_call_operand.hbm [shape: f32[16,128], index: 5, kind: output, shape index: {}]  }
   0x1   :  { %11 = vsyncpa [#allocation7], 0 }
   0x2   :  { %12 = vsyncpa [#allocation10], 0 }
   0x3   :  { %13 = vsyncpa [#allocation5], 0  ;;  %s6114_s18 = smov 0   ;;  %s6116_s19 = smov 0  }
   0x4   :  { %s6118_s20 = smov 0  }
   0x5 LB: > { %s4958_s21 = sadd.s32 4294967295, %s6070_s20   ;;  %p4959_p0 = scmp.ge.s32.totalorder %s6070_s20, 1  ;;  %s6070_s20 = sphi %s6118_s20, %s19_s20   ;;  %s6066_s19 = sphi %s6116_s19, %s6432_s19   ;;  %s6062_s18 = sphi %s6114_s18, %s6431_s18  }
   0x6   : > { %p172_p1 = scmp.lt.s32.totalorder %s6070_s20, 3  ;;  %p6134_p2 = scmp.eq.s32.totalorder %s4958_s21, 0 }
   0x7   : > { %s6072_s24 = smov [#allocation6]   ;;  %s6073_s26 = smov [#allocation9]  }
   0x8   : > { %s6424_s22 = scalar_select %p6134_p2, 1, 0 }
   0x9   : > { %p6138_p3 = pnand %p4959_p0, %p172_p1  ;;  %s201_s25 = sshll.u32 %s6072_s24, 4  ;;  %s202_s25 = int_to_ptr.vmem [resolvable:$true] %s201_s25 }
   0xa   : > { %s225_s27 = sshll.u32 %s6073_s26, 4  ;;  %s5866_s6 = scalar_lea.hbm %s6416_s1, 65536  ;;  %s6144_s27 = int_to_ptr.vmem [resolvable:$true] %s225_s27 }
   0xb   : > { %s6425_s23 = scalar_select %p6138_p3, 1, 0 }
   0xc   : > { %p5738_p4 = pneg %p6138_p3  ;;  %p5867_p6 = scmp.ne.s32.totalorder %s6416_s1, %s5866_s6 }
   0xd   : > { %p5873_p10 = scmp.lt.u32.totalorder %s5866_s6, %s6416_s1 }
   0xe   : > { %p6148_p5 = pnand %p6134_p2, %p5738_p4 }
  0x10   : > { %p6160_p7 = pneg %p6148_p5 }
  0x12   : > { %p5869_p8 = pnand %p6160_p7, %p5867_p6 }
  0x14   : > { %p5870_p9 = pneg %p5869_p8 }
  0x16   : > { %p5875_p11 = pnand %p5873_p10, %p5870_p9 }
  0x18   : > { %5878 = shalt.err (!%p5875_p11)
}
  0x19   : > { %s5879_s12 = scalar_lea.vmem %s202_s25, 65536  ;;  %p5887_p1 = scmp.lt.s32.totalorder %s202_s25, %s202_s25 }
  0x1a   : > { %p5880_p12 = scmp.ne.s32.totalorder %s202_s25, %s5879_s12  ;;  %p5888_p4 = scmp.lt.s32.totalorder %s5879_s12, %s5879_s12 }
  0x1c   : > { %p5882_p13 = pnand %p5880_p12, %p6160_p7  ;;  %p5889_p2 = por %p5888_p4, %p5887_p1 }
  0x1e   : > { %p5883_p0 = pneg %p5882_p13 }
  0x20   : > { %p5890_p3 = pnand %p5889_p2, %p5883_p0 }
  0x22   : > { %5893 = shalt.err (!%p5890_p3)
}
  0x23   : > { %s6074_s13 = smov 512   ;;  %s6075_s14 = smov 32  }
  0x24   : > { %5744 = dma.hbm_to_vmem [thread:$0]  (!%p6148_p5), %s6416_s1, 65536, %s202_s25, [#allocation7], %s6074_s13, %s6074_s13, %s6075_s14  }
  0x25   : > { %s5894_s26 = scalar_lea.hbm %s6418_s3, 8192 }
  0x26   : > { %p5895_p2 = scmp.ne.s32.totalorder %s6418_s3, %s5894_s26  ;;  %p5901_p8 = scmp.lt.u32.totalorder %s5894_s26, %s6418_s3 }
  0x28   : > { %p5897_p3 = pnand %p5895_p2, %p6160_p7 }
  0x2a   : > { %p5898_p6 = pneg %p5897_p3 }
  0x2c   : > { %p5903_p9 = pnand %p5901_p8, %p5898_p6 }
  0x2e   : > { %5906 = shalt.err (!%p5903_p9)
}
  0x2f   : > { %s5907_s25 = scalar_lea.vmem %s6144_s27, 8192  ;;  %p5915_p13 = scmp.lt.s32.totalorder %s6144_s27, %s6144_s27 }
  0x30   : > { %p5908_p10 = scmp.ne.s32.totalorder %s6144_s27, %s5907_s25  ;;  %p5916_p0 = scmp.lt.s32.totalorder %s5907_s25, %s5907_s25 }
  0x32   : > { %p5910_p11 = pnand %p5908_p10, %p6160_p7  ;;  %p5917_p1 = por %p5916_p0, %p5915_p13 }
  0x34   : > { %p5911_p12 = pneg %p5910_p11 }
  0x36   : > { %p5918_p4 = pnand %p5917_p1, %p5911_p12 }
  0x38   : > { %5921 = shalt.err (!%p5918_p4)
}
  0x39   : > { %s6076_s8 = smov 64   ;;  %s6077_s10 = smov 4  }
  0x3a   : > { %5750 = dma.hbm_to_vmem [thread:$0]  (!%p6148_p5), %s6418_s3, 8192, %s6144_s27, [#allocation10], %s6076_s8, %s6076_s8, %s6077_s10  }
  0x3b   : > { %s28_s15 = sadd.s32 1, %s6066_s19  ;;  %s6078_s16 = smov [#allocation3]  }
  0x3c   : > { %p29_p2 = scmp.ge.s32.totalorder %s28_s15, 2  ;;  %s188_s17 = sshll.u32 %s6078_s16, 4  ;;  %s189_s17 = int_to_ptr.vmem [resolvable:$true] %s188_s17 }
  0x3d   : > { %s6079_s24 = smov [#allocation8]   ;;  %s5922_s6 = scalar_lea.hbm %s6415_s0, 1024 }
  0x3e   : > { %s6434_s15 = smov (%p29_p2, %s28_s15), 0  ;;  %s215_s26 = sshll.u32 %s6079_s24, 4  ;;  %s216_s26 = int_to_ptr.vmem [resolvable:$true] %s215_s26 }
  0x3f   : > { %p5923_p3 = scmp.ne.s32.totalorder %s6415_s0, %s5922_s6  ;;  %p5929_p9 = scmp.lt.u32.totalorder %s5922_s6, %s6415_s0 }
  0x41   : > { %p5925_p6 = pnand %p5923_p3, %p6160_p7 }
  0x43   : > { %p5926_p8 = pneg %p5925_p6 }
  0x45   : > { %p5931_p10 = pnand %p5929_p9, %p5926_p8 }
  0x47   : > { %5934 = shalt.err (!%p5931_p10)
}
  0x48   : > { %s5935_s10 = scalar_lea.vmem %s189_s17, 1024  ;;  %p5943_p0 = scmp.lt.s32.totalorder %s189_s17, %s189_s17 }
  0x49   : > { %p5936_p11 = scmp.ne.s32.totalorder %s189_s17, %s5935_s10  ;;  %p5944_p1 = scmp.lt.s32.totalorder %s5935_s10, %s5935_s10 }
  0x4b   : > { %p5938_p12 = pnand %p5936_p11, %p6160_p7  ;;  %p5945_p4 = por %p5944_p1, %p5943_p0 }
  0x4d   : > { %p5939_p13 = pneg %p5938_p12 }
  0x4f   : > { %p5946_p2 = pnand %p5945_p4, %p5939_p13 }
  0x51   : > { %5949 = shalt.err (!%p5946_p2)
}
  0x52   : > { %5741 = dma.hbm_to_vmem [thread:$0]  (!%p6148_p5), %s6415_s0, 1024, %s189_s17, [#allocation4], %s6074_s13, %s6074_s13, %s6075_s14  }
  0x53   : > { %s5950_s29 = scalar_lea.hbm %s6417_s2, 128 }
  0x54   : > { %p5951_p3 = scmp.ne.s32.totalorder %s6417_s2, %s5950_s29  ;;  %p5957_p9 = scmp.lt.u32.totalorder %s5950_s29, %s6417_s2 }
  0x56   : > { %p5953_p6 = pnand %p5951_p3, %p6160_p7 }
  0x58   : > { %p5954_p8 = pneg %p5953_p6 }
  0x5a   : > { %p5959_p10 = pnand %p5957_p9, %p5954_p8 }
  0x5c   : > { %5962 = shalt.err (!%p5959_p10)
}
  0x5d   : > { %s5963_s27 = scalar_lea.vmem %s216_s26, 128  ;;  %p5971_p0 = scmp.lt.s32.totalorder %s216_s26, %s216_s26 }
  0x5e   : > { %p5964_p11 = scmp.ne.s32.totalorder %s216_s26, %s5963_s27  ;;  %p5972_p1 = scmp.lt.s32.totalorder %s5963_s27, %s5963_s27 }
  0x60   : > { %p5966_p12 = pnand %p5964_p11, %p6160_p7  ;;  %p5973_p4 = por %p5972_p1, %p5971_p0 }
  0x62   : > { %p5967_p13 = pneg %p5966_p12 }
  0x64   : > { %p5974_p2 = pnand %p5973_p4, %p5967_p13 }
  0x66   : > { %5977 = shalt.err (!%p5974_p2)
}
  0x67   : > { %5747 = dma.hbm_to_vmem [thread:$0]  (!%p6148_p5), %s6417_s2, 128, %s216_s26, [#allocation7]  }
  0x68   : > { %s6080_s17 = smov [#allocation11]   ;;  %s5978_s12 = scalar_lea.hbm %s6419_s4, 16 }
  0x69   : > { %s239_s8 = sshll.u32 %s6080_s17, 4  ;;  %p5979_p3 = scmp.ne.s32.totalorder %s6419_s4, %s5978_s12  ;;  %s240_s8 = int_to_ptr.vmem [resolvable:$true] %s239_s8 }
  0x6a   : > { %p5985_p9 = scmp.lt.u32.totalorder %s5978_s12, %s6419_s4 }
  0x6b   : > { %p5981_p6 = pnand %p5979_p3, %p6160_p7 }
  0x6d   : > { %p5982_p8 = pneg %p5981_p6 }
  0x6f   : > { %p5987_p10 = pnand %p5985_p9, %p5982_p8 }
  0x71   : > { %5990 = shalt.err (!%p5987_p10)
}
  0x72   : > { %s5991_s26 = scalar_lea.vmem %s240_s8, 16  ;;  %s5998_s6 = scalar_lea.vmem %s240_s8, 32 }
  0x73   : > { %p5992_p11 = scmp.ne.s32.totalorder %s240_s8, %s5991_s26  ;;  %p5999_p0 = scmp.lt.s32.totalorder %s240_s8, %s240_s8 }
  0x74   : > { %p6000_p1 = scmp.lt.s32.totalorder %s5998_s6, %s5991_s26 }
  0x75   : > { %p5994_p12 = pnand %p5992_p11, %p6160_p7 }
  0x76   : > { %p6001_p4 = por %p6000_p1, %p5999_p0 }
  0x77   : > { %p5995_p13 = pneg %p5994_p12 }
  0x79   : > { %p6002_p2 = pnand %p6001_p4, %p5995_p13 }
  0x7b   : > { %6005 = shalt.err (!%p6002_p2)
}
  0x7c   : > { %5753 = dma.hbm_to_vmem [thread:$0]  (!%p6148_p5), %s6419_s4, 16, %s240_s8, [#allocation10]  }
  0x7d   : > { %p6428_p3 = scmp.ne.s32.totalorder %s6425_s23, 0 }
  0x7e   : > { %p6429_p6 = scmp.ne.s32.totalorder (!%p6428_p3), %s6424_s22, 0 }
  0x7f   : > { %252 = sbr.rel (%p6428_p3) target bundleno = 1191 (0x4a7), region = 40 }
  0x86   : > { %6045 = dma.done.wait (%p6429_p6), [#allocation4], 1024  }
  0x87   : > { %6047 = vsyncadd (%p6429_p6), [#allocation4], 4294966272 }
  0x88   : > { %6049 = dma.done.wait (%p6429_p6), [#allocation7], 65664  }
  0x89   : > { %6051 = vsyncadd (%p6429_p6), [#allocation7], 4294901632 }
  0x8a   : > { %6053 = dma.done.wait (%p6429_p6), [#allocation10], 8208  }
  0x8b   : > { %6055 = vsyncadd (%p6429_p6), [#allocation10], 4294959088  ;;  %p4971_p5 = scmp.ne.s32.totalorder %s6062_s18, 0 }
  0x8c   : > { %v301_v0 = vld [vmem:[#allocation6] sm:$0xff] (!%p4971_p5)  ;;  %v302_v2 = vld [vmem:[#allocation6 + $0x8] sm:$0xff] (!%p4971_p5) }
  0x8d   : > { %292 = sbr.rel (%p4971_p5) target bundleno = 876 (0x36c), region = 64  ;;  %v305_v1 = vld [vmem:[#allocation6 + $0x20] sm:$0xff] (!%p4971_p5)  ;;  %v306_v4 = vld [vmem:[#allocation6 + $0x28] sm:$0xff] (!%p4971_p5) }
  0x8e   : > { %v4981_v3 = vcombine.high (!%p4971_p5), %v301_v0, %v305_v1  ;;  %v4980_v5 = vcombine.low (!%p4971_p5), %v301_v0, %v305_v1  ;;  %v309_v6 = vld [vmem:[#allocation6 + $0x40] sm:$0xff] (!%p4971_p5)  ;;  %v4983_v8 = vcombine.high (!%p4971_p5), %v302_v2, %v306_v4  ;;  %v4982_v9 = vcombine.low (!%p4971_p5), %v302_v2, %v306_v4  ;;  %v310_v11 = vld [vmem:[#allocation6 + $0x48] sm:$0xff] (!%p4971_p5) }
  0x8f   : > { %v313_v7 = vld [vmem:[#allocation6 + $0x60] sm:$0xff] (!%p4971_p5)  ;;  %v314_v12 = vld [vmem:[#allocation6 + $0x68] sm:$0xff] (!%p4971_p5) }
  0x90   : > { %v4989_v10 = vcombine.high (!%p4971_p5), %v309_v6, %v313_v7  ;;  %v317_v13 = vld [vmem:[#allocation6 + $0x80] sm:$0xff] (!%p4971_p5)  ;;  %3455 = vmatprep.subr.bf16.mxu0 (!%p4971_p5), %v4981_v3  ;;  %v4991_v14 = vcombine.high (!%p4971_p5), %v310_v11, %v314_v12  ;;  %v318_v16 = vld [vmem:[#allocation6 + $0x88] sm:$0xff] (!%p4971_p5)  ;;  %3627 = vmatprep.subr.bf16.mxu1 (!%p4971_p5), %v4983_v8  ;;  %v4988_v18 = vcombine.low (!%p4971_p5), %v309_v6, %v313_v7 }
  0x91   : > { %v321_v15 = vld [vmem:[#allocation6 + $0xa0] sm:$0xff] (!%p4971_p5)  ;;  %v322_v17 = vld [vmem:[#allocation6 + $0xa8] sm:$0xff] (!%p4971_p5)  ;;  %3456 = vmatpush1.bf16.msra.mxu0 (!%p4971_p5), %v4980_v5  ;;  %3628 = vmatpush1.bf16.msra.mxu1 (!%p4971_p5), %v4982_v9  ;;  %v4990_v19 = vcombine.low (!%p4971_p5), %v310_v11, %v314_v12 }
  0x92   : > { %3457 = vmatprep.subr.bf16.mxu0 (!%p4971_p5), %v4989_v10  ;;  %v4997_v20 = vcombine.high (!%p4971_p5), %v317_v13, %v321_v15  ;;  %3629 = vmatprep.subr.bf16.mxu1 (!%p4971_p5), %v4991_v14  ;;  %v4999_v21 = vcombine.high (!%p4971_p5), %v318_v16, %v322_v17  ;;  %v325_v22 = vld [vmem:[#allocation6 + $0xc0] sm:$0xff] (!%p4971_p5)  ;;  %v326_v24 = vld [vmem:[#allocation6 + $0xc8] sm:$0xff] (!%p4971_p5)  ;;  %v4996_v26 = vcombine.low (!%p4971_p5), %v317_v13, %v321_v15 }
  0x93   : > { %v329_v23 = vld [vmem:[#allocation6 + $0xe0] sm:$0xff] (!%p4971_p5)  ;;  %v330_v25 = vld [vmem:[#allocation6 + $0xe8] sm:$0xff] (!%p4971_p5)  ;;  %v4998_v27 = vcombine.low (!%p4971_p5), %v318_v16, %v322_v17 }
  0x94   : > { %v5005_v28 = vcombine.high %v325_v22, %v329_v23  ;;  %v5007_v29 = vcombine.high %v326_v24, %v330_v25  ;;  %v333_v30 = vld [vmem:[#allocation6 + $0x100] sm:$0xff]  ;;  %v334_v32 = vld [vmem:[#allocation6 + $0x108] sm:$0xff]  ;;  %v5004_v34 = vcombine.low %v325_v22, %v329_v23  ;;  %v5006_v35 = vcombine.low %v326_v24, %v330_v25 }
  0x95   : > { %3458 = vmatpush1.bf16.msra.mxu0 %v4988_v18  ;;  %3630 = vmatpush1.bf16.msra.mxu1 %v4990_v19  ;;  %v337_v31 = vld [vmem:[#allocation6 + $0x120] sm:$0xff]  ;;  %v338_v33 = vld [vmem:[#allocation6 + $0x128] sm:$0xff] }
  0x96   : > { %3459 = vmatprep.subr.bf16.mxu0 %v4997_v20  ;;  %3631 = vmatprep.subr.bf16.mxu1 %v4999_v21  ;;  %v5013_v36 = vcombine.high %v333_v30, %v337_v31  ;;  %v5015_v37 = vcombine.high %v334_v32, %v338_v33  ;;  %v341_v38 = vld [vmem:[#allocation6 + $0x140] sm:$0xff]  ;;  %v342_v40 = vld [vmem:[#allocation6 + $0x148] sm:$0xff]  ;;  %v5012_v42 = vcombine.low %v333_v30, %v337_v31 }
  0x97   : > { %v345_v39 = vld [vmem:[#allocation6 + $0x160] sm:$0xff]  ;;  %v346_v41 = vld [vmem:[#allocation6 + $0x168] sm:$0xff]  ;;  %v5014_v43 = vcombine.low %v334_v32, %v338_v33 }
  0x98   : > { %v5021_v44 = vcombine.high %v341_v38, %v345_v39  ;;  %v5023_v45 = vcombine.high %v342_v40, %v346_v41  ;;  %v349_v46 = vld [vmem:[#allocation6 + $0x180] sm:$0xff]  ;;  %v350_v48 = vld [vmem:[#allocation6 + $0x188] sm:$0xff]  ;;  %v5020_v50 = vcombine.low %v341_v38, %v345_v39  ;;  %v5022_v51 = vcombine.low %v342_v40, %v346_v41 }
  0x99   : > { %3460 = vmatpush1.bf16.msra.mxu0 %v4996_v26  ;;  %3632 = vmatpush1.bf16.msra.mxu1 %v4998_v27  ;;  %v353_v47 = vld [vmem:[#allocation6 + $0x1a0] sm:$0xff]  ;;  %v354_v49 = vld [vmem:[#allocation6 + $0x1a8] sm:$0xff] }
  0x9a   : > { %3461 = vmatprep.subr.bf16.mxu0 %v5005_v28  ;;  %3633 = vmatprep.subr.bf16.mxu1 %v5007_v29  ;;  %v5029_v52 = vcombine.high %v349_v46, %v353_v47  ;;  %v6277_v53 = vld [vmem:[#allocation3] sm:$0xff]  ;;  %v5031_v55 = vcombine.high %v350_v48, %v354_v49  ;;  %v358_v59 = vld [vmem:[#allocation6 + $0x1c8] sm:$0xff]  ;;  %v5028_v61 = vcombine.low %v349_v46, %v353_v47 }
  0x9b   : > { %v6279_v54 = vld [vmem:[#allocation3 + $0x20] sm:$0xff]  ;;  %v362_v60 = vld [vmem:[#allocation6 + $0x1e8] sm:$0xff]  ;;  %v5030_v62 = vcombine.low %v350_v48, %v354_v49 }
  0x9c   : > { %v357_v56 = vld [vmem:[#allocation6 + $0x1c0] sm:$0xff]  ;;  %v6283_v58 = vcombine.high %v6277_v53, %v6279_v54  ;;  %v5039_v0 = vcombine.high %v358_v59, %v362_v60  ;;  %v366_v3 = vld [vmem:[#allocation6 + $0x208] sm:$0xff]  ;;  %v5038_v6 = vcombine.low %v358_v59, %v362_v60 }
  0x9d   : > { %3462 = vmatpush1.bf16.msra.mxu0 %v5004_v34  ;;  %3634 = vmatpush1.bf16.msra.mxu1 %v5006_v35  ;;  %v361_v57 = vld [vmem:[#allocation6 + $0x1e0] sm:$0xff]  ;;  %v370_v4 = vld [vmem:[#allocation6 + $0x228] sm:$0xff] }
  0x9e   : > { %3463 = vmatprep.subr.bf16.mxu0 %v5013_v36  ;;  %3635 = vmatprep.subr.bf16.mxu1 %v5015_v37  ;;  %v5037_v63 = vcombine.high %v357_v56, %v361_v57  ;;  %v365_v1 = vld [vmem:[#allocation6 + $0x200] sm:$0xff]  ;;  %v5036_v5 = vcombine.low %v357_v56, %v361_v57  ;;  %v5047_v8 = vcombine.high %v366_v3, %v370_v4  ;;  %v374_v11 = vld [vmem:[#allocation6 + $0x248] sm:$0xff] }
  0x9f   : > { %3487 = vmatprep.mubr.bf16.mxu0 %v6283_v58  ;;  %v369_v2 = vld [vmem:[#allocation6 + $0x220] sm:$0xff]  ;;  %3659 = vmatprep.mubr.bf16.mxu1 %v6283_v58  ;;  %v378_v12 = vld [vmem:[#allocation6 + $0x268] sm:$0xff]  ;;  %v5046_v14 = vcombine.low %v366_v3, %v370_v4 }
  0xa0   : > { %v5045_v7 = vcombine.high %v365_v1, %v369_v2  ;;  %v373_v9 = vld [vmem:[#allocation6 + $0x240] sm:$0xff]  ;;  %v5044_v13 = vcombine.low %v365_v1, %v369_v2  ;;  %v5055_v16 = vcombine.high %v374_v11, %v378_v12  ;;  %v382_v19 = vld [vmem:[#allocation6 + $0x288] sm:$0xff]  ;;  %v5054_v22 = vcombine.low %v374_v11, %v378_v12 }
  0xa1   : > { %3464 = vmatpush1.bf16.msra.mxu0 %v5012_v42  ;;  %3636 = vmatpush1.bf16.msra.mxu1 %v5014_v43  ;;  %v377_v10 = vld [vmem:[#allocation6 + $0x260] sm:$0xff]  ;;  %v386_v20 = vld [vmem:[#allocation6 + $0x2a8] sm:$0xff] }
  0xa2   : > { %3465 = vmatprep.subr.bf16.mxu0 %v5021_v44  ;;  %3637 = vmatprep.subr.bf16.mxu1 %v5023_v45  ;;  %v5053_v15 = vcombine.high %v373_v9, %v377_v10  ;;  %v381_v17 = vld [vmem:[#allocation6 + $0x280] sm:$0xff]  ;;  %v5052_v21 = vcombine.low %v373_v9, %v377_v10  ;;  %v5063_v24 = vcombine.high %v382_v19, %v386_v20  ;;  %v390_v27 = vld [vmem:[#allocation6 + $0x2c8] sm:$0xff] }
  0xa3   : > { %v385_v18 = vld [vmem:[#allocation6 + $0x2a0] sm:$0xff]  ;;  %v394_v28 = vld [vmem:[#allocation6 + $0x2e8] sm:$0xff]  ;;  %v5062_v30 = vcombine.low %v382_v19, %v386_v20 }
  0xa4   : > { %v5061_v23 = vcombine.high %v381_v17, %v385_v18  ;;  %v389_v25 = vld [vmem:[#allocation6 + $0x2c0] sm:$0xff]  ;;  %v5060_v29 = vcombine.low %v381_v17, %v385_v18  ;;  %v5071_v32 = vcombine.high %v390_v27, %v394_v28  ;;  %v398_v35 = vld [vmem:[#allocation6 + $0x308] sm:$0xff]  ;;  %v5070_v38 = vcombine.low %v390_v27, %v394_v28 }
  0xa5   : > { %3466 = vmatpush1.bf16.msra.mxu0 %v5020_v50  ;;  %3638 = vmatpush1.bf16.msra.mxu1 %v5022_v51  ;;  %v393_v26 = vld [vmem:[#allocation6 + $0x2e0] sm:$0xff]  ;;  %v402_v36 = vld [vmem:[#allocation6 + $0x328] sm:$0xff] }
  0xa6   : > { %3467 = vmatprep.subr.bf16.mxu0 %v5029_v52  ;;  %3639 = vmatprep.subr.bf16.mxu1 %v5031_v55  ;;  %v5069_v31 = vcombine.high %v389_v25, %v393_v26  ;;  %v397_v33 = vld [vmem:[#allocation6 + $0x300] sm:$0xff]  ;;  %v5068_v37 = vcombine.low %v389_v25, %v393_v26  ;;  %v5079_v40 = vcombine.high %v398_v35, %v402_v36  ;;  %v406_v43 = vld [vmem:[#allocation6 + $0x348] sm:$0xff] }
  0xa7   : > { %v401_v34 = vld [vmem:[#allocation6 + $0x320] sm:$0xff]  ;;  %v410_v44 = vld [vmem:[#allocation6 + $0x368] sm:$0xff]  ;;  %v5078_v46 = vcombine.low %v398_v35, %v402_v36 }
  0xa8   : > { %v5077_v39 = vcombine.high %v397_v33, %v401_v34  ;;  %v405_v41 = vld [vmem:[#allocation6 + $0x340] sm:$0xff]  ;;  %v5076_v45 = vcombine.low %v397_v33, %v401_v34  ;;  %v5087_v48 = vcombine.high %v406_v43, %v410_v44  ;;  %v414_v51 = vld [vmem:[#allocation6 + $0x388] sm:$0xff]  ;;  %v5086_v56 = vcombine.low %v406_v43, %v410_v44 }
  0xa9   : > { %3468 = vmatpush1.bf16.msra.mxu0 %v5028_v61  ;;  %3640 = vmatpush1.bf16.msra.mxu1 %v5030_v62  ;;  %v409_v42 = vld [vmem:[#allocation6 + $0x360] sm:$0xff]  ;;  %v418_v52 = vld [vmem:[#allocation6 + $0x3a8] sm:$0xff] }
  0xaa   : > { %3469 = vmatprep.subr.bf16.mxu0 %v5037_v63  ;;  %3641 = vmatprep.subr.bf16.mxu1 %v5039_v0  ;;  %v5085_v47 = vcombine.high %v405_v41, %v409_v42  ;;  %v413_v49 = vld [vmem:[#allocation6 + $0x380] sm:$0xff]  ;;  %v5084_v55 = vcombine.low %v405_v41, %v409_v42  ;;  %v5095_v59 = vcombine.high %v414_v51, %v418_v52  ;;  %v422_v62 = vld [vmem:[#allocation6 + $0x3c8] sm:$0xff] }
  0xab   : > { %v417_v50 = vld [vmem:[#allocation6 + $0x3a0] sm:$0xff]  ;;  %v426_v63 = vld [vmem:[#allocation6 + $0x3e8] sm:$0xff]  ;;  %v5094_v1 = vcombine.low %v414_v51, %v418_v52 }
  0xac   : > { %v5093_v57 = vcombine.high %v413_v49, %v417_v50  ;;  %v421_v60 = vld [vmem:[#allocation6 + $0x3c0] sm:$0xff]  ;;  %v5092_v0 = vcombine.low %v413_v49, %v417_v50  ;;  %v5103_v3 = vcombine.high %v422_v62, %v426_v63  ;;  %v5102_v9 = vcombine.low %v422_v62, %v426_v63  ;;  %v6291_v17 = vld [vmem:[#allocation3 + $0x8] sm:$0xff] }
  0xad   : > { %3470 = vmatpush1.bf16.msra.mxu0 %v5036_v5  ;;  %3642 = vmatpush1.bf16.msra.mxu1 %v5038_v6  ;;  %v425_v61 = vld [vmem:[#allocation6 + $0x3e0] sm:$0xff]  ;;  %v430_v6 = vld [vmem:[#allocation6 + $0x408] sm:$0xff] }
  0xae   : > { %3471 = vmatprep.subr.bf16.mxu0 %v5045_v7  ;;  %3643 = vmatprep.subr.bf16.mxu1 %v5047_v8  ;;  %v5101_v2 = vcombine.high %v421_v60, %v425_v61  ;;  %v429_v4 = vld [vmem:[#allocation6 + $0x400] sm:$0xff]  ;;  %v434_v7 = vld [vmem:[#allocation6 + $0x428] sm:$0xff]  ;;  %v5100_v8 = vcombine.low %v421_v60, %v425_v61 }
  0xaf   : > { %v433_v5 = vld [vmem:[#allocation6 + $0x420] sm:$0xff]  ;;  %v5111_v11 = vcombine.high %v430_v6, %v434_v7  ;;  %v6293_v18 = vld [vmem:[#allocation3 + $0x28] sm:$0xff]  ;;  %v5110_v20 = vcombine.low %v430_v6, %v434_v7 }
  0xb0   : > { %v5109_v10 = vcombine.high %v429_v4, %v433_v5  ;;  %v437_v12 = vld [vmem:[#allocation6 + $0x440] sm:$0xff]  ;;  %v5108_v19 = vcombine.low %v429_v4, %v433_v5  ;;  %v6297_v25 = vcombine.high %v6291_v17, %v6293_v18  ;;  %v458_v33 = vld [vmem:[#allocation6 + $0x4e8] sm:$0xff] }
  0xb1   : > { %3472 = vmatpush1.bf16.msra.mxu0 %v5044_v13  ;;  %3644 = vmatpush1.bf16.msra.mxu1 %v5046_v14  ;;  %v441_v13 = vld [vmem:[#allocation6 + $0x460] sm:$0xff]  ;;  %v438_v14 = vld [vmem:[#allocation6 + $0x448] sm:$0xff] }
  0xb2   : > { %3473 = vmatprep.subr.bf16.mxu0 %v5053_v15  ;;  %3645 = vmatprep.subr.bf16.mxu1 %v5055_v16  ;;  %v6289_v15 = vcombine.low %v6277_v53, %v6279_v54  ;;  %v442_v16 = vld [vmem:[#allocation6 + $0x468] sm:$0xff]  ;;  %v5116_v26 = vcombine.low %v437_v12, %v441_v13 }
  0xb3   : > { %v446_v53 = vld [vmem:[#allocation6 + $0x488] sm:$0xff]  ;;  %v5118_v27 = vcombine.low %v438_v14, %v442_v16 }
  0xb4   : > { %v450_v54 = vld [vmem:[#allocation6 + $0x4a8] sm:$0xff] }
  0xb5   : > { %3474 = vmatpush1.bf16.msra.mxu0 %v5052_v21  ;;  %3646 = vmatpush1.bf16.msra.mxu1 %v5054_v22  ;;  %v5117_v21 = vcombine.high %v437_v12, %v441_v13  ;;  %v5119_v22 = vcombine.high %v438_v14, %v442_v16  ;;  %v5126_v35 = vcombine.low %v446_v53, %v450_v54  ;;  %v466_v41 = vld [vmem:[#allocation6 + $0x528] sm:$0xff] }
  0xb6   : > { %3475 = vmatprep.subr.bf16.mxu0 %v5061_v23  ;;  %3647 = vmatprep.subr.bf16.mxu1 %v5063_v24  ;;  %v445_v23 = vld [vmem:[#allocation6 + $0x480] sm:$0xff]  ;;  %v474_v49 = vld [vmem:[#allocation6 + $0x568] sm:$0xff] }
  0xb7   : > { %v449_v24 = vld [vmem:[#allocation6 + $0x4a0] sm:$0xff]  ;;  %v482_v60 = vld [vmem:[#allocation6 + $0x5a8] sm:$0xff] }
  0xb8   : > { %v5125_v28 = vcombine.high %v445_v23, %v449_v24  ;;  %v5124_v34 = vcombine.low %v445_v23, %v449_v24  ;;  %v490_v4 = vld [vmem:[#allocation6 + $0x5e8] sm:$0xff] }
  0xb9   : > { %3476 = vmatpush1.bf16.msra.mxu0 %v5060_v29  ;;  %3648 = vmatpush1.bf16.msra.mxu1 %v5062_v30  ;;  %v5127_v29 = vcombine.high %v446_v53, %v450_v54  ;;  %v453_v30 = vld [vmem:[#allocation6 + $0x4c0] sm:$0xff]  ;;  %v498_v12 = vld [vmem:[#allocation6 + $0x628] sm:$0xff] }
  0xba   : > { %3477 = vmatprep.subr.bf16.mxu0 %v5069_v31  ;;  %3649 = vmatprep.subr.bf16.mxu1 %v5071_v32  ;;  %v457_v31 = vld [vmem:[#allocation6 + $0x4e0] sm:$0xff]  ;;  %v454_v32 = vld [vmem:[#allocation6 + $0x4c8] sm:$0xff] }
  0xbb   : > { %v5133_v36 = vcombine.high %v453_v30, %v457_v31  ;;  %v5132_v42 = vcombine.low %v453_v30, %v457_v31  ;;  %v5134_v43 = vcombine.low %v454_v32, %v458_v33  ;;  %v506_v23 = vld [vmem:[#allocation6 + $0x668] sm:$0xff] }
  0xbc   : > { %v514_v30 = vld [vmem:[#allocation6 + $0x6a8] sm:$0xff] }
  0xbd   : > { %3478 = vmatpush1.bf16.msra.mxu0 %v5068_v37  ;;  %3650 = vmatpush1.bf16.msra.mxu1 %v5070_v38  ;;  %v5135_v37 = vcombine.high %v454_v32, %v458_v33  ;;  %v461_v38 = vld [vmem:[#allocation6 + $0x500] sm:$0xff] }
  0xbe   : > { %3479 = vmatprep.subr.bf16.mxu0 %v5077_v39  ;;  %3651 = vmatprep.subr.bf16.mxu1 %v5079_v40  ;;  %v465_v39 = vld [vmem:[#allocation6 + $0x520] sm:$0xff]  ;;  %v462_v40 = vld [vmem:[#allocation6 + $0x508] sm:$0xff] }
  0xbf   : > { %v5141_v44 = vcombine.high %v461_v38, %v465_v39  ;;  %v5140_v50 = vcombine.low %v461_v38, %v465_v39  ;;  %v5142_v51 = vcombine.low %v462_v40, %v466_v41  ;;  %v522_v38 = vld [vmem:[#allocation6 + $0x6e8] sm:$0xff] }
  0xc1   : > { %3480 = vmatpush1.bf16.msra.mxu0 %v5076_v45  ;;  %3652 = vmatpush1.bf16.msra.mxu1 %v5078_v46  ;;  %v5143_v45 = vcombine.high %v462_v40, %v466_v41  ;;  %v469_v46 = vld [vmem:[#allocation6 + $0x540] sm:$0xff] }
  0xc2   : > { %3481 = vmatprep.subr.bf16.mxu0 %v5085_v47  ;;  %3653 = vmatprep.subr.bf16.mxu1 %v5087_v48  ;;  %v473_v47 = vld [vmem:[#allocation6 + $0x560] sm:$0xff]  ;;  %v470_v48 = vld [vmem:[#allocation6 + $0x548] sm:$0xff] }
  0xc3   : > { %v5149_v52 = vcombine.high %v469_v46, %v473_v47  ;;  %v5148_v61 = vcombine.low %v469_v46, %v473_v47  ;;  %v5150_v62 = vcombine.low %v470_v48, %v474_v49  ;;  %v530_v46 = vld [vmem:[#allocation6 + $0x728] sm:$0xff] }
  0xc5   : > { %3482 = vmatpush1.bf16.msra.mxu0 %v5084_v55  ;;  %3654 = vmatpush1.bf16.msra.mxu1 %v5086_v56  ;;  %v5151_v55 = vcombine.high %v470_v48, %v474_v49  ;;  %v477_v56 = vld [vmem:[#allocation6 + $0x580] sm:$0xff] }
  0xc6   : > { %3483 = vmatprep.subr.bf16.mxu0 %v5093_v57  ;;  %3655 = vmatprep.subr.bf16.mxu1 %v5095_v59  ;;  %v481_v57 = vld [vmem:[#allocation6 + $0x5a0] sm:$0xff]  ;;  %v478_v59 = vld [vmem:[#allocation6 + $0x588] sm:$0xff] }
  0xc7   : > { %v5157_v63 = vcombine.high %v477_v56, %v481_v57  ;;  %v5156_v5 = vcombine.low %v477_v56, %v481_v57  ;;  %v5158_v6 = vcombine.low %v478_v59, %v482_v60  ;;  %v538_v56 = vld [vmem:[#allocation6 + $0x768] sm:$0xff] }
  0xc9   : > { %3484 = vmatpush1.bf16.msra.mxu0 %v5092_v0  ;;  %3656 = vmatpush1.bf16.msra.mxu1 %v5094_v1  ;;  %v5159_v0 = vcombine.high %v478_v59, %v482_v60  ;;  %v485_v1 = vld [vmem:[#allocation6 + $0x5c0] sm:$0xff] }
  0xca   : > { %3485 = vmatprep.subr.bf16.mxu0 %v5101_v2  ;;  %3657 = vmatprep.subr.bf16.mxu1 %v5103_v3  ;;  %v489_v2 = vld [vmem:[#allocation6 + $0x5e0] sm:$0xff]  ;;  %v486_v3 = vld [vmem:[#allocation6 + $0x5c8] sm:$0xff] }
  0xcb   : > { %v5165_v7 = vcombine.high %v485_v1, %v489_v2  ;;  %v5164_v13 = vcombine.low %v485_v1, %v489_v2  ;;  %v5166_v14 = vcombine.low %v486_v3, %v490_v4  ;;  %v546_v1 = vld [vmem:[#allocation6 + $0x7a8] sm:$0xff] }
  0xcd   : > { %3486 = vmatpush1.bf16.msra.mxu0 %v5100_v8  ;;  %3658 = vmatpush1.bf16.msra.mxu1 %v5102_v9  ;;  %v5167_v8 = vcombine.high %v486_v3, %v490_v4  ;;  %v493_v9 = vld [vmem:[#allocation6 + $0x600] sm:$0xff] }
  0xce   : > { %3498 = vmatprep.subr.bf16.mxu0 %v5109_v10  ;;  %3670 = vmatprep.subr.bf16.mxu1 %v5111_v11  ;;  %v497_v10 = vld [vmem:[#allocation6 + $0x620] sm:$0xff]  ;;  %v494_v11 = vld [vmem:[#allocation6 + $0x608] sm:$0xff] }
  0xcf   : > { %v5173_v16 = vcombine.high %v493_v9, %v497_v10  ;;  %v5172_v24 = vcombine.low %v493_v9, %v497_v10  ;;  %v5174_v53 = vcombine.low %v494_v11, %v498_v12  ;;  %v554_v9 = vld [vmem:[#allocation6 + $0x7e8] sm:$0xff] }
  0xd0   : > { %3488 = vmatmul.mubr.bf16.vlgmr.msra.gmra.mrb[0].mxu0 %v6289_v15  ;;  %3660 = vmatmul.mubr.bf16.vlgmr.msra.gmra.mrb[0].mxu1 %v6289_v15 }
  0xd1   : > { %3499 = vmatpush1.bf16.msra.mxu0 %v5108_v19  ;;  %3671 = vmatpush1.bf16.msra.mxu1 %v5110_v20  ;;  %v5175_v19 = vcombine.high %v494_v11, %v498_v12  ;;  %v501_v20 = vld [vmem:[#allocation6 + $0x640] sm:$0xff] }
  0xd2   : > { %3500 = vmatprep.subr.bf16.mxu0 %v5117_v21  ;;  %3672 = vmatprep.subr.bf16.mxu1 %v5119_v22  ;;  %v505_v21 = vld [vmem:[#allocation6 + $0x660] sm:$0xff]  ;;  %v502_v22 = vld [vmem:[#allocation6 + $0x648] sm:$0xff] }
  0xd3   : > { %3530 = vmatprep.mubr.bf16.mxu0 %v6297_v25  ;;  %3702 = vmatprep.mubr.bf16.mxu1 %v6297_v25  ;;  %v5181_v54 = vcombine.high %v501_v20, %v505_v21  ;;  %v5180_v31 = vcombine.low %v501_v20, %v505_v21  ;;  %v5182_v32 = vcombine.low %v502_v22, %v506_v23  ;;  %v562_v20 = vld [vmem:[#allocation6 + $0x828] sm:$0xff] }
  0xd5   : > { %3501 = vmatpush1.bf16.msra.mxu0 %v5116_v26  ;;  %3673 = vmatpush1.bf16.msra.mxu1 %v5118_v27  ;;  %v5183_v26 = vcombine.high %v502_v22, %v506_v23  ;;  %v509_v27 = vld [vmem:[#allocation6 + $0x680] sm:$0xff] }
  0xd6   : > { %3502 = vmatprep.subr.bf16.mxu0 %v5125_v28  ;;  %3674 = vmatprep.subr.bf16.mxu1 %v5127_v29  ;;  %v513_v28 = vld [vmem:[#allocation6 + $0x6a0] sm:$0xff]  ;;  %v510_v29 = vld [vmem:[#allocation6 + $0x688] sm:$0xff] }
  0xd7   : > { %v5189_v33 = vcombine.high %v509_v27, %v513_v28  ;;  %v5188_v39 = vcombine.low %v509_v27, %v513_v28  ;;  %v5190_v40 = vcombine.low %v510_v29, %v514_v30  ;;  %v6305_v27 = vcombine.low %v6291_v17, %v6293_v18  ;;  %v570_v28 = vld [vmem:[#allocation6 + $0x868] sm:$0xff] }
  0xd8   : > { %v574_v17 = vld [vmem:[#allocation6 + $0x888] sm:$0xff] }
  0xd9   : > { %3503 = vmatpush1.bf16.msra.mxu0 %v5124_v34  ;;  %3675 = vmatpush1.bf16.msra.mxu1 %v5126_v35  ;;  %v5191_v34 = vcombine.high %v510_v29, %v514_v30  ;;  %v517_v35 = vld [vmem:[#allocation6 + $0x6c0] sm:$0xff]  ;;  %v6307_v29 = vld [vmem:[#allocation3 + $0x10] sm:$0xff]  ;;  %v578_v18 = vld [vmem:[#allocation6 + $0x8a8] sm:$0xff] }
  0xda   : > { %3504 = vmatprep.subr.bf16.mxu0 %v5133_v36  ;;  %3676 = vmatprep.subr.bf16.mxu1 %v5135_v37  ;;  %v521_v36 = vld [vmem:[#allocation6 + $0x6e0] sm:$0xff]  ;;  %v518_v37 = vld [vmem:[#allocation6 + $0x6c8] sm:$0xff]  ;;  %v6309_v30 = vld [vmem:[#allocation3 + $0x30] sm:$0xff] }
  0xdb   : > { %v5197_v41 = vcombine.high %v517_v35, %v521_v36  ;;  %v5196_v47 = vcombine.low %v517_v35, %v521_v36  ;;  %v5198_v48 = vcombine.low %v518_v37, %v522_v38  ;;  %v573_v35 = vld [vmem:[#allocation6 + $0x880] sm:$0xff] }
  0xdc   : > { %v577_v36 = vld [vmem:[#allocation6 + $0x8a0] sm:$0xff] }
  0xdd   : > { %3505 = vmatpush1.bf16.msra.mxu0 %v5132_v42  ;;  %3677 = vmatpush1.bf16.msra.mxu1 %v5134_v43  ;;  %v5199_v42 = vcombine.high %v518_v37, %v522_v38  ;;  %v525_v43 = vld [vmem:[#allocation6 + $0x700] sm:$0xff]  ;;  %v6313_v37 = vcombine.high %v6307_v29, %v6309_v30 }
  0xde   : > { %3506 = vmatprep.subr.bf16.mxu0 %v5141_v44  ;;  %3678 = vmatprep.subr.bf16.mxu1 %v5143_v45  ;;  %v529_v44 = vld [vmem:[#allocation6 + $0x720] sm:$0xff]  ;;  %v526_v45 = vld [vmem:[#allocation6 + $0x708] sm:$0xff] }
  0xdf   : > { %v5205_v49 = vcombine.high %v525_v43, %v529_v44  ;;  %v5204_v57 = vcombine.low %v525_v43, %v529_v44  ;;  %v5206_v59 = vcombine.low %v526_v45, %v530_v46  ;;  %v585_v43 = vld [vmem:[#allocation6 + $0x8e0] sm:$0xff]  ;;  %v582_v44 = vld [vmem:[#allocation6 + $0x8c8] sm:$0xff] }
  0xe1   : > { %3507 = vmatpush1.bf16.msra.mxu0 %v5140_v50  ;;  %3679 = vmatpush1.bf16.msra.mxu1 %v5142_v51  ;;  %v5207_v50 = vcombine.high %v526_v45, %v530_v46  ;;  %v533_v51 = vld [vmem:[#allocation6 + $0x740] sm:$0xff]  ;;  %v586_v45 = vld [vmem:[#allocation6 + $0x8e8] sm:$0xff]  ;;  %v5252_v46 = vcombine.low %v573_v35, %v577_v36 }
  0xe2   : > { %3508 = vmatprep.subr.bf16.mxu0 %v5149_v52  ;;  %3680 = vmatprep.subr.bf16.mxu1 %v5151_v55  ;;  %v537_v52 = vld [vmem:[#allocation6 + $0x760] sm:$0xff]  ;;  %v534_v55 = vld [vmem:[#allocation6 + $0x748] sm:$0xff] }
  0xe3   : > { %v5213_v60 = vcombine.high %v533_v51, %v537_v52  ;;  %v5212_v2 = vcombine.low %v533_v51, %v537_v52  ;;  %v5214_v3 = vcombine.low %v534_v55, %v538_v56  ;;  %v593_v51 = vld [vmem:[#allocation6 + $0x920] sm:$0xff]  ;;  %v590_v52 = vld [vmem:[#allocation6 + $0x908] sm:$0xff] }
  0xe5   : > { %3509 = vmatpush1.bf16.msra.mxu0 %v5148_v61  ;;  %3681 = vmatpush1.bf16.msra.mxu1 %v5150_v62  ;;  %v5215_v61 = vcombine.high %v534_v55, %v538_v56  ;;  %v541_v62 = vld [vmem:[#allocation6 + $0x780] sm:$0xff]  ;;  %v594_v55 = vld [vmem:[#allocation6 + $0x928] sm:$0xff] }
  0xe6   : > { %3510 = vmatprep.subr.bf16.mxu0 %v5157_v63  ;;  %3682 = vmatprep.subr.bf16.mxu1 %v5159_v0  ;;  %v545_v63 = vld [vmem:[#allocation6 + $0x7a0] sm:$0xff]  ;;  %v542_v0 = vld [vmem:[#allocation6 + $0x788] sm:$0xff] }
  0xe7   : > { %v5221_v4 = vcombine.high %v541_v62, %v545_v63  ;;  %v5220_v10 = vcombine.low %v541_v62, %v545_v63  ;;  %v5222_v11 = vcombine.low %v542_v0, %v546_v1  ;;  %v601_v62 = vld [vmem:[#allocation6 + $0x960] sm:$0xff]  ;;  %v598_v63 = vld [vmem:[#allocation6 + $0x948] sm:$0xff] }
  0xe9   : > { %3511 = vmatpush1.bf16.msra.mxu0 %v5156_v5  ;;  %3683 = vmatpush1.bf16.msra.mxu1 %v5158_v6  ;;  %v5223_v5 = vcombine.high %v542_v0, %v546_v1  ;;  %v549_v6 = vld [vmem:[#allocation6 + $0x7c0] sm:$0xff]  ;;  %v602_v0 = vld [vmem:[#allocation6 + $0x968] sm:$0xff] }
  0xea   : > { %3512 = vmatprep.subr.bf16.mxu0 %v5165_v7  ;;  %3684 = vmatprep.subr.bf16.mxu1 %v5167_v8  ;;  %v553_v7 = vld [vmem:[#allocation6 + $0x7e0] sm:$0xff]  ;;  %v550_v8 = vld [vmem:[#allocation6 + $0x7c8] sm:$0xff] }
  0xeb   : > { %v5229_v12 = vcombine.high %v549_v6, %v553_v7  ;;  %v5228_v21 = vcombine.low %v549_v6, %v553_v7  ;;  %v5230_v22 = vcombine.low %v550_v8, %v554_v9  ;;  %v609_v6 = vld [vmem:[#allocation6 + $0x9a0] sm:$0xff]  ;;  %v606_v7 = vld [vmem:[#allocation6 + $0x988] sm:$0xff] }
  0xed   : > { %3513 = vmatpush1.bf16.msra.mxu0 %v5164_v13  ;;  %3685 = vmatpush1.bf16.msra.mxu1 %v5166_v14  ;;  %v5231_v13 = vcombine.high %v550_v8, %v554_v9  ;;  %v557_v14 = vld [vmem:[#allocation6 + $0x800] sm:$0xff]  ;;  %v610_v8 = vld [vmem:[#allocation6 + $0x9a8] sm:$0xff] }
  0xee   : > { %3514 = vmatprep.subr.bf16.mxu0 %v5173_v16  ;;  %3686 = vmatprep.subr.bf16.mxu1 %v5175_v19  ;;  %v561_v16 = vld [vmem:[#allocation6 + $0x820] sm:$0xff]  ;;  %v558_v19 = vld [vmem:[#allocation6 + $0x808] sm:$0xff] }
  0xef   : > { %v5237_v23 = vcombine.high %v557_v14, %v561_v16 }
  0xf1   : > { %3515 = vmatpush1.bf16.msra.mxu0 %v5172_v24  ;;  %3687 = vmatpush1.bf16.msra.mxu1 %v5174_v53  ;;  %v5239_v24 = vcombine.high %v558_v19, %v562_v20  ;;  %v565_v53 = vld [vmem:[#allocation6 + $0x840] sm:$0xff] }
  0xf2   : > { %3516 = vmatprep.subr.bf16.mxu0 %v5181_v54  ;;  %3688 = vmatprep.subr.bf16.mxu1 %v5183_v26  ;;  %v569_v54 = vld [vmem:[#allocation6 + $0x860] sm:$0xff]  ;;  %v566_v26 = vld [vmem:[#allocation6 + $0x848] sm:$0xff] }
  0xf3   : > { %v5244_v38 = vcombine.low %v565_v53, %v569_v54 }
  0xf5   : > { %3517 = vmatpush1.bf16.msra.mxu0 %v5180_v31  ;;  %3689 = vmatpush1.bf16.msra.mxu1 %v5182_v32  ;;  %v5236_v31 = vcombine.low %v557_v14, %v561_v16  ;;  %v5238_v32 = vcombine.low %v558_v19, %v562_v20  ;;  %v617_v14 = vld [vmem:[#allocation6 + $0x9e0] sm:$0xff]  ;;  %v614_v16 = vld [vmem:[#allocation6 + $0x9c8] sm:$0xff] }
  0xf6   : > { %3518 = vmatprep.subr.bf16.mxu0 %v5189_v33  ;;  %3690 = vmatprep.subr.bf16.mxu1 %v5191_v34  ;;  %v5245_v33 = vcombine.high %v565_v53, %v569_v54  ;;  %v5247_v34 = vcombine.high %v566_v26, %v570_v28  ;;  %v618_v19 = vld [vmem:[#allocation6 + $0x9e8] sm:$0xff]  ;;  %v625_v53 = vld [vmem:[#allocation6 + $0xa20] sm:$0xff] }
  0xf7   : > { %v622_v54 = vld [vmem:[#allocation6 + $0xa08] sm:$0xff] }
  0xf9   : > { %3519 = vmatpush1.bf16.msra.mxu0 %v5188_v39  ;;  %3691 = vmatpush1.bf16.msra.mxu1 %v5190_v40  ;;  %v5246_v39 = vcombine.low %v566_v26, %v570_v28  ;;  %v5253_v40 = vcombine.high %v573_v35, %v577_v36  ;;  %v626_v26 = vld [vmem:[#allocation6 + $0xa28] sm:$0xff]  ;;  %v633_v35 = vld [vmem:[#allocation6 + $0xa60] sm:$0xff] }
  0xfa   : > { %3520 = vmatprep.subr.bf16.mxu0 %v5197_v41  ;;  %3692 = vmatprep.subr.bf16.mxu1 %v5199_v42  ;;  %v5255_v41 = vcombine.high %v574_v17, %v578_v18  ;;  %v581_v42 = vld [vmem:[#allocation6 + $0x8c0] sm:$0xff]  ;;  %v630_v36 = vld [vmem:[#allocation6 + $0xa48] sm:$0xff] }
  0xfb   : > { %v5260_v56 = vcombine.low %v581_v42, %v585_v43 }
  0xfd   : > { %3521 = vmatpush1.bf16.msra.mxu0 %v5196_v47  ;;  %3693 = vmatpush1.bf16.msra.mxu1 %v5198_v48  ;;  %v5254_v47 = vcombine.low %v574_v17, %v578_v18  ;;  %v5261_v48 = vcombine.high %v581_v42, %v585_v43  ;;  %v634_v17 = vld [vmem:[#allocation6 + $0xa68] sm:$0xff]  ;;  %v641_v42 = vld [vmem:[#allocation6 + $0xaa0] sm:$0xff] }
  0xfe   : > { %3522 = vmatprep.subr.bf16.mxu0 %v5205_v49  ;;  %3694 = vmatprep.subr.bf16.mxu1 %v5207_v50  ;;  %v5263_v49 = vcombine.high %v582_v44, %v586_v45  ;;  %v589_v50 = vld [vmem:[#allocation6 + $0x900] sm:$0xff]  ;;  %v638_v43 = vld [vmem:[#allocation6 + $0xa88] sm:$0xff] }
  0xff   : > { %v5268_v1 = vcombine.low %v589_v50, %v593_v51 }
 0x101   : > { %3523 = vmatpush1.bf16.msra.mxu0 %v5204_v57  ;;  %3695 = vmatpush1.bf16.msra.mxu1 %v5206_v59  ;;  %v5262_v57 = vcombine.low %v582_v44, %v586_v45  ;;  %v5269_v59 = vcombine.high %v589_v50, %v593_v51  ;;  %v642_v44 = vld [vmem:[#allocation6 + $0xaa8] sm:$0xff]  ;;  %v649_v50 = vld [vmem:[#allocation6 + $0xae0] sm:$0xff] }
 0x102   : > { %3524 = vmatprep.subr.bf16.mxu0 %v5213_v60  ;;  %3696 = vmatprep.subr.bf16.mxu1 %v5215_v61  ;;  %v5271_v60 = vcombine.high %v590_v52, %v594_v55  ;;  %v597_v61 = vld [vmem:[#allocation6 + $0x940] sm:$0xff]  ;;  %v646_v51 = vld [vmem:[#allocation6 + $0xac8] sm:$0xff] }
 0x103   : > { %v5276_v9 = vcombine.low %v597_v61, %v601_v62 }
 0x105   : > { %3525 = vmatpush1.bf16.msra.mxu0 %v5212_v2  ;;  %3697 = vmatpush1.bf16.msra.mxu1 %v5214_v3  ;;  %v5270_v2 = vcombine.low %v590_v52, %v594_v55  ;;  %v5277_v3 = vcombine.high %v597_v61, %v601_v62  ;;  %v650_v52 = vld [vmem:[#allocation6 + $0xae8] sm:$0xff]  ;;  %v657_v61 = vld [vmem:[#allocation6 + $0xb20] sm:$0xff] }
 0x106   : > { %3526 = vmatprep.subr.bf16.mxu0 %v5221_v4  ;;  %3698 = vmatprep.subr.bf16.mxu1 %v5223_v5  ;;  %v5279_v4 = vcombine.high %v598_v63, %v602_v0  ;;  %v605_v5 = vld [vmem:[#allocation6 + $0x980] sm:$0xff]  ;;  %v654_v62 = vld [vmem:[#allocation6 + $0xb08] sm:$0xff] }
 0x107   : > { %v5284_v20 = vcombine.low %v605_v5, %v609_v6 }
 0x109   : > { %3527 = vmatpush1.bf16.msra.mxu0 %v5220_v10  ;;  %3699 = vmatpush1.bf16.msra.mxu1 %v5222_v11  ;;  %v5278_v10 = vcombine.low %v598_v63, %v602_v0  ;;  %v5285_v11 = vcombine.high %v605_v5, %v609_v6  ;;  %v658_v63 = vld [vmem:[#allocation6 + $0xb28] sm:$0xff]  ;;  %v665_v5 = vld [vmem:[#allocation6 + $0xb60] sm:$0xff] }
 0x10a   : > { %3528 = vmatprep.subr.bf16.mxu0 %v5229_v12  ;;  %3700 = vmatprep.subr.bf16.mxu1 %v5231_v13  ;;  %v5287_v12 = vcombine.high %v606_v7, %v610_v8  ;;  %v613_v13 = vld [vmem:[#allocation6 + $0x9c0] sm:$0xff]  ;;  %v662_v6 = vld [vmem:[#allocation6 + $0xb48] sm:$0xff] }
 0x10b   : > { %v5292_v28 = vcombine.low %v613_v13, %v617_v14 }
 0x10d   : > { %3529 = vmatpush1.bf16.msra.mxu0 %v5228_v21  ;;  %3701 = vmatpush1.bf16.msra.mxu1 %v5230_v22  ;;  %v5286_v21 = vcombine.low %v606_v7, %v610_v8  ;;  %v5293_v22 = vcombine.high %v613_v13, %v617_v14  ;;  %v666_v7 = vld [vmem:[#allocation6 + $0xb68] sm:$0xff]  ;;  %v673_v13 = vld [vmem:[#allocation6 + $0xba0] sm:$0xff] }
 0x10e   : > { %3541 = vmatprep.subr.bf16.mxu0 %v5237_v23  ;;  %3713 = vmatprep.subr.bf16.mxu1 %v5239_v24  ;;  %v5295_v23 = vcombine.high %v614_v16, %v618_v19  ;;  %v621_v24 = vld [vmem:[#allocation6 + $0xa00] sm:$0xff]  ;;  %v670_v14 = vld [vmem:[#allocation6 + $0xb88] sm:$0xff] }
 0x10f   : > { %v5300_v18 = vcombine.low %v621_v24, %v625_v53 }
 0x110   : > { %3531 = vmatmul.mubr.bf16.vlgmr.msra.gmra.mrb[0].mxu0 %v6305_v27  ;;  %3703 = vmatmul.mubr.bf16.vlgmr.msra.gmra.mrb[0].mxu1 %v6305_v27 }
 0x111   : > { %3542 = vmatpush1.bf16.msra.mxu0 %v5236_v31  ;;  %3714 = vmatpush1.bf16.msra.mxu1 %v5238_v32  ;;  %v5294_v31 = vcombine.low %v614_v16, %v618_v19  ;;  %v5301_v32 = vcombine.high %v621_v24, %v625_v53  ;;  %v674_v16 = vld [vmem:[#allocation6 + $0xba8] sm:$0xff]  ;;  %v681_v24 = vld [vmem:[#allocation6 + $0xbe0] sm:$0xff] }
 0x112   : > { %3543 = vmatprep.subr.bf16.mxu0 %v5245_v33  ;;  %3715 = vmatprep.subr.bf16.mxu1 %v5247_v34  ;;  %v5303_v33 = vcombine.high %v622_v54, %v626_v26  ;;  %v629_v34 = vld [vmem:[#allocation6 + $0xa40] sm:$0xff]  ;;  %v678_v53 = vld [vmem:[#allocation6 + $0xbc8] sm:$0xff] }
 0x113   : > { %3573 = vmatprep.mubr.bf16.mxu0 %v6313_v37  ;;  %3745 = vmatprep.mubr.bf16.mxu1 %v6313_v37  ;;  %v5308_v45 = vcombine.low %v629_v34, %v633_v35 }
 0x115   : > { %3544 = vmatpush1.bf16.msra.mxu0 %v5244_v38  ;;  %3716 = vmatpush1.bf16.msra.mxu1 %v5246_v39  ;;  %v5302_v38 = vcombine.low %v622_v54, %v626_v26  ;;  %v5309_v39 = vcombine.high %v629_v34, %v633_v35  ;;  %v682_v54 = vld [vmem:[#allocation6 + $0xbe8] sm:$0xff]  ;;  %v689_v34 = vld [vmem:[#allocation6 + $0xc20] sm:$0xff] }
 0x116   : > { %3545 = vmatprep.subr.bf16.mxu0 %v5253_v40  ;;  %3717 = vmatprep.subr.bf16.mxu1 %v5255_v41  ;;  %v5311_v40 = vcombine.high %v630_v36, %v634_v17  ;;  %v637_v41 = vld [vmem:[#allocation6 + $0xa80] sm:$0xff]  ;;  %v686_v35 = vld [vmem:[#allocation6 + $0xc08] sm:$0xff] }
 0x117   : > { %v5316_v55 = vcombine.low %v637_v41, %v641_v42 }
 0x119   : > { %3546 = vmatpush1.bf16.msra.mxu0 %v5252_v46  ;;  %3718 = vmatpush1.bf16.msra.mxu1 %v5254_v47  ;;  %v5310_v46 = vcombine.low %v630_v36, %v634_v17  ;;  %v5317_v47 = vcombine.high %v637_v41, %v641_v42  ;;  %v690_v36 = vld [vmem:[#allocation6 + $0xc28] sm:$0xff]  ;;  %v697_v41 = vld [vmem:[#allocation6 + $0xc60] sm:$0xff] }
 0x11a   : > { %3547 = vmatprep.subr.bf16.mxu0 %v5261_v48  ;;  %3719 = vmatprep.subr.bf16.mxu1 %v5263_v49  ;;  %v5319_v48 = vcombine.high %v638_v43, %v642_v44  ;;  %v645_v49 = vld [vmem:[#allocation6 + $0xac0] sm:$0xff]  ;;  %v694_v42 = vld [vmem:[#allocation6 + $0xc48] sm:$0xff] }
 0x11b   : > { %v5324_v0 = vcombine.low %v645_v49, %v649_v50 }
 0x11d   : > { %3548 = vmatpush1.bf16.msra.mxu0 %v5260_v56  ;;  %3720 = vmatpush1.bf16.msra.mxu1 %v5262_v57  ;;  %v5318_v56 = vcombine.low %v638_v43, %v642_v44  ;;  %v5325_v57 = vcombine.high %v645_v49, %v649_v50  ;;  %v6321_v43 = vcombine.low %v6307_v29, %v6309_v30  ;;  %v698_v44 = vld [vmem:[#allocation6 + $0xc68] sm:$0xff] }
 0x11e   : > { %3549 = vmatprep.subr.bf16.mxu0 %v5269_v59  ;;  %3721 = vmatprep.subr.bf16.mxu1 %v5271_v60  ;;  %v5327_v59 = vcombine.high %v646_v51, %v650_v52  ;;  %v653_v60 = vld [vmem:[#allocation6 + $0xb00] sm:$0xff]  ;;  %v5375_v50 = vcombine.high %v694_v42, %v698_v44  ;;  %v702_v29 = vld [vmem:[#allocation6 + $0xc88] sm:$0xff] }
 0x11f   : > { %v5332_v8 = vcombine.low %v653_v60, %v657_v61  ;;  %v706_v30 = vld [vmem:[#allocation6 + $0xca8] sm:$0xff] }
 0x121   : > { %3550 = vmatpush1.bf16.msra.mxu0 %v5268_v1  ;;  %3722 = vmatpush1.bf16.msra.mxu1 %v5270_v2  ;;  %v5326_v1 = vcombine.low %v646_v51, %v650_v52  ;;  %v5333_v2 = vcombine.high %v653_v60, %v657_v61  ;;  %v701_v51 = vld [vmem:[#allocation6 + $0xc80] sm:$0xff]  ;;  %v5383_v60 = vcombine.high %v702_v29, %v706_v30 }
 0x122   : > { %3551 = vmatprep.subr.bf16.mxu0 %v5277_v3  ;;  %3723 = vmatprep.subr.bf16.mxu1 %v5279_v4  ;;  %v5335_v3 = vcombine.high %v654_v62, %v658_v63  ;;  %v661_v4 = vld [vmem:[#allocation6 + $0xb40] sm:$0xff] }
 0x123   : > { %v5340_v19 = vcombine.low %v661_v4, %v665_v5  ;;  %v705_v52 = vld [vmem:[#allocation6 + $0xca0] sm:$0xff] }
 0x124   : > { %v709_v61 = vld [vmem:[#allocation6 + $0xcc0] sm:$0xff] }
 0x125   : > { %3552 = vmatpush1.bf16.msra.mxu0 %v5276_v9  ;;  %3724 = vmatpush1.bf16.msra.mxu1 %v5278_v10  ;;  %v5334_v9 = vcombine.low %v654_v62, %v658_v63  ;;  %v5341_v10 = vcombine.high %v661_v4, %v665_v5  ;;  %v713_v62 = vld [vmem:[#allocation6 + $0xce0] sm:$0xff]  ;;  %v710_v63 = vld [vmem:[#allocation6 + $0xcc8] sm:$0xff] }
 0x126   : > { %3553 = vmatprep.subr.bf16.mxu0 %v5285_v11  ;;  %3725 = vmatprep.subr.bf16.mxu1 %v5287_v12  ;;  %v5343_v11 = vcombine.high %v662_v6, %v666_v7  ;;  %v669_v12 = vld [vmem:[#allocation6 + $0xb80] sm:$0xff] }
 0x127   : > { %v5348_v26 = vcombine.low %v669_v12, %v673_v13  ;;  %v717_v5 = vld [vmem:[#allocation6 + $0xd00] sm:$0xff] }
 0x129   : > { %3554 = vmatpush1.bf16.msra.mxu0 %v5284_v20  ;;  %3726 = vmatpush1.bf16.msra.mxu1 %v5286_v21  ;;  %v5342_v20 = vcombine.low %v662_v6, %v666_v7  ;;  %v5349_v21 = vcombine.high %v669_v12, %v673_v13  ;;  %v721_v6 = vld [vmem:[#allocation6 + $0xd20] sm:$0xff]  ;;  %v718_v7 = vld [vmem:[#allocation6 + $0xd08] sm:$0xff] }
 0x12a   : > { %3555 = vmatprep.subr.bf16.mxu0 %v5293_v22  ;;  %3727 = vmatprep.subr.bf16.mxu1 %v5295_v23  ;;  %v5351_v22 = vcombine.high %v670_v14, %v674_v16  ;;  %v677_v23 = vld [vmem:[#allocation6 + $0xbc0] sm:$0xff] }
 0x12b   : > { %v5356_v17 = vcombine.low %v677_v23, %v681_v24  ;;  %v725_v13 = vld [vmem:[#allocation6 + $0xd40] sm:$0xff] }
 0x12d   : > { %3556 = vmatpush1.bf16.msra.mxu0 %v5292_v28  ;;  %3728 = vmatpush1.bf16.msra.mxu1 %v5294_v31  ;;  %v5350_v28 = vcombine.low %v670_v14, %v674_v16  ;;  %v5357_v31 = vcombine.high %v677_v23, %v681_v24  ;;  %v729_v14 = vld [vmem:[#allocation6 + $0xd60] sm:$0xff]  ;;  %v726_v16 = vld [vmem:[#allocation6 + $0xd48] sm:$0xff] }
 0x12e   : > { %3557 = vmatprep.subr.bf16.mxu0 %v5301_v32  ;;  %3729 = vmatprep.subr.bf16.mxu1 %v5303_v33  ;;  %v5359_v32 = vcombine.high %v678_v53, %v682_v54  ;;  %v685_v33 = vld [vmem:[#allocation6 + $0xc00] sm:$0xff] }
 0x12f   : > { %v733_v24 = vld [vmem:[#allocation6 + $0xd80] sm:$0xff] }
 0x131   : > { %3558 = vmatpush1.bf16.msra.mxu0 %v5300_v18  ;;  %3730 = vmatpush1.bf16.msra.mxu1 %v5302_v38  ;;  %v5358_v18 = vcombine.low %v678_v53, %v682_v54  ;;  %v5365_v38 = vcombine.high %v685_v33, %v689_v34  ;;  %v737_v53 = vld [vmem:[#allocation6 + $0xda0] sm:$0xff]  ;;  %v734_v54 = vld [vmem:[#allocation6 + $0xd88] sm:$0xff] }
 0x132   : > { %3559 = vmatprep.subr.bf16.mxu0 %v5309_v39  ;;  %3731 = vmatprep.subr.bf16.mxu1 %v5311_v40  ;;  %v5367_v39 = vcombine.high %v686_v35, %v690_v36  ;;  %v693_v40 = vld [vmem:[#allocation6 + $0xc40] sm:$0xff] }
 0x133   : > { %v5373_v49 = vcombine.high %v693_v40, %v697_v41 }
 0x135   : > { %3560 = vmatpush1.bf16.msra.mxu0 %v5308_v45  ;;  %3732 = vmatpush1.bf16.msra.mxu1 %v5310_v46  ;;  %v6323_v45 = vld [vmem:[#allocation3 + $0x18] sm:$0xff] }
 0x136   : > { %3561 = vmatprep.subr.bf16.mxu0 %v5317_v47  ;;  %3733 = vmatprep.subr.bf16.mxu1 %v5319_v48  ;;  %v6325_v46 = vld [vmem:[#allocation3 + $0x38] sm:$0xff]  ;;  %v5364_v47 = vcombine.low %v685_v33, %v689_v34  ;;  %v5366_v48 = vcombine.low %v686_v35, %v690_v36  ;;  %v741_v34 = vld [vmem:[#allocation6 + $0xdc0] sm:$0xff]  ;;  %v742_v36 = vld [vmem:[#allocation6 + $0xdc8] sm:$0xff] }
 0x137   : > { %v745_v35 = vld [vmem:[#allocation6 + $0xde0] sm:$0xff] }
 0x139   : > { %3562 = vmatpush1.bf16.msra.mxu0 %v5316_v55  ;;  %3734 = vmatpush1.bf16.msra.mxu1 %v5318_v56  ;;  %v6329_v55 = vcombine.high %v6323_v45, %v6325_v46  ;;  %v5372_v56 = vcombine.low %v693_v40, %v697_v41  ;;  %v749_v41 = vld [vmem:[#allocation6 + $0xe00] sm:$0xff] }
 0x13a   : > { %3563 = vmatprep.subr.bf16.mxu0 %v5325_v57  ;;  %3735 = vmatprep.subr.bf16.mxu1 %v5327_v59  ;;  %v5374_v57 = vcombine.low %v694_v42, %v698_v44  ;;  %v5381_v59 = vcombine.high %v701_v51, %v705_v52  ;;  %v753_v42 = vld [vmem:[#allocation6 + $0xe20] sm:$0xff]  ;;  %v750_v44 = vld [vmem:[#allocation6 + $0xe08] sm:$0xff] }
 0x13d   : > { %3564 = vmatpush1.bf16.msra.mxu0 %v5324_v0  ;;  %3736 = vmatpush1.bf16.msra.mxu1 %v5326_v1  ;;  %v714_v0 = vld [vmem:[#allocation6 + $0xce8] sm:$0xff]  ;;  %v5380_v1 = vcombine.low %v701_v51, %v705_v52  ;;  %v757_v52 = vld [vmem:[#allocation6 + $0xe40] sm:$0xff] }
 0x13e   : > { %3565 = vmatprep.subr.bf16.mxu0 %v5333_v2  ;;  %3737 = vmatprep.subr.bf16.mxu1 %v5335_v3  ;;  %v5382_v2 = vcombine.low %v702_v29, %v706_v30  ;;  %v5389_v3 = vcombine.high %v709_v61, %v713_v62  ;;  %v5391_v4 = vcombine.high %v710_v63, %v714_v0  ;;  %v761_v29 = vld [vmem:[#allocation6 + $0xe60] sm:$0xff]  ;;  %v758_v30 = vld [vmem:[#allocation6 + $0xe48] sm:$0xff] }
 0x141   : > { %3566 = vmatpush1.bf16.msra.mxu0 %v5332_v8  ;;  %3738 = vmatpush1.bf16.msra.mxu1 %v5334_v9  ;;  %v722_v8 = vld [vmem:[#allocation6 + $0xd28] sm:$0xff]  ;;  %v5388_v9 = vcombine.low %v709_v61, %v713_v62  ;;  %v765_v62 = vld [vmem:[#allocation6 + $0xe80] sm:$0xff] }
 0x142   : > { %3567 = vmatprep.subr.bf16.mxu0 %v5341_v10  ;;  %3739 = vmatprep.subr.bf16.mxu1 %v5343_v11  ;;  %v5390_v10 = vcombine.low %v710_v63, %v714_v0  ;;  %v5397_v11 = vcombine.high %v717_v5, %v721_v6  ;;  %v5399_v12 = vcombine.high %v718_v7, %v722_v8  ;;  %v769_v63 = vld [vmem:[#allocation6 + $0xea0] sm:$0xff]  ;;  %v766_v0 = vld [vmem:[#allocation6 + $0xe88] sm:$0xff] }
 0x145   : > { %3568 = vmatpush1.bf16.msra.mxu0 %v5340_v19  ;;  %3740 = vmatpush1.bf16.msra.mxu1 %v5342_v20  ;;  %v730_v19 = vld [vmem:[#allocation6 + $0xd68] sm:$0xff]  ;;  %v5396_v20 = vcombine.low %v717_v5, %v721_v6  ;;  %v773_v6 = vld [vmem:[#allocation6 + $0xec0] sm:$0xff] }
 0x146   : > { %3569 = vmatprep.subr.bf16.mxu0 %v5349_v21  ;;  %3741 = vmatprep.subr.bf16.mxu1 %v5351_v22  ;;  %v5398_v21 = vcombine.low %v718_v7, %v722_v8  ;;  %v5405_v22 = vcombine.high %v725_v13, %v729_v14  ;;  %v5407_v23 = vcombine.high %v726_v16, %v730_v19  ;;  %v777_v7 = vld [vmem:[#allocation6 + $0xee0] sm:$0xff]  ;;  %v774_v8 = vld [vmem:[#allocation6 + $0xec8] sm:$0xff] }
 0x149   : > { %3570 = vmatpush1.bf16.msra.mxu0 %v5348_v26  ;;  %3742 = vmatpush1.bf16.msra.mxu1 %v5350_v28  ;;  %v738_v26 = vld [vmem:[#allocation6 + $0xda8] sm:$0xff]  ;;  %v5404_v28 = vcombine.low %v725_v13, %v729_v14  ;;  %v781_v14 = vld [vmem:[#allocation6 + $0xf00] sm:$0xff] }
 0x14a   : > { %3571 = vmatprep.subr.bf16.mxu0 %v5357_v31  ;;  %3743 = vmatprep.subr.bf16.mxu1 %v5359_v32  ;;  %v5406_v31 = vcombine.low %v726_v16, %v730_v19  ;;  %v5413_v32 = vcombine.high %v733_v24, %v737_v53  ;;  %v5415_v33 = vcombine.high %v734_v54, %v738_v26  ;;  %v785_v16 = vld [vmem:[#allocation6 + $0xf20] sm:$0xff]  ;;  %v782_v19 = vld [vmem:[#allocation6 + $0xf08] sm:$0xff] }
 0x14d   : > { %3572 = vmatpush1.bf16.msra.mxu0 %v5356_v17  ;;  %3744 = vmatpush1.bf16.msra.mxu1 %v5358_v18  ;;  %v746_v17 = vld [vmem:[#allocation6 + $0xde8] sm:$0xff]  ;;  %v5412_v18 = vcombine.low %v733_v24, %v737_v53  ;;  %v789_v53 = vld [vmem:[#allocation6 + $0xf40] sm:$0xff] }
 0x14e   : > { %3584 = vmatprep.subr.bf16.mxu0 %v5365_v38  ;;  %3756 = vmatprep.subr.bf16.mxu1 %v5367_v39  ;;  %v5414_v38 = vcombine.low %v734_v54, %v738_v26  ;;  %v5421_v39 = vcombine.high %v741_v34, %v745_v35  ;;  %v5423_v40 = vcombine.high %v742_v36, %v746_v17  ;;  %v793_v54 = vld [vmem:[#allocation6 + $0xf60] sm:$0xff]  ;;  %v790_v26 = vld [vmem:[#allocation6 + $0xf48] sm:$0xff] }
 0x150   : > { %3574 = vmatmul.mubr.bf16.vlgmr.msra.gmra.mrb[0].mxu0 %v6321_v43  ;;  %3746 = vmatmul.mubr.bf16.vlgmr.msra.gmra.mrb[0].mxu1 %v6321_v43 }
 0x151   : > { %3585 = vmatpush1.bf16.msra.mxu0 %v5364_v47  ;;  %3757 = vmatpush1.bf16.msra.mxu1 %v5366_v48  ;;  %v754_v47 = vld [vmem:[#allocation6 + $0xe28] sm:$0xff]  ;;  %v5420_v48 = vcombine.low %v741_v34, %v745_v35  ;;  %v797_v35 = vld [vmem:[#allocation6 + $0xf80] sm:$0xff] }
 0x152   : > { %3586 = vmatprep.subr.bf16.mxu0 %v5373_v49  ;;  %3758 = vmatprep.subr.bf16.mxu1 %v5375_v50  ;;  %v5422_v49 = vcombine.low %v742_v36, %v746_v17  ;;  %v5429_v50 = vcombine.high %v749_v41, %v753_v42  ;;  %v5431_v51 = vcombine.high %v750_v44, %v754_v47  ;;  %v801_v36 = vld [vmem:[#allocation6 + $0xfa0] sm:$0xff]  ;;  %v798_v17 = vld [vmem:[#allocation6 + $0xf88] sm:$0xff] }
 0x153   : > { %3616 = vmatprep.mubr.bf16.mxu0 %v6329_v55  ;;  %3788 = vmatprep.mubr.bf16.mxu1 %v6329_v55 }
 0x155   : > { %3587 = vmatpush1.bf16.msra.mxu0 %v5372_v56  ;;  %3759 = vmatpush1.bf16.msra.mxu1 %v5374_v57  ;;  %v762_v56 = vld [vmem:[#allocation6 + $0xe68] sm:$0xff]  ;;  %v5428_v57 = vcombine.low %v749_v41, %v753_v42  ;;  %v805_v42 = vld [vmem:[#allocation6 + $0xfc0] sm:$0xff] }
 0x156   : > { %3588 = vmatprep.subr.bf16.mxu0 %v5381_v59  ;;  %3760 = vmatprep.subr.bf16.mxu1 %v5383_v60  ;;  %v5430_v59 = vcombine.low %v750_v44, %v754_v47  ;;  %v5437_v60 = vcombine.high %v757_v52, %v761_v29  ;;  %v5439_v61 = vcombine.high %v758_v30, %v762_v56  ;;  %v809_v44 = vld [vmem:[#allocation6 + $0xfe0] sm:$0xff]  ;;  %v806_v47 = vld [vmem:[#allocation6 + $0xfc8] sm:$0xff] }
 0x159   : > { %3589 = vmatpush1.bf16.msra.mxu0 %v5380_v1  ;;  %3761 = vmatpush1.bf16.msra.mxu1 %v5382_v2  ;;  %v770_v1 = vld [vmem:[#allocation6 + $0xea8] sm:$0xff]  ;;  %v5436_v2 = vcombine.low %v757_v52, %v761_v29  ;;  %v303_v29 = vld [vmem:[#allocation6 + $0x10] sm:$0xff] }
 0x15a   : > { %3590 = vmatprep.subr.bf16.mxu0 %v5389_v3  ;;  %3762 = vmatprep.subr.bf16.mxu1 %v5391_v4  ;;  %v5438_v3 = vcombine.low %v758_v30, %v762_v56  ;;  %v5445_v4 = vcombine.high %v765_v62, %v769_v63  ;;  %v5447_v5 = vcombine.high %v766_v0, %v770_v1  ;;  %v307_v30 = vld [vmem:[#allocation6 + $0x30] sm:$0xff]  ;;  %v304_v56 = vld [vmem:[#allocation6 + $0x18] sm:$0xff] }
 0x15d   : > { %3591 = vmatpush1.bf16.msra.mxu0 %v5388_v9  ;;  %3763 = vmatpush1.bf16.msra.mxu1 %v5390_v10  ;;  %v778_v9 = vld [vmem:[#allocation6 + $0xee8] sm:$0xff]  ;;  %v5444_v10 = vcombine.low %v765_v62, %v769_v63  ;;  %v311_v63 = vld [vmem:[#allocation6 + $0x50] sm:$0xff] }
 0x15e   : > { %3592 = vmatprep.subr.bf16.mxu0 %v5397_v11  ;;  %3764 = vmatprep.subr.bf16.mxu1 %v5399_v12  ;;  %v5446_v11 = vcombine.low %v766_v0, %v770_v1  ;;  %v5453_v12 = vcombine.high %v773_v6, %v777_v7  ;;  %v5455_v13 = vcombine.high %v774_v8, %v778_v9  ;;  %v315_v0 = vld [vmem:[#allocation6 + $0x70] sm:$0xff] }
 0x15f   : > { %v6337_v1 = vcombine.low %v6323_v45, %v6325_v46  ;;  %v4992_v45 = vcombine.low %v311_v63, %v315_v0 }
 0x161   : > { %3593 = vmatpush1.bf16.msra.mxu0 %v5396_v20  ;;  %3765 = vmatpush1.bf16.msra.mxu1 %v5398_v21  ;;  %v786_v20 = vld [vmem:[#allocation6 + $0xf28] sm:$0xff]  ;;  %v5452_v21 = vcombine.low %v773_v6, %v777_v7  ;;  %v4993_v6 = vcombine.high %v311_v63, %v315_v0  ;;  %v371_v63 = vld [vmem:[#allocation6 + $0x230] sm:$0xff]  ;;  %v368_v0 = vld [vmem:[#allocation6 + $0x218] sm:$0xff] }
 0x162   : > { %3594 = vmatprep.subr.bf16.mxu0 %v5405_v22  ;;  %3766 = vmatprep.subr.bf16.mxu1 %v5407_v23  ;;  %v5454_v22 = vcombine.low %v774_v8, %v778_v9  ;;  %v5461_v23 = vcombine.high %v781_v14, %v785_v16  ;;  %v5463_v24 = vcombine.high %v782_v19, %v786_v20  ;;  %v319_v8 = vld [vmem:[#allocation6 + $0x90] sm:$0xff] }
 0x163   : > { %v323_v9 = vld [vmem:[#allocation6 + $0xb0] sm:$0xff] }
 0x165   : > { %3595 = vmatpush1.bf16.msra.mxu0 %v5404_v28  ;;  %3767 = vmatpush1.bf16.msra.mxu1 %v5406_v31  ;;  %v794_v28 = vld [vmem:[#allocation6 + $0xf68] sm:$0xff]  ;;  %v5460_v31 = vcombine.low %v781_v14, %v785_v16  ;;  %v327_v14 = vld [vmem:[#allocation6 + $0xd0] sm:$0xff] }
 0x166   : > { %3596 = vmatprep.subr.bf16.mxu0 %v5413_v32  ;;  %3768 = vmatprep.subr.bf16.mxu1 %v5415_v33  ;;  %v5462_v32 = vcombine.low %v782_v19, %v786_v20  ;;  %v5469_v33 = vcombine.high %v789_v53, %v793_v54  ;;  %v5471_v34 = vcombine.high %v790_v26, %v794_v28  ;;  %v331_v16 = vld [vmem:[#allocation6 + $0xf0] sm:$0xff]  ;;  %v328_v19 = vld [vmem:[#allocation6 + $0xd8] sm:$0xff] }
 0x167   : > { %v332_v20 = vld [vmem:[#allocation6 + $0xf8] sm:$0xff] }
 0x169   : > { %3597 = vmatpush1.bf16.msra.mxu0 %v5412_v18  ;;  %3769 = vmatpush1.bf16.msra.mxu1 %v5414_v38  ;;  %v802_v18 = vld [vmem:[#allocation6 + $0xfa8] sm:$0xff]  ;;  %v5468_v38 = vcombine.low %v789_v53, %v793_v54  ;;  %v335_v53 = vld [vmem:[#allocation6 + $0x110] sm:$0xff] }
 0x16a   : > { %3598 = vmatprep.subr.bf16.mxu0 %v5421_v39  ;;  %3770 = vmatprep.subr.bf16.mxu1 %v5423_v40  ;;  %v5470_v39 = vcombine.low %v790_v26, %v794_v28  ;;  %v5477_v40 = vcombine.high %v797_v35, %v801_v36  ;;  %v5479_v41 = vcombine.high %v798_v17, %v802_v18  ;;  %v339_v54 = vld [vmem:[#allocation6 + $0x130] sm:$0xff]  ;;  %v336_v26 = vld [vmem:[#allocation6 + $0x118] sm:$0xff] }
 0x16b   : > { %v340_v28 = vld [vmem:[#allocation6 + $0x138] sm:$0xff] }
 0x16d   : > { %3599 = vmatpush1.bf16.msra.mxu0 %v5420_v48  ;;  %3771 = vmatpush1.bf16.msra.mxu1 %v5422_v49  ;;  %v810_v48 = vld [vmem:[#allocation6 + $0xfe8] sm:$0xff]  ;;  %v5476_v49 = vcombine.low %v797_v35, %v801_v36  ;;  %v347_v35 = vld [vmem:[#allocation6 + $0x170] sm:$0xff]  ;;  %v344_v36 = vld [vmem:[#allocation6 + $0x158] sm:$0xff] }
 0x16e   : > { %3600 = vmatprep.subr.bf16.mxu0 %v5429_v50  ;;  %3772 = vmatprep.subr.bf16.mxu1 %v5431_v51  ;;  %v5478_v50 = vcombine.low %v798_v17, %v802_v18  ;;  %v5485_v51 = vcombine.high %v805_v42, %v809_v44  ;;  %v5487_v52 = vcombine.high %v806_v47, %v810_v48  ;;  %v348_v17 = vld [vmem:[#allocation6 + $0x178] sm:$0xff] }
 0x16f   : > { %v5016_v18 = vcombine.low %v335_v53, %v339_v54 }
 0x171   : > { %3601 = vmatpush1.bf16.msra.mxu0 %v5428_v57  ;;  %3773 = vmatpush1.bf16.msra.mxu1 %v5430_v59  ;;  %v308_v57 = vld [vmem:[#allocation6 + $0x38] sm:$0xff]  ;;  %v5484_v59 = vcombine.low %v805_v42, %v809_v44  ;;  %v355_v42 = vld [vmem:[#allocation6 + $0x1b0] sm:$0xff] }
 0x172   : > { %3602 = vmatprep.subr.bf16.mxu0 %v5437_v60  ;;  %3774 = vmatprep.subr.bf16.mxu1 %v5439_v61  ;;  %v5486_v60 = vcombine.low %v806_v47, %v810_v48  ;;  %v4985_v61 = vcombine.high %v303_v29, %v307_v30  ;;  %v4987_v62 = vcombine.high %v304_v56, %v308_v57  ;;  %v352_v44 = vld [vmem:[#allocation6 + $0x198] sm:$0xff] }
 0x173   : > { %v356_v47 = vld [vmem:[#allocation6 + $0x1b8] sm:$0xff] }
 0x175   : > { %3603 = vmatpush1.bf16.msra.mxu0 %v5436_v2  ;;  %3775 = vmatpush1.bf16.msra.mxu1 %v5438_v3  ;;  %v312_v2 = vld [vmem:[#allocation6 + $0x58] sm:$0xff] }
 0x176   : > { %3604 = vmatprep.subr.bf16.mxu0 %v5445_v4  ;;  %3776 = vmatprep.subr.bf16.mxu1 %v5447_v5  ;;  %v316_v3 = vld [vmem:[#allocation6 + $0x78] sm:$0xff]  ;;  %v4984_v4 = vcombine.low %v303_v29, %v307_v30  ;;  %v4986_v5 = vcombine.low %v304_v56, %v308_v57  ;;  %v363_v29 = vld [vmem:[#allocation6 + $0x1f0] sm:$0xff] }
 0x177   : > { %v4995_v7 = vcombine.high %v312_v2, %v316_v3  ;;  %v4994_v46 = vcombine.low %v312_v2, %v316_v3  ;;  %v360_v30 = vld [vmem:[#allocation6 + $0x1d8] sm:$0xff] }
 0x178   : > { %v364_v56 = vld [vmem:[#allocation6 + $0x1f8] sm:$0xff] }
 0x179   : > { %3605 = vmatpush1.bf16.msra.mxu0 %v5444_v10  ;;  %3777 = vmatpush1.bf16.msra.mxu1 %v5446_v11  ;;  %v320_v10 = vld [vmem:[#allocation6 + $0x98] sm:$0xff] }
 0x17a   : > { %3606 = vmatprep.subr.bf16.mxu0 %v5453_v12  ;;  %3778 = vmatprep.subr.bf16.mxu1 %v5455_v13  ;;  %v324_v11 = vld [vmem:[#allocation6 + $0xb8] sm:$0xff]  ;;  %v5001_v12 = vcombine.high %v319_v8, %v323_v9 }
 0x17b   : > { %v5003_v13 = vcombine.high %v320_v10, %v324_v11  ;;  %v372_v2 = vld [vmem:[#allocation6 + $0x238] sm:$0xff] }
 0x17d   : > { %3607 = vmatpush1.bf16.msra.mxu0 %v5452_v21  ;;  %3779 = vmatpush1.bf16.msra.mxu1 %v5454_v22  ;;  %v5000_v21 = vcombine.low %v319_v8, %v323_v9  ;;  %v5002_v22 = vcombine.low %v320_v10, %v324_v11  ;;  %v379_v8 = vld [vmem:[#allocation6 + $0x270] sm:$0xff]  ;;  %v376_v9 = vld [vmem:[#allocation6 + $0x258] sm:$0xff] }
 0x17e   : > { %3608 = vmatprep.subr.bf16.mxu0 %v5461_v23  ;;  %3780 = vmatprep.subr.bf16.mxu1 %v5463_v24  ;;  %v5009_v23 = vcombine.high %v327_v14, %v331_v16  ;;  %v5011_v24 = vcombine.high %v328_v19, %v332_v20  ;;  %v380_v10 = vld [vmem:[#allocation6 + $0x278] sm:$0xff] }
 0x181   : > { %3609 = vmatpush1.bf16.msra.mxu0 %v5460_v31  ;;  %3781 = vmatpush1.bf16.msra.mxu1 %v5462_v32  ;;  %v5008_v31 = vcombine.low %v327_v14, %v331_v16  ;;  %v5010_v32 = vcombine.low %v328_v19, %v332_v20  ;;  %v387_v14 = vld [vmem:[#allocation6 + $0x2b0] sm:$0xff]  ;;  %v384_v16 = vld [vmem:[#allocation6 + $0x298] sm:$0xff] }
 0x182   : > { %3610 = vmatprep.subr.bf16.mxu0 %v5469_v33  ;;  %3782 = vmatprep.subr.bf16.mxu1 %v5471_v34  ;;  %v5017_v33 = vcombine.high %v335_v53, %v339_v54  ;;  %v343_v34 = vld [vmem:[#allocation6 + $0x150] sm:$0xff]  ;;  %v388_v19 = vld [vmem:[#allocation6 + $0x2b8] sm:$0xff] }
 0x183   : > { %v5024_v48 = vcombine.low %v343_v34, %v347_v35  ;;  %v395_v53 = vld [vmem:[#allocation6 + $0x2f0] sm:$0xff]  ;;  %v392_v54 = vld [vmem:[#allocation6 + $0x2d8] sm:$0xff] }
 0x185   : > { %3611 = vmatpush1.bf16.msra.mxu0 %v5468_v38  ;;  %3783 = vmatpush1.bf16.msra.mxu1 %v5470_v39  ;;  %v5018_v38 = vcombine.low %v336_v26, %v340_v28  ;;  %v5025_v39 = vcombine.high %v343_v34, %v347_v35  ;;  %v403_v34 = vld [vmem:[#allocation6 + $0x330] sm:$0xff]  ;;  %v400_v35 = vld [vmem:[#allocation6 + $0x318] sm:$0xff] }
 0x186   : > { %3612 = vmatprep.subr.bf16.mxu0 %v5477_v40  ;;  %3784 = vmatprep.subr.bf16.mxu1 %v5479_v41  ;;  %v5027_v40 = vcombine.high %v344_v36, %v348_v17  ;;  %v351_v41 = vld [vmem:[#allocation6 + $0x190] sm:$0xff] }
 0x187   : > { %v5032_v57 = vcombine.low %v351_v41, %v355_v42 }
 0x189   : > { %3613 = vmatpush1.bf16.msra.mxu0 %v5476_v49  ;;  %3785 = vmatpush1.bf16.msra.mxu1 %v5478_v50  ;;  %v5026_v49 = vcombine.low %v344_v36, %v348_v17  ;;  %v5033_v50 = vcombine.high %v351_v41, %v355_v42  ;;  %v404_v36 = vld [vmem:[#allocation6 + $0x338] sm:$0xff]  ;;  %v411_v41 = vld [vmem:[#allocation6 + $0x370] sm:$0xff] }
 0x18a   : > { %3614 = vmatprep.subr.bf16.mxu0 %v5485_v51  ;;  %3786 = vmatprep.subr.bf16.mxu1 %v5487_v52  ;;  %v5035_v51 = vcombine.high %v352_v44, %v356_v47  ;;  %v359_v52 = vld [vmem:[#allocation6 + $0x1d0] sm:$0xff]  ;;  %v408_v42 = vld [vmem:[#allocation6 + $0x358] sm:$0xff] }
 0x18b   : > { %v5040_v3 = vcombine.low %v359_v52, %v363_v29 }
 0x18d   : > { %3615 = vmatpush1.bf16.msra.mxu0 %v5484_v59  ;;  %3787 = vmatpush1.bf16.msra.mxu1 %v5486_v60  ;;  %v5034_v59 = vcombine.low %v352_v44, %v356_v47  ;;  %v5041_v60 = vcombine.high %v359_v52, %v363_v29  ;;  %v412_v44 = vld [vmem:[#allocation6 + $0x378] sm:$0xff]  ;;  %v419_v52 = vld [vmem:[#allocation6 + $0x3b0] sm:$0xff] }
 0x18e   : > { %3799 = vmatprep.subr.bf16.mxu0 %v4985_v61  ;;  %3971 = vmatprep.subr.bf16.mxu1 %v4987_v62  ;;  %v5043_v61 = vcombine.high %v360_v30, %v364_v56  ;;  %v367_v62 = vld [vmem:[#allocation6 + $0x210] sm:$0xff]  ;;  %v416_v29 = vld [vmem:[#allocation6 + $0x398] sm:$0xff] }
 0x18f   : > { %v5048_v11 = vcombine.low %v367_v62, %v371_v63 }
 0x190   : > { %3617 = vmatmul.mubr.bf16.vlgmr.msra.gmra.mrb[0].mxu0 %v6337_v1  ;;  %3789 = vmatmul.mubr.bf16.vlgmr.msra.gmra.mrb[0].mxu1 %v6337_v1 }
 0x191   : > { %3800 = vmatpush1.bf16.msra.mxu0 %v4984_v4  ;;  %3972 = vmatpush1.bf16.msra.mxu1 %v4986_v5  ;;  %v5042_v4 = vcombine.low %v360_v30, %v364_v56  ;;  %v5049_v5 = vcombine.high %v367_v62, %v371_v63  ;;  %v420_v30 = vld [vmem:[#allocation6 + $0x3b8] sm:$0xff]  ;;  %v427_v62 = vld [vmem:[#allocation6 + $0x3f0] sm:$0xff] }
 0x192   : > { %3801 = vmatprep.subr.bf16.mxu0 %v4993_v6  ;;  %3973 = vmatprep.subr.bf16.mxu1 %v4995_v7  ;;  %v5051_v6 = vcombine.high %v368_v0, %v372_v2  ;;  %v375_v7 = vld [vmem:[#allocation6 + $0x250] sm:$0xff]  ;;  %v424_v63 = vld [vmem:[#allocation6 + $0x3d8] sm:$0xff] }
 0x193   : > { %3831 = vmatprep.mubr.bf16.mxu0 %v6283_v58  ;;  %4003 = vmatprep.mubr.bf16.mxu1 %v6283_v58  ;;  %v5019_v58 = vcombine.high %v336_v26, %v340_v28  ;;  %v5056_v20 = vcombine.low %v375_v7, %v379_v8  ;;  %v396_v26 = vld [vmem:[#allocation6 + $0x2f8] sm:$0xff] }
 0x195   : > { %3802 = vmatpush1.bf16.msra.mxu0 %v4992_v45  ;;  %3974 = vmatpush1.bf16.msra.mxu1 %v4994_v46  ;;  %v5050_v45 = vcombine.low %v368_v0, %v372_v2  ;;  %v5057_v46 = vcombine.high %v375_v7, %v379_v8  ;;  %v428_v0 = vld [vmem:[#allocation6 + $0x3f8] sm:$0xff]  ;;  %v435_v7 = vld [vmem:[#allocation6 + $0x430] sm:$0xff] }
 0x196   : > { %3803 = vmatprep.subr.bf16.mxu0 %v5001_v12  ;;  %3975 = vmatprep.subr.bf16.mxu1 %v5003_v13  ;;  %v5059_v12 = vcombine.high %v376_v9, %v380_v10  ;;  %v383_v13 = vld [vmem:[#allocation6 + $0x290] sm:$0xff]  ;;  %v432_v8 = vld [vmem:[#allocation6 + $0x418] sm:$0xff] }
 0x197   : > { %v5064_v28 = vcombine.low %v383_v13, %v387_v14 }
 0x199   : > { %3804 = vmatpush1.bf16.msra.mxu0 %v5000_v21  ;;  %3976 = vmatpush1.bf16.msra.mxu1 %v5002_v22  ;;  %v5058_v21 = vcombine.low %v376_v9, %v380_v10  ;;  %v5065_v22 = vcombine.high %v383_v13, %v387_v14  ;;  %v436_v9 = vld [vmem:[#allocation6 + $0x438] sm:$0xff]  ;;  %v443_v13 = vld [vmem:[#allocation6 + $0x470] sm:$0xff] }
 0x19a   : > { %3805 = vmatprep.subr.bf16.mxu0 %v5009_v23  ;;  %3977 = vmatprep.subr.bf16.mxu1 %v5011_v24  ;;  %v5067_v23 = vcombine.high %v384_v16, %v388_v19  ;;  %v391_v24 = vld [vmem:[#allocation6 + $0x2d0] sm:$0xff]  ;;  %v440_v14 = vld [vmem:[#allocation6 + $0x458] sm:$0xff] }
 0x19b   : > { %v5072_v17 = vcombine.low %v391_v24, %v395_v53 }
 0x19d   : > { %3806 = vmatpush1.bf16.msra.mxu0 %v5008_v31  ;;  %3978 = vmatpush1.bf16.msra.mxu1 %v5010_v32  ;;  %v5066_v31 = vcombine.low %v384_v16, %v388_v19  ;;  %v5073_v32 = vcombine.high %v391_v24, %v395_v53  ;;  %v444_v16 = vld [vmem:[#allocation6 + $0x478] sm:$0xff]  ;;  %v451_v24 = vld [vmem:[#allocation6 + $0x4b0] sm:$0xff] }
 0x19e   : > { %3807 = vmatprep.subr.bf16.mxu0 %v5017_v33  ;;  %3979 = vmatprep.subr.bf16.mxu1 %v5019_v58  ;;  %v5075_v33 = vcombine.high %v392_v54, %v396_v26  ;;  %v399_v58 = vld [vmem:[#allocation6 + $0x310] sm:$0xff]  ;;  %v448_v53 = vld [vmem:[#allocation6 + $0x498] sm:$0xff] }
 0x19f   : > { %v5080_v47 = vcombine.low %v399_v58, %v403_v34 }
 0x1a1   : > { %3808 = vmatpush1.bf16.msra.mxu0 %v5016_v18  ;;  %3980 = vmatpush1.bf16.msra.mxu1 %v5018_v38  ;;  %v5074_v18 = vcombine.low %v392_v54, %v396_v26  ;;  %v5081_v38 = vcombine.high %v399_v58, %v403_v34  ;;  %v452_v54 = vld [vmem:[#allocation6 + $0x4b8] sm:$0xff]  ;;  %v459_v58 = vld [vmem:[#allocation6 + $0x4f0] sm:$0xff] }
 0x1a2   : > { %3809 = vmatprep.subr.bf16.mxu0 %v5025_v39  ;;  %3981 = vmatprep.subr.bf16.mxu1 %v5027_v40  ;;  %v5083_v39 = vcombine.high %v400_v35, %v404_v36  ;;  %v407_v40 = vld [vmem:[#allocation6 + $0x350] sm:$0xff]  ;;  %v456_v34 = vld [vmem:[#allocation6 + $0x4d8] sm:$0xff] }
 0x1a3   : > { %v5088_v56 = vcombine.low %v407_v40, %v411_v41 }
 0x1a5   : > { %3810 = vmatpush1.bf16.msra.mxu0 %v5024_v48  ;;  %3982 = vmatpush1.bf16.msra.mxu1 %v5026_v49  ;;  %v5082_v48 = vcombine.low %v400_v35, %v404_v36  ;;  %v5089_v49 = vcombine.high %v407_v40, %v411_v41  ;;  %v460_v35 = vld [vmem:[#allocation6 + $0x4f8] sm:$0xff] }
 0x1a6   : > { %3811 = vmatprep.subr.bf16.mxu0 %v5033_v50  ;;  %3983 = vmatprep.subr.bf16.mxu1 %v5035_v51  ;;  %v5091_v50 = vcombine.high %v408_v42, %v412_v44  ;;  %v415_v51 = vld [vmem:[#allocation6 + $0x390] sm:$0xff]  ;;  %v464_v40 = vld [vmem:[#allocation6 + $0x518] sm:$0xff] }
 0x1a7   : > { %v5096_v2 = vcombine.low %v415_v51, %v419_v52  ;;  %v468_v41 = vld [vmem:[#allocation6 + $0x538] sm:$0xff] }
 0x1a9   : > { %3812 = vmatpush1.bf16.msra.mxu0 %v5032_v57  ;;  %3984 = vmatpush1.bf16.msra.mxu1 %v5034_v59  ;;  %v5090_v57 = vcombine.low %v408_v42, %v412_v44  ;;  %v5097_v59 = vcombine.high %v415_v51, %v419_v52  ;;  %v5138_v44 = vcombine.low %v456_v34, %v460_v35  ;;  %v476_v51 = vld [vmem:[#allocation6 + $0x578] sm:$0xff] }
 0x1aa   : > { %3813 = vmatprep.subr.bf16.mxu0 %v5041_v60  ;;  %3985 = vmatprep.subr.bf16.mxu1 %v5043_v61  ;;  %v5099_v60 = vcombine.high %v416_v29, %v420_v30  ;;  %v423_v61 = vld [vmem:[#allocation6 + $0x3d0] sm:$0xff] }
 0x1ab   : > { %v5104_v10 = vcombine.low %v423_v61, %v427_v62 }
 0x1ad   : > { %3814 = vmatpush1.bf16.msra.mxu0 %v5040_v3  ;;  %3986 = vmatpush1.bf16.msra.mxu1 %v5042_v4  ;;  %v5098_v3 = vcombine.low %v416_v29, %v420_v30  ;;  %v5105_v4 = vcombine.high %v423_v61, %v427_v62  ;;  %v5146_v29 = vcombine.low %v464_v40, %v468_v41  ;;  %v484_v61 = vld [vmem:[#allocation6 + $0x5b8] sm:$0xff] }
 0x1ae   : > { %3815 = vmatprep.subr.bf16.mxu0 %v5049_v5  ;;  %3987 = vmatprep.subr.bf16.mxu1 %v5051_v6  ;;  %v5107_v5 = vcombine.high %v424_v63, %v428_v0  ;;  %v431_v6 = vld [vmem:[#allocation6 + $0x410] sm:$0xff] }
 0x1af   : > { %v5112_v19 = vcombine.low %v431_v6, %v435_v7 }
 0x1b1   : > { %3816 = vmatpush1.bf16.msra.mxu0 %v5048_v11  ;;  %3988 = vmatpush1.bf16.msra.mxu1 %v5050_v45  ;;  %v5106_v11 = vcombine.low %v424_v63, %v428_v0  ;;  %v5113_v45 = vcombine.high %v431_v6, %v435_v7  ;;  %v492_v6 = vld [vmem:[#allocation6 + $0x5f8] sm:$0xff] }
 0x1b2   : > { %3817 = vmatprep.subr.bf16.mxu0 %v5057_v46  ;;  %3989 = vmatprep.subr.bf16.mxu1 %v5059_v12  ;;  %v5115_v46 = vcombine.high %v432_v8, %v436_v9  ;;  %v439_v12 = vld [vmem:[#allocation6 + $0x450] sm:$0xff] }
 0x1b3   : > { %v5120_v26 = vcombine.low %v439_v12, %v443_v13 }
 0x1b5   : > { %3818 = vmatpush1.bf16.msra.mxu0 %v5056_v20  ;;  %3990 = vmatpush1.bf16.msra.mxu1 %v5058_v21  ;;  %v5114_v20 = vcombine.low %v432_v8, %v436_v9  ;;  %v5121_v21 = vcombine.high %v439_v12, %v443_v13  ;;  %v500_v12 = vld [vmem:[#allocation6 + $0x638] sm:$0xff] }
 0x1b6   : > { %3819 = vmatprep.subr.bf16.mxu0 %v5065_v22  ;;  %3991 = vmatprep.subr.bf16.mxu1 %v5067_v23  ;;  %v5123_v22 = vcombine.high %v440_v14, %v444_v16  ;;  %v447_v23 = vld [vmem:[#allocation6 + $0x490] sm:$0xff] }
 0x1b7   : > { %v5128_v36 = vcombine.low %v447_v23, %v451_v24 }
 0x1b9   : > { %3820 = vmatpush1.bf16.msra.mxu0 %v5064_v28  ;;  %3992 = vmatpush1.bf16.msra.mxu1 %v5066_v31  ;;  %v5122_v28 = vcombine.low %v440_v14, %v444_v16  ;;  %v5129_v31 = vcombine.high %v447_v23, %v451_v24  ;;  %v508_v23 = vld [vmem:[#allocation6 + $0x678] sm:$0xff] }
 0x1ba   : > { %3821 = vmatprep.subr.bf16.mxu0 %v5073_v32  ;;  %3993 = vmatprep.subr.bf16.mxu1 %v5075_v33  ;;  %v5131_v32 = vcombine.high %v448_v53, %v452_v54  ;;  %v455_v33 = vld [vmem:[#allocation6 + $0x4d0] sm:$0xff] }
 0x1bb   : > { %v5136_v42 = vcombine.low %v455_v33, %v459_v58 }
 0x1bd   : > { %3822 = vmatpush1.bf16.msra.mxu0 %v5072_v17  ;;  %3994 = vmatpush1.bf16.msra.mxu1 %v5074_v18  ;;  %v5137_v17 = vcombine.high %v455_v33, %v459_v58  ;;  %v5139_v18 = vcombine.high %v456_v34, %v460_v35  ;;  %v516_v33 = vld [vmem:[#allocation6 + $0x6b8] sm:$0xff] }
 0x1be   : > { %3823 = vmatprep.subr.bf16.mxu0 %v5081_v38  ;;  %3995 = vmatprep.subr.bf16.mxu1 %v5083_v39  ;;  %v463_v38 = vld [vmem:[#allocation6 + $0x510] sm:$0xff] }
 0x1bf   : > { %v467_v39 = vld [vmem:[#allocation6 + $0x530] sm:$0xff] }
 0x1c0   : > { %v5144_v52 = vcombine.low %v463_v38, %v467_v39 }
 0x1c1   : > { %3824 = vmatpush1.bf16.msra.mxu0 %v5080_v47  ;;  %3996 = vmatpush1.bf16.msra.mxu1 %v5082_v48  ;;  %v5145_v47 = vcombine.high %v463_v38, %v467_v39  ;;  %v471_v48 = vld [vmem:[#allocation6 + $0x550] sm:$0xff]  ;;  %v524_v38 = vld [vmem:[#allocation6 + $0x6f8] sm:$0xff] }
 0x1c2   : > { %3825 = vmatprep.subr.bf16.mxu0 %v5089_v49  ;;  %3997 = vmatprep.subr.bf16.mxu1 %v5091_v50  ;;  %v475_v49 = vld [vmem:[#allocation6 + $0x570] sm:$0xff]  ;;  %v472_v50 = vld [vmem:[#allocation6 + $0x558] sm:$0xff] }
 0x1c3   : > { %v5153_v30 = vcombine.high %v471_v48, %v475_v49  ;;  %v5152_v62 = vcombine.low %v471_v48, %v475_v49  ;;  %v5154_v63 = vcombine.low %v472_v50, %v476_v51  ;;  %v532_v48 = vld [vmem:[#allocation6 + $0x738] sm:$0xff] }
 0x1c5   : > { %3826 = vmatpush1.bf16.msra.mxu0 %v5088_v56  ;;  %3998 = vmatpush1.bf16.msra.mxu1 %v5090_v57  ;;  %v5155_v56 = vcombine.high %v472_v50, %v476_v51  ;;  %v479_v57 = vld [vmem:[#allocation6 + $0x590] sm:$0xff] }
 0x1c6   : > { %3827 = vmatprep.subr.bf16.mxu0 %v5097_v59  ;;  %3999 = vmatprep.subr.bf16.mxu1 %v5099_v60  ;;  %v483_v59 = vld [vmem:[#allocation6 + $0x5b0] sm:$0xff]  ;;  %v480_v60 = vld [vmem:[#allocation6 + $0x598] sm:$0xff] }
 0x1c7   : > { %v5161_v0 = vcombine.high %v479_v57, %v483_v59  ;;  %v5160_v7 = vcombine.low %v479_v57, %v483_v59  ;;  %v5162_v8 = vcombine.low %v480_v60, %v484_v61  ;;  %v540_v57 = vld [vmem:[#allocation6 + $0x778] sm:$0xff] }
 0x1c9   : > { %3828 = vmatpush1.bf16.msra.mxu0 %v5096_v2  ;;  %4000 = vmatpush1.bf16.msra.mxu1 %v5098_v3  ;;  %v5163_v2 = vcombine.high %v480_v60, %v484_v61  ;;  %v487_v3 = vld [vmem:[#allocation6 + $0x5d0] sm:$0xff] }
 0x1ca   : > { %3829 = vmatprep.subr.bf16.mxu0 %v5105_v4  ;;  %4001 = vmatprep.subr.bf16.mxu1 %v5107_v5  ;;  %v491_v4 = vld [vmem:[#allocation6 + $0x5f0] sm:$0xff]  ;;  %v488_v5 = vld [vmem:[#allocation6 + $0x5d8] sm:$0xff] }
 0x1cb   : > { %v5169_v9 = vcombine.high %v487_v3, %v491_v4  ;;  %v5168_v13 = vcombine.low %v487_v3, %v491_v4  ;;  %v5170_v14 = vcombine.low %v488_v5, %v492_v6  ;;  %v548_v3 = vld [vmem:[#allocation6 + $0x7b8] sm:$0xff] }
 0x1cd   : > { %3830 = vmatpush1.bf16.msra.mxu0 %v5104_v10  ;;  %4002 = vmatpush1.bf16.msra.mxu1 %v5106_v11  ;;  %v5171_v10 = vcombine.high %v488_v5, %v492_v6  ;;  %v495_v11 = vld [vmem:[#allocation6 + $0x610] sm:$0xff] }
 0x1ce   : > { %3842 = vmatprep.subr.bf16.mxu0 %v5113_v45  ;;  %4014 = vmatprep.subr.bf16.mxu1 %v5115_v46  ;;  %v499_v45 = vld [vmem:[#allocation6 + $0x630] sm:$0xff]  ;;  %v496_v46 = vld [vmem:[#allocation6 + $0x618] sm:$0xff] }
 0x1cf   : > { %v5177_v16 = vcombine.high %v495_v11, %v499_v45  ;;  %v5176_v24 = vcombine.low %v495_v11, %v499_v45  ;;  %v556_v11 = vld [vmem:[#allocation6 + $0x7f8] sm:$0xff] }
 0x1d0   : > { %3832 = vmatmul.mubr.bf16.vlgmr.msra.gmra.mrb[4].mxu0 %v6289_v15  ;;  %4004 = vmatmul.mubr.bf16.vlgmr.msra.gmra.mrb[4].mxu1 %v6289_v15  ;;  %v5130_v15 = vcombine.low %v448_v53, %v452_v54  ;;  %v5178_v53 = vcombine.low %v496_v46, %v500_v12 }
 0x1d1   : > { %3843 = vmatpush1.bf16.msra.mxu0 %v5112_v19  ;;  %4015 = vmatpush1.bf16.msra.mxu1 %v5114_v20  ;;  %v5179_v19 = vcombine.high %v496_v46, %v500_v12  ;;  %v503_v20 = vld [vmem:[#allocation6 + $0x650] sm:$0xff] }
 0x1d2   : > { %3844 = vmatprep.subr.bf16.mxu0 %v5121_v21  ;;  %4016 = vmatprep.subr.bf16.mxu1 %v5123_v22  ;;  %v507_v21 = vld [vmem:[#allocation6 + $0x670] sm:$0xff]  ;;  %v504_v22 = vld [vmem:[#allocation6 + $0x658] sm:$0xff] }
 0x1d3   : > { %3874 = vmatprep.mubr.bf16.mxu0 %v6297_v25  ;;  %4046 = vmatprep.mubr.bf16.mxu1 %v6297_v25  ;;  %v5147_v25 = vcombine.high %v464_v40, %v468_v41  ;;  %v5185_v54 = vcombine.high %v503_v20, %v507_v21  ;;  %v5184_v58 = vcombine.low %v503_v20, %v507_v21  ;;  %v564_v20 = vld [vmem:[#allocation6 + $0x838] sm:$0xff] }
 0x1d4   : > { %v5186_v34 = vcombine.low %v504_v22, %v508_v23 }
 0x1d5   : > { %3845 = vmatpush1.bf16.msra.mxu0 %v5120_v26  ;;  %4017 = vmatpush1.bf16.msra.mxu1 %v5122_v28  ;;  %v5187_v26 = vcombine.high %v504_v22, %v508_v23  ;;  %v511_v28 = vld [vmem:[#allocation6 + $0x690] sm:$0xff] }
 0x1d6   : > { %3846 = vmatprep.subr.bf16.mxu0 %v5129_v31  ;;  %4018 = vmatprep.subr.bf16.mxu1 %v5131_v32  ;;  %v515_v31 = vld [vmem:[#allocation6 + $0x6b0] sm:$0xff]  ;;  %v512_v32 = vld [vmem:[#allocation6 + $0x698] sm:$0xff] }
 0x1d7   : > { %v5193_v35 = vcombine.high %v511_v28, %v515_v31  ;;  %v5192_v39 = vcombine.low %v511_v28, %v515_v31  ;;  %v5194_v40 = vcombine.low %v512_v32, %v516_v33  ;;  %v572_v28 = vld [vmem:[#allocation6 + $0x878] sm:$0xff] }
 0x1d9   : > { %3847 = vmatpush1.bf16.msra.mxu0 %v5128_v36  ;;  %4019 = vmatpush1.bf16.msra.mxu1 %v5130_v15  ;;  %v5195_v36 = vcombine.high %v512_v32, %v516_v33  ;;  %v519_v15 = vld [vmem:[#allocation6 + $0x6d0] sm:$0xff] }
 0x1da   : > { %3848 = vmatprep.subr.bf16.mxu0 %v5137_v17  ;;  %4020 = vmatprep.subr.bf16.mxu1 %v5139_v18  ;;  %v523_v17 = vld [vmem:[#allocation6 + $0x6f0] sm:$0xff]  ;;  %v520_v18 = vld [vmem:[#allocation6 + $0x6d8] sm:$0xff] }
 0x1db   : > { %v5201_v41 = vcombine.high %v519_v15, %v523_v17  ;;  %v5200_v49 = vcombine.low %v519_v15, %v523_v17  ;;  %v5202_v50 = vcombine.low %v520_v18, %v524_v38  ;;  %v580_v15 = vld [vmem:[#allocation6 + $0x8b8] sm:$0xff] }
 0x1dd   : > { %3849 = vmatpush1.bf16.msra.mxu0 %v5136_v42  ;;  %4021 = vmatpush1.bf16.msra.mxu1 %v5138_v44  ;;  %v5203_v42 = vcombine.high %v520_v18, %v524_v38  ;;  %v527_v44 = vld [vmem:[#allocation6 + $0x710] sm:$0xff] }
 0x1de   : > { %3850 = vmatprep.subr.bf16.mxu0 %v5145_v47  ;;  %4022 = vmatprep.subr.bf16.mxu1 %v5147_v25  ;;  %v531_v47 = vld [vmem:[#allocation6 + $0x730] sm:$0xff]  ;;  %v528_v25 = vld [vmem:[#allocation6 + $0x718] sm:$0xff] }
 0x1df   : > { %v5209_v51 = vcombine.high %v527_v44, %v531_v47  ;;  %v5208_v59 = vcombine.low %v527_v44, %v531_v47  ;;  %v5210_v60 = vcombine.low %v528_v25, %v532_v48  ;;  %v588_v44 = vld [vmem:[#allocation6 + $0x8f8] sm:$0xff] }
 0x1e1   : > { %3851 = vmatpush1.bf16.msra.mxu0 %v5144_v52  ;;  %4023 = vmatpush1.bf16.msra.mxu1 %v5146_v29  ;;  %v5211_v52 = vcombine.high %v528_v25, %v532_v48  ;;  %v535_v29 = vld [vmem:[#allocation6 + $0x750] sm:$0xff] }
 0x1e2   : > { %3852 = vmatprep.subr.bf16.mxu0 %v5153_v30  ;;  %4024 = vmatprep.subr.bf16.mxu1 %v5155_v56  ;;  %v539_v30 = vld [vmem:[#allocation6 + $0x770] sm:$0xff]  ;;  %v536_v56 = vld [vmem:[#allocation6 + $0x758] sm:$0xff] }
 0x1e3   : > { %v5217_v61 = vcombine.high %v535_v29, %v539_v30  ;;  %v5216_v4 = vcombine.low %v535_v29, %v539_v30  ;;  %v5218_v5 = vcombine.low %v536_v56, %v540_v57 }
 0x1e5   : > { %3853 = vmatpush1.bf16.msra.mxu0 %v5152_v62  ;;  %4025 = vmatpush1.bf16.msra.mxu1 %v5154_v63  ;;  %v5219_v62 = vcombine.high %v536_v56, %v540_v57  ;;  %v543_v63 = vld [vmem:[#allocation6 + $0x790] sm:$0xff] }
 0x1e6   : > { %3854 = vmatprep.subr.bf16.mxu0 %v5161_v0  ;;  %4026 = vmatprep.subr.bf16.mxu1 %v5163_v2  ;;  %v547_v0 = vld [vmem:[#allocation6 + $0x7b0] sm:$0xff]  ;;  %v544_v2 = vld [vmem:[#allocation6 + $0x798] sm:$0xff] }
 0x1e7   : > { %v5225_v6 = vcombine.high %v543_v63, %v547_v0  ;;  %v5224_v45 = vcombine.low %v543_v63, %v547_v0  ;;  %v5226_v46 = vcombine.low %v544_v2, %v548_v3  ;;  %v599_v57 = vld [vmem:[#allocation6 + $0x950] sm:$0xff] }
 0x1e9   : > { %3855 = vmatpush1.bf16.msra.mxu0 %v5160_v7  ;;  %4027 = vmatpush1.bf16.msra.mxu1 %v5162_v8  ;;  %v5227_v7 = vcombine.high %v544_v2, %v548_v3  ;;  %v551_v8 = vld [vmem:[#allocation6 + $0x7d0] sm:$0xff] }
 0x1ea   : > { %3856 = vmatprep.subr.bf16.mxu0 %v5169_v9  ;;  %4028 = vmatprep.subr.bf16.mxu1 %v5171_v10  ;;  %v555_v9 = vld [vmem:[#allocation6 + $0x7f0] sm:$0xff]  ;;  %v552_v10 = vld [vmem:[#allocation6 + $0x7d8] sm:$0xff] }
 0x1eb   : > { %v5233_v12 = vcombine.high %v551_v8, %v555_v9  ;;  %v5232_v21 = vcombine.low %v551_v8, %v555_v9  ;;  %v5234_v22 = vcombine.low %v552_v10, %v556_v11  ;;  %v607_v3 = vld [vmem:[#allocation6 + $0x990] sm:$0xff] }
 0x1ed   : > { %3857 = vmatpush1.bf16.msra.mxu0 %v5168_v13  ;;  %4029 = vmatpush1.bf16.msra.mxu1 %v5170_v14  ;;  %v5235_v13 = vcombine.high %v552_v10, %v556_v11  ;;  %v559_v14 = vld [vmem:[#allocation6 + $0x810] sm:$0xff] }
 0x1ee   : > { %3858 = vmatprep.subr.bf16.mxu0 %v5177_v16  ;;  %4030 = vmatprep.subr.bf16.mxu1 %v5179_v19  ;;  %v563_v16 = vld [vmem:[#allocation6 + $0x830] sm:$0xff]  ;;  %v560_v19 = vld [vmem:[#allocation6 + $0x818] sm:$0xff] }
 0x1ef   : > { %v5241_v23 = vcombine.high %v559_v14, %v563_v16  ;;  %v5240_v31 = vcombine.low %v559_v14, %v563_v16  ;;  %v5242_v32 = vcombine.low %v560_v19, %v564_v20  ;;  %v615_v11 = vld [vmem:[#allocation6 + $0x9d0] sm:$0xff] }
 0x1f1   : > { %3859 = vmatpush1.bf16.msra.mxu0 %v5176_v24  ;;  %4031 = vmatpush1.bf16.msra.mxu1 %v5178_v53  ;;  %v5243_v24 = vcombine.high %v560_v19, %v564_v20  ;;  %v567_v53 = vld [vmem:[#allocation6 + $0x850] sm:$0xff] }
 0x1f2   : > { %3860 = vmatprep.subr.bf16.mxu0 %v5185_v54  ;;  %4032 = vmatprep.subr.bf16.mxu1 %v5187_v26  ;;  %v571_v54 = vld [vmem:[#allocation6 + $0x870] sm:$0xff]  ;;  %v568_v26 = vld [vmem:[#allocation6 + $0x858] sm:$0xff] }
 0x1f3   : > { %v5249_v33 = vcombine.high %v567_v53, %v571_v54  ;;  %v5248_v17 = vcombine.low %v567_v53, %v571_v54  ;;  %v5250_v18 = vcombine.low %v568_v26, %v572_v28  ;;  %v623_v20 = vld [vmem:[#allocation6 + $0xa10] sm:$0xff] }
 0x1f5   : > { %3861 = vmatpush1.bf16.msra.mxu0 %v5184_v58  ;;  %4033 = vmatpush1.bf16.msra.mxu1 %v5186_v34  ;;  %v5251_v58 = vcombine.high %v568_v26, %v572_v28  ;;  %v575_v34 = vld [vmem:[#allocation6 + $0x890] sm:$0xff] }
 0x1f6   : > { %3862 = vmatprep.subr.bf16.mxu0 %v5193_v35  ;;  %4034 = vmatprep.subr.bf16.mxu1 %v5195_v36  ;;  %v579_v35 = vld [vmem:[#allocation6 + $0x8b0] sm:$0xff]  ;;  %v576_v36 = vld [vmem:[#allocation6 + $0x898] sm:$0xff] }
 0x1f7   : > { %v5257_v38 = vcombine.high %v575_v34, %v579_v35  ;;  %v5256_v47 = vcombine.low %v575_v34, %v579_v35  ;;  %v631_v28 = vld [vmem:[#allocation6 + $0xa50] sm:$0xff] }
 0x1f9   : > { %3863 = vmatpush1.bf16.msra.mxu0 %v5192_v39  ;;  %4035 = vmatpush1.bf16.msra.mxu1 %v5194_v40  ;;  %v5259_v39 = vcombine.high %v576_v36, %v580_v15  ;;  %v583_v40 = vld [vmem:[#allocation6 + $0x8d0] sm:$0xff] }
 0x1fa   : > { %3864 = vmatprep.subr.bf16.mxu0 %v5201_v41  ;;  %4036 = vmatprep.subr.bf16.mxu1 %v5203_v42  ;;  %v587_v41 = vld [vmem:[#allocation6 + $0x8f0] sm:$0xff]  ;;  %v584_v42 = vld [vmem:[#allocation6 + $0x8d8] sm:$0xff] }
 0x1fb   : > { %v5265_v25 = vcombine.high %v583_v40, %v587_v41  ;;  %v5267_v48 = vcombine.high %v584_v42, %v588_v44  ;;  %v5264_v29 = vcombine.low %v583_v40, %v587_v41  ;;  %v5266_v30 = vcombine.low %v584_v42, %v588_v44  ;;  %v647_v44 = vld [vmem:[#allocation6 + $0xad0] sm:$0xff] }
 0x1fd   : > { %3865 = vmatpush1.bf16.msra.mxu0 %v5200_v49  ;;  %4037 = vmatpush1.bf16.msra.mxu1 %v5202_v50  ;;  %v591_v49 = vld [vmem:[#allocation6 + $0x910] sm:$0xff] }
 0x1fe   : > { %3866 = vmatprep.subr.bf16.mxu0 %v5209_v51  ;;  %4038 = vmatprep.subr.bf16.mxu1 %v5211_v52  ;;  %v595_v50 = vld [vmem:[#allocation6 + $0x930] sm:$0xff]  ;;  %v592_v51 = vld [vmem:[#allocation6 + $0x918] sm:$0xff] }
 0x1ff   : > { %v596_v52 = vld [vmem:[#allocation6 + $0x938] sm:$0xff]  ;;  %v5273_v56 = vcombine.high %v591_v49, %v595_v50 }
 0x200   : > { %v5274_v63 = vcombine.low %v592_v51, %v596_v52 }
 0x201   : > { %3867 = vmatpush1.bf16.msra.mxu0 %v5208_v59  ;;  %4039 = vmatpush1.bf16.msra.mxu1 %v5210_v60  ;;  %v603_v59 = vld [vmem:[#allocation6 + $0x970] sm:$0xff]  ;;  %v600_v60 = vld [vmem:[#allocation6 + $0x958] sm:$0xff] }
 0x202   : > { %3868 = vmatprep.subr.bf16.mxu0 %v5217_v61  ;;  %4040 = vmatprep.subr.bf16.mxu1 %v5219_v62  ;;  %v604_v61 = vld [vmem:[#allocation6 + $0x978] sm:$0xff]  ;;  %v5272_v62 = vcombine.low %v591_v49, %v595_v50  ;;  %v5281_v0 = vcombine.high %v599_v57, %v603_v59 }
 0x203   : > { %v5283_v2 = vcombine.high %v600_v60, %v604_v61  ;;  %v5282_v8 = vcombine.low %v600_v60, %v604_v61  ;;  %v663_v61 = vld [vmem:[#allocation6 + $0xb50] sm:$0xff] }
 0x205   : > { %3869 = vmatpush1.bf16.msra.mxu0 %v5216_v4  ;;  %4041 = vmatpush1.bf16.msra.mxu1 %v5218_v5  ;;  %v611_v4 = vld [vmem:[#allocation6 + $0x9b0] sm:$0xff]  ;;  %v608_v5 = vld [vmem:[#allocation6 + $0x998] sm:$0xff] }
 0x206   : > { %3870 = vmatprep.subr.bf16.mxu0 %v5225_v6  ;;  %4042 = vmatprep.subr.bf16.mxu1 %v5227_v7  ;;  %v612_v6 = vld [vmem:[#allocation6 + $0x9b8] sm:$0xff]  ;;  %v5280_v7 = vcombine.low %v599_v57, %v603_v59  ;;  %v5289_v9 = vcombine.high %v607_v3, %v611_v4 }
 0x207   : > { %v5291_v10 = vcombine.high %v608_v5, %v612_v6  ;;  %v5290_v14 = vcombine.low %v608_v5, %v612_v6  ;;  %v671_v6 = vld [vmem:[#allocation6 + $0xb90] sm:$0xff] }
 0x209   : > { %3871 = vmatpush1.bf16.msra.mxu0 %v5224_v45  ;;  %4043 = vmatpush1.bf16.msra.mxu1 %v5226_v46  ;;  %v619_v45 = vld [vmem:[#allocation6 + $0x9f0] sm:$0xff]  ;;  %v616_v46 = vld [vmem:[#allocation6 + $0x9d8] sm:$0xff] }
 0x20a   : > { %3872 = vmatprep.subr.bf16.mxu0 %v5233_v12  ;;  %4044 = vmatprep.subr.bf16.mxu1 %v5235_v13  ;;  %v620_v12 = vld [vmem:[#allocation6 + $0x9f8] sm:$0xff]  ;;  %v5288_v13 = vcombine.low %v607_v3, %v611_v4  ;;  %v5297_v16 = vcombine.high %v615_v11, %v619_v45 }
 0x20b   : > { %v5299_v19 = vcombine.high %v616_v46, %v620_v12  ;;  %v5298_v53 = vcombine.low %v616_v46, %v620_v12  ;;  %v679_v12 = vld [vmem:[#allocation6 + $0xbd0] sm:$0xff] }
 0x20d   : > { %3873 = vmatpush1.bf16.msra.mxu0 %v5232_v21  ;;  %4045 = vmatpush1.bf16.msra.mxu1 %v5234_v22  ;;  %v627_v21 = vld [vmem:[#allocation6 + $0xa30] sm:$0xff]  ;;  %v624_v22 = vld [vmem:[#allocation6 + $0xa18] sm:$0xff] }
 0x20e   : > { %3885 = vmatprep.subr.bf16.mxu0 %v5241_v23  ;;  %4057 = vmatprep.subr.bf16.mxu1 %v5243_v24  ;;  %v628_v23 = vld [vmem:[#allocation6 + $0xa38] sm:$0xff]  ;;  %v5296_v24 = vcombine.low %v615_v11, %v619_v45  ;;  %v5305_v54 = vcombine.high %v623_v20, %v627_v21 }
 0x20f   : > { %v5307_v26 = vcombine.high %v624_v22, %v628_v23  ;;  %v5306_v34 = vcombine.low %v624_v22, %v628_v23  ;;  %v687_v23 = vld [vmem:[#allocation6 + $0xc10] sm:$0xff] }
 0x210   : > { %3875 = vmatmul.mubr.bf16.vlgmr.msra.gmra.mrb[4].mxu0 %v6305_v27  ;;  %4047 = vmatmul.mubr.bf16.vlgmr.msra.gmra.mrb[4].mxu1 %v6305_v27  ;;  %v5258_v27 = vcombine.low %v576_v36, %v580_v15  ;;  %v639_v15 = vld [vmem:[#allocation6 + $0xa90] sm:$0xff] }
 0x211   : > { %3886 = vmatpush1.bf16.msra.mxu0 %v5240_v31  ;;  %4058 = vmatpush1.bf16.msra.mxu1 %v5242_v32  ;;  %v635_v31 = vld [vmem:[#allocation6 + $0xa70] sm:$0xff]  ;;  %v632_v32 = vld [vmem:[#allocation6 + $0xa58] sm:$0xff] }
 0x212   : > { %3887 = vmatprep.subr.bf16.mxu0 %v5249_v33  ;;  %4059 = vmatprep.subr.bf16.mxu1 %v5251_v58  ;;  %v636_v33 = vld [vmem:[#allocation6 + $0xa78] sm:$0xff]  ;;  %v5304_v58 = vcombine.low %v623_v20, %v627_v21  ;;  %v5313_v35 = vcombine.high %v631_v28, %v635_v31 }
 0x213   : > { %3917 = vmatprep.mubr.bf16.mxu0 %v6313_v37  ;;  %4089 = vmatprep.mubr.bf16.mxu1 %v6313_v37  ;;  %v5275_v37 = vcombine.high %v592_v51, %v596_v52  ;;  %v5315_v36 = vcombine.high %v632_v32, %v636_v33  ;;  %v5314_v40 = vcombine.low %v632_v32, %v636_v33  ;;  %v655_v52 = vld [vmem:[#allocation6 + $0xb10] sm:$0xff] }
 0x214   : > { %v695_v33 = vld [vmem:[#allocation6 + $0xc50] sm:$0xff] }
 0x215   : > { %3888 = vmatpush1.bf16.msra.mxu0 %v5248_v17  ;;  %4060 = vmatpush1.bf16.msra.mxu1 %v5250_v18  ;;  %v643_v17 = vld [vmem:[#allocation6 + $0xab0] sm:$0xff]  ;;  %v640_v18 = vld [vmem:[#allocation6 + $0xa98] sm:$0xff] }
 0x216   : > { %3889 = vmatprep.subr.bf16.mxu0 %v5257_v38  ;;  %4061 = vmatprep.subr.bf16.mxu1 %v5259_v39  ;;  %v644_v38 = vld [vmem:[#allocation6 + $0xab8] sm:$0xff]  ;;  %v5312_v39 = vcombine.low %v631_v28, %v635_v31  ;;  %v5321_v41 = vcombine.high %v639_v15, %v643_v17 }
 0x217   : > { %v5323_v42 = vcombine.high %v640_v18, %v644_v38  ;;  %v5322_v49 = vcombine.low %v640_v18, %v644_v38  ;;  %v703_v38 = vld [vmem:[#allocation6 + $0xc90] sm:$0xff] }
 0x219   : > { %3890 = vmatpush1.bf16.msra.mxu0 %v5256_v47  ;;  %4062 = vmatpush1.bf16.msra.mxu1 %v5258_v27  ;;  %v651_v47 = vld [vmem:[#allocation6 + $0xaf0] sm:$0xff]  ;;  %v648_v27 = vld [vmem:[#allocation6 + $0xad8] sm:$0xff] }
 0x21a   : > { %3891 = vmatprep.subr.bf16.mxu0 %v5265_v25  ;;  %4063 = vmatprep.subr.bf16.mxu1 %v5267_v48  ;;  %v652_v25 = vld [vmem:[#allocation6 + $0xaf8] sm:$0xff]  ;;  %v5320_v48 = vcombine.low %v639_v15, %v643_v17  ;;  %v5329_v50 = vcombine.high %v647_v44, %v651_v47 }
 0x21b   : > { %v5331_v51 = vcombine.high %v648_v27, %v652_v25  ;;  %v5330_v57 = vcombine.low %v648_v27, %v652_v25  ;;  %v711_v25 = vld [vmem:[#allocation6 + $0xcd0] sm:$0xff] }
 0x21d   : > { %3892 = vmatpush1.bf16.msra.mxu0 %v5264_v29  ;;  %4064 = vmatpush1.bf16.msra.mxu1 %v5266_v30  ;;  %v659_v29 = vld [vmem:[#allocation6 + $0xb30] sm:$0xff]  ;;  %v656_v30 = vld [vmem:[#allocation6 + $0xb18] sm:$0xff] }
 0x21e   : > { %3893 = vmatprep.subr.bf16.mxu0 %v5273_v56  ;;  %4065 = vmatprep.subr.bf16.mxu1 %v5275_v37  ;;  %v660_v56 = vld [vmem:[#allocation6 + $0xb38] sm:$0xff]  ;;  %v5328_v37 = vcombine.low %v647_v44, %v651_v47  ;;  %v5337_v59 = vcombine.high %v655_v52, %v659_v29 }
 0x21f   : > { %v5339_v60 = vcombine.high %v656_v30, %v660_v56  ;;  %v5338_v3 = vcombine.low %v656_v30, %v660_v56  ;;  %v719_v56 = vld [vmem:[#allocation6 + $0xd10] sm:$0xff] }
 0x221   : > { %3894 = vmatpush1.bf16.msra.mxu0 %v5272_v62  ;;  %4066 = vmatpush1.bf16.msra.mxu1 %v5274_v63  ;;  %v667_v62 = vld [vmem:[#allocation6 + $0xb70] sm:$0xff]  ;;  %v664_v63 = vld [vmem:[#allocation6 + $0xb58] sm:$0xff] }
 0x222   : > { %3895 = vmatprep.subr.bf16.mxu0 %v5281_v0  ;;  %4067 = vmatprep.subr.bf16.mxu1 %v5283_v2  ;;  %v668_v0 = vld [vmem:[#allocation6 + $0xb78] sm:$0xff]  ;;  %v5336_v2 = vcombine.low %v655_v52, %v659_v29  ;;  %v5345_v4 = vcombine.high %v663_v61, %v667_v62  ;;  %v815_v29 = vlaneseq }
 0x223   : > { %v5347_v5 = vcombine.high %v664_v63, %v668_v0  ;;  %v5346_v11 = vcombine.low %v664_v63, %v668_v0  ;;  %v727_v0 = vld [vmem:[#allocation6 + $0xd50] sm:$0xff] }
 0x225   : > { %3896 = vmatpush1.bf16.msra.mxu0 %v5280_v7  ;;  %4068 = vmatpush1.bf16.msra.mxu1 %v5282_v8  ;;  %v675_v7 = vld [vmem:[#allocation6 + $0xbb0] sm:$0xff]  ;;  %v672_v8 = vld [vmem:[#allocation6 + $0xb98] sm:$0xff] }
 0x226   : > { %3897 = vmatprep.subr.bf16.mxu0 %v5289_v9  ;;  %4069 = vmatprep.subr.bf16.mxu1 %v5291_v10  ;;  %v676_v9 = vld [vmem:[#allocation6 + $0xbb8] sm:$0xff]  ;;  %v5344_v10 = vcombine.low %v663_v61, %v667_v62  ;;  %v5353_v45 = vcombine.high %v671_v6, %v675_v7 }
 0x227   : > { %v5355_v46 = vcombine.high %v672_v8, %v676_v9  ;;  %v5354_v20 = vcombine.low %v672_v8, %v676_v9  ;;  %v6358_v9 = vld [vmem:[#allocation8] sm:$0xff] }
 0x229   : > { %3898 = vmatpush1.bf16.msra.mxu0 %v5288_v13  ;;  %4070 = vmatpush1.bf16.msra.mxu1 %v5290_v14  ;;  %v683_v13 = vld [vmem:[#allocation6 + $0xbf0] sm:$0xff]  ;;  %v680_v14 = vld [vmem:[#allocation6 + $0xbd8] sm:$0xff] }
 0x22a   : > { %3899 = vmatprep.subr.bf16.mxu0 %v5297_v16  ;;  %4071 = vmatprep.subr.bf16.mxu1 %v5299_v19  ;;  %v684_v16 = vld [vmem:[#allocation6 + $0xbf8] sm:$0xff]  ;;  %v5352_v19 = vcombine.low %v671_v6, %v675_v7  ;;  %v5361_v21 = vcombine.high %v679_v12, %v683_v13 }
 0x22b   : > { %v5363_v22 = vcombine.high %v680_v14, %v684_v16  ;;  %v5362_v28 = vcombine.low %v680_v14, %v684_v16  ;;  %v736_v14 = vld [vmem:[#allocation6 + $0xd98] sm:$0xff] }
 0x22c   : > { %v740_v16 = vld [vmem:[#allocation6 + $0xdb8] sm:$0xff] }
 0x22d   : > { %3900 = vmatpush1.bf16.msra.mxu0 %v5296_v24  ;;  %4072 = vmatpush1.bf16.msra.mxu1 %v5298_v53  ;;  %v691_v24 = vld [vmem:[#allocation6 + $0xc30] sm:$0xff]  ;;  %v688_v53 = vld [vmem:[#allocation6 + $0xc18] sm:$0xff] }
 0x22e   : > { %3901 = vmatprep.subr.bf16.mxu0 %v5305_v54  ;;  %4073 = vmatprep.subr.bf16.mxu1 %v5307_v26  ;;  %v692_v54 = vld [vmem:[#allocation6 + $0xc38] sm:$0xff]  ;;  %v5360_v26 = vcombine.low %v679_v12, %v683_v13  ;;  %v5369_v31 = vcombine.high %v687_v23, %v691_v24  ;;  %v739_v12 = vld [vmem:[#allocation6 + $0xdb0] sm:$0xff] }
 0x22f   : > { %v5371_v32 = vcombine.high %v688_v53, %v692_v54  ;;  %v5370_v15 = vcombine.low %v688_v53, %v692_v54 }
 0x231   : > { %3902 = vmatpush1.bf16.msra.mxu0 %v5304_v58  ;;  %4074 = vmatpush1.bf16.msra.mxu1 %v5306_v34  ;;  %v699_v58 = vld [vmem:[#allocation6 + $0xc70] sm:$0xff]  ;;  %v696_v34 = vld [vmem:[#allocation6 + $0xc58] sm:$0xff] }
 0x232   : > { %3903 = vmatprep.subr.bf16.mxu0 %v5313_v35  ;;  %4075 = vmatprep.subr.bf16.mxu1 %v5315_v36  ;;  %v700_v35 = vld [vmem:[#allocation6 + $0xc78] sm:$0xff]  ;;  %v5368_v36 = vcombine.low %v687_v23, %v691_v24  ;;  %v5377_v17 = vcombine.high %v695_v33, %v699_v58  ;;  %v743_v23 = vld [vmem:[#allocation6 + $0xdd0] sm:$0xff] }
 0x233   : > { %v5379_v18 = vcombine.high %v696_v34, %v700_v35  ;;  %v5378_v44 = vcombine.low %v696_v34, %v700_v35  ;;  %v747_v24 = vld [vmem:[#allocation6 + $0xdf0] sm:$0xff] }
 0x235   : > { %3904 = vmatpush1.bf16.msra.mxu0 %v5312_v39  ;;  %4076 = vmatpush1.bf16.msra.mxu1 %v5314_v40  ;;  %v707_v39 = vld [vmem:[#allocation6 + $0xcb0] sm:$0xff]  ;;  %v704_v40 = vld [vmem:[#allocation6 + $0xc98] sm:$0xff] }
 0x236   : > { %3905 = vmatprep.subr.bf16.mxu0 %v5321_v41  ;;  %4077 = vmatprep.subr.bf16.mxu1 %v5323_v42  ;;  %v708_v41 = vld [vmem:[#allocation6 + $0xcb8] sm:$0xff]  ;;  %v5376_v42 = vcombine.low %v695_v33, %v699_v58  ;;  %v5385_v47 = vcombine.high %v703_v38, %v707_v39 }
 0x237   : > { %v5387_v27 = vcombine.high %v704_v40, %v708_v41 }
 0x239   : > { %3906 = vmatpush1.bf16.msra.mxu0 %v5320_v48  ;;  %4078 = vmatpush1.bf16.msra.mxu1 %v5322_v49  ;;  %v715_v48 = vld [vmem:[#allocation6 + $0xcf0] sm:$0xff]  ;;  %v712_v49 = vld [vmem:[#allocation6 + $0xcd8] sm:$0xff] }
 0x23a   : > { %3907 = vmatprep.subr.bf16.mxu0 %v5329_v50  ;;  %4079 = vmatprep.subr.bf16.mxu1 %v5331_v51  ;;  %v716_v50 = vld [vmem:[#allocation6 + $0xcf8] sm:$0xff]  ;;  %v5384_v51 = vcombine.low %v703_v38, %v707_v39  ;;  %v5393_v52 = vcombine.high %v711_v25, %v715_v48 }
 0x23b   : > { %v5395_v30 = vcombine.high %v712_v49, %v716_v50  ;;  %v5394_v61 = vcombine.low %v712_v49, %v716_v50  ;;  %v751_v49 = vld [vmem:[#allocation6 + $0xe10] sm:$0xff] }
 0x23c   : > { %v755_v50 = vld [vmem:[#allocation6 + $0xe30] sm:$0xff] }
 0x23d   : > { %3908 = vmatpush1.bf16.msra.mxu0 %v5328_v37  ;;  %4080 = vmatpush1.bf16.msra.mxu1 %v5330_v57  ;;  %v723_v37 = vld [vmem:[#allocation6 + $0xd30] sm:$0xff]  ;;  %v720_v57 = vld [vmem:[#allocation6 + $0xd18] sm:$0xff] }
 0x23e   : > { %3909 = vmatprep.subr.bf16.mxu0 %v5337_v59  ;;  %4081 = vmatprep.subr.bf16.mxu1 %v5339_v60  ;;  %v724_v59 = vld [vmem:[#allocation6 + $0xd38] sm:$0xff]  ;;  %v5392_v60 = vcombine.low %v711_v25, %v715_v48  ;;  %v5401_v62 = vcombine.high %v719_v56, %v723_v37 }
 0x23f   : > { %v5403_v63 = vcombine.high %v720_v57, %v724_v59  ;;  %v5402_v6 = vcombine.low %v720_v57, %v724_v59  ;;  %v5424_v57 = vcombine.low %v743_v23, %v747_v24 }
 0x241   : > { %3910 = vmatpush1.bf16.msra.mxu0 %v5336_v2  ;;  %4082 = vmatpush1.bf16.msra.mxu1 %v5338_v3  ;;  %v731_v2 = vld [vmem:[#allocation6 + $0xd70] sm:$0xff]  ;;  %v728_v3 = vld [vmem:[#allocation6 + $0xd58] sm:$0xff] }
 0x242   : > { %3911 = vmatprep.subr.bf16.mxu0 %v5345_v4  ;;  %4083 = vmatprep.subr.bf16.mxu1 %v5347_v5  ;;  %v732_v4 = vld [vmem:[#allocation6 + $0xd78] sm:$0xff]  ;;  %v5400_v5 = vcombine.low %v719_v56, %v723_v37  ;;  %v5409_v8 = vcombine.high %v727_v0, %v731_v2 }
 0x245   : > { %3912 = vmatpush1.bf16.msra.mxu0 %v5344_v10  ;;  %4084 = vmatpush1.bf16.msra.mxu1 %v5346_v11 }
 0x246   : > { %3913 = vmatprep.subr.bf16.mxu0 %v5353_v45  ;;  %4085 = vmatprep.subr.bf16.mxu1 %v5355_v46  ;;  %v5411_v45 = vcombine.high %v728_v3, %v732_v4  ;;  %v735_v46 = vld [vmem:[#allocation6 + $0xd90] sm:$0xff] }
 0x249   : > { %3914 = vmatpush1.bf16.msra.mxu0 %v5352_v19  ;;  %4086 = vmatpush1.bf16.msra.mxu1 %v5354_v20  ;;  %v5408_v19 = vcombine.low %v727_v0, %v731_v2  ;;  %v763_v0 = vld [vmem:[#allocation6 + $0xe70] sm:$0xff]  ;;  %v760_v2 = vld [vmem:[#allocation6 + $0xe58] sm:$0xff] }
 0x24a   : > { %3915 = vmatprep.subr.bf16.mxu0 %v5361_v21  ;;  %4087 = vmatprep.subr.bf16.mxu1 %v5363_v22  ;;  %v5410_v21 = vcombine.low %v728_v3, %v732_v4  ;;  %v5417_v22 = vcombine.high %v735_v46, %v739_v12  ;;  %v764_v3 = vld [vmem:[#allocation6 + $0xe78] sm:$0xff]  ;;  %v5432_v4 = vcombine.low %v751_v49, %v755_v50 }
 0x24d   : > { %3916 = vmatpush1.bf16.msra.mxu0 %v5360_v26  ;;  %4088 = vmatpush1.bf16.msra.mxu1 %v5362_v28  ;;  %v5419_v28 = vcombine.high %v736_v14, %v740_v16 }
 0x24e   : > { %3928 = vmatprep.subr.bf16.mxu0 %v5369_v31  ;;  %4100 = vmatprep.subr.bf16.mxu1 %v5371_v32  ;;  %v744_v31 = vld [vmem:[#allocation6 + $0xdd8] sm:$0xff] }
 0x24f   : > { %v748_v32 = vld [vmem:[#allocation6 + $0xdf8] sm:$0xff] }
 0x250   : > { %3918 = vmatmul.mubr.bf16.vlgmr.msra.gmra.mrb[4].mxu0 %v6321_v43  ;;  %4090 = vmatmul.mubr.bf16.vlgmr.msra.gmra.mrb[4].mxu1 %v6321_v43  ;;  %v5386_v43 = vcombine.low %v704_v40, %v708_v41 }
 0x251   : > { %3929 = vmatpush1.bf16.msra.mxu0 %v5368_v36  ;;  %4101 = vmatpush1.bf16.msra.mxu1 %v5370_v15  ;;  %v5416_v15 = vcombine.low %v735_v46, %v739_v12  ;;  %v5442_v12 = vcombine.low %v760_v2, %v764_v3 }
 0x252   : > { %3930 = vmatprep.subr.bf16.mxu0 %v5377_v17  ;;  %4102 = vmatprep.subr.bf16.mxu1 %v5379_v18  ;;  %v5418_v17 = vcombine.low %v736_v14, %v740_v16  ;;  %v5425_v18 = vcombine.high %v743_v23, %v747_v24  ;;  %v775_v16 = vld [vmem:[#allocation6 + $0xed0] sm:$0xff] }
 0x253   : > { %3960 = vmatprep.mubr.bf16.mxu0 %v6329_v55  ;;  %4132 = vmatprep.mubr.bf16.mxu1 %v6329_v55  ;;  %v6355_v55 = vshrl.u32 %v815_v29, 7  ;;  %v752_v29 = vld [vmem:[#allocation6 + $0xe18] sm:$0xff] }
 0x255   : > { %3931 = vmatpush1.bf16.msra.mxu0 %v5376_v42  ;;  %4103 = vmatpush1.bf16.msra.mxu1 %v5378_v44  ;;  %v817_v7 = vsub.s32 0, %v6355_v55  ;;  %v825_v10 = vsub.s32 2, %v6355_v55  ;;  %v821_v11 = vsub.s32 1, %v6355_v55  ;;  %v829_v13 = vsub.s32 3, %v6355_v55 }
 0x256   : > { %3932 = vmatprep.subr.bf16.mxu0 %v5385_v47  ;;  %4104 = vmatprep.subr.bf16.mxu1 %v5387_v27  ;;  %v5427_v42 = vcombine.high %v744_v31, %v748_v32 }
 0x257   : > { %v818_v20 = vrot.slane %v6358_v9, %v817_v7  ;;  %v826_v54 = vrot.slane %v6358_v9, %v825_v10  ;;  %v822_v26 = vrot.slane %v6358_v9, %v821_v11  ;;  %v830_v34 = vrot.slane %v6358_v9, %v829_v13  ;;  %v771_v10 = vld [vmem:[#allocation6 + $0xeb0] sm:$0xff]  ;;  %v768_v11 = vld [vmem:[#allocation6 + $0xe98] sm:$0xff] }
 0x258   : > { %v5443_v7 = vcombine.high %v760_v2, %v764_v3 }
 0x259   : > { %3933 = vmatpush1.bf16.msra.mxu0 %v5384_v51  ;;  %4105 = vmatpush1.bf16.msra.mxu1 %v5386_v43 }
 0x25a   : > { %3934 = vmatprep.subr.bf16.mxu0 %v5393_v52  ;;  %4106 = vmatprep.subr.bf16.mxu1 %v5395_v30  ;;  %v756_v30 = vld [vmem:[#allocation6 + $0xe38] sm:$0xff] }
 0x25d   : > { %3935 = vmatpush1.bf16.msra.mxu0 %v5392_v60  ;;  %4107 = vmatpush1.bf16.msra.mxu1 %v5394_v61  ;;  %v5426_v60 = vcombine.low %v744_v31, %v748_v32  ;;  %v5433_v61 = vcombine.high %v751_v49, %v755_v50  ;;  %v788_v31 = vld [vmem:[#allocation6 + $0xf38] sm:$0xff]  ;;  %v807_v50 = vld [vmem:[#allocation6 + $0xfd0] sm:$0xff] }
 0x25e   : > { %3936 = vmatprep.subr.bf16.mxu0 %v5401_v62  ;;  %4108 = vmatprep.subr.bf16.mxu1 %v5403_v63  ;;  %v5435_v62 = vcombine.high %v752_v29, %v756_v30  ;;  %v759_v63 = vld [vmem:[#allocation6 + $0xe50] sm:$0xff] }
 0x25f   : > { %v5440_v46 = vcombine.low %v759_v63, %v763_v0 }
 0x261   : > { %3937 = vmatpush1.bf16.msra.mxu0 %v5400_v5  ;;  %4109 = vmatpush1.bf16.msra.mxu1 %v5402_v6  ;;  %v5434_v5 = vcombine.low %v752_v29, %v756_v30  ;;  %v5441_v6 = vcombine.high %v759_v63, %v763_v0  ;;  %v845_v63 = vsub.s32 7, %v6355_v55 }
 0x262   : > { %3938 = vmatprep.subr.bf16.mxu0 %v5409_v8  ;;  %4110 = vmatprep.subr.bf16.mxu1 %v5411_v45  ;;  %v767_v8 = vld [vmem:[#allocation6 + $0xe90] sm:$0xff]  ;;  %v772_v45 = vld [vmem:[#allocation6 + $0xeb8] sm:$0xff] }
 0x263   : > { %v3618_v53 = vpop.f32.mrb[0].mxu0  ;;  %v3790_v33 = vpop.f32.mrb[0].mxu1  ;;  %v5449_v13 = vcombine.high %v767_v8, %v771_v10  ;;  %v5451_v14 = vcombine.high %v768_v11, %v772_v45  ;;  %v5450_v23 = vcombine.low %v768_v11, %v772_v45 }
 0x264   : > { %v3620_v58 = vpop.f32.mrb[1].mxu0  ;;  %v3792_v35 = vpop.f32.mrb[1].mxu1  ;;  %v5650_v38 = vadd.f32 %v3618_v53, %v818_v20  ;;  %v5654_v44 = vadd.f32 %v3790_v33, %v826_v54 }
 0x265   : > { %v3622_v36 = vpop.f32.mrb[2].mxu0  ;;  %3939 = vmatpush1.bf16.msra.mxu0 %v5408_v19  ;;  %v3794_v40 = vpop.f32.mrb[2].mxu1  ;;  %4111 = vmatpush1.bf16.msra.mxu1 %v5410_v21  ;;  %v5651_v47 = vadd.f32 %v3620_v58, %v822_v26  ;;  %v5655_v51 = vadd.f32 %v3792_v35, %v830_v34  ;;  %v779_v19 = vld [vmem:[#allocation6 + $0xef0] sm:$0xff]  ;;  %v780_v21 = vld [vmem:[#allocation6 + $0xef8] sm:$0xff] }
 0x266   : > { %v5652_v39 = vadd.f32 %v3622_v36, %v818_v20  ;;  %v3624_v41 = vpop.f32.mrb[3].mxu0  ;;  %3940 = vmatprep.subr.bf16.mxu0 %v5417_v22  ;;  %v5656_v27 = vadd.f32 %v3794_v40, %v826_v54  ;;  %v3796_v48 = vpop.f32.mrb[3].mxu1  ;;  %4112 = vmatprep.subr.bf16.mxu1 %v5419_v28  ;;  %v776_v20 = vld [vmem:[#allocation6 + $0xed8] sm:$0xff]  ;;  %v5448_v22 = vcombine.low %v767_v8, %v771_v10  ;;  %v783_v54 = vld [vmem:[#allocation6 + $0xf10] sm:$0xff] }
 0x267   : > { %v5653_v25 = vadd.f32 %v3624_v41, %v822_v26  ;;  %v5657_v52 = vadd.f32 %v3796_v48, %v830_v34  ;;  %v5457_v24 = vcombine.high %v775_v16, %v779_v19  ;;  %v5459_v53 = vcombine.high %v776_v20, %v780_v21  ;;  %v787_v26 = vld [vmem:[#allocation6 + $0xf30] sm:$0xff]  ;;  %v784_v28 = vld [vmem:[#allocation6 + $0xf18] sm:$0xff] }
 0x268   : > { %v4143_v43 = vpack.c.bf16 %v5652_v39, %v5650_v38  ;;  %v4145_v56 = vpack.c.bf16 %v5656_v27, %v5654_v44  ;;  %v5456_v32 = vcombine.low %v775_v16, %v779_v19  ;;  %v5458_v33 = vcombine.low %v776_v20, %v780_v21  ;;  %v791_v35 = vld [vmem:[#allocation6 + $0xf50] sm:$0xff]  ;;  %v800_v44 = vld [vmem:[#allocation6 + $0xf98] sm:$0xff] }
 0x269   : > { %v4144_v37 = vpack.c.bf16 %v5653_v25, %v5651_v47  ;;  %3941 = vmatpush1.bf16.msra.mxu0 %v5416_v15  ;;  %v4146_v59 = vpack.c.bf16 %v5657_v52, %v5655_v51  ;;  %4113 = vmatpush1.bf16.msra.mxu1 %v5418_v17  ;;  %v5465_v58 = vcombine.high %v783_v54, %v787_v26  ;;  %v795_v36 = vld [vmem:[#allocation6 + $0xf70] sm:$0xff]  ;;  %v792_v15 = vld [vmem:[#allocation6 + $0xf58] sm:$0xff] }
 0x26a   : > { %4151 = vst [vmem:[#allocation2] sm:$0xff] %v4143_v43  ;;  %3942 = vmatprep.subr.bf16.mxu0 %v5425_v18  ;;  %4153 = vst [vmem:[#allocation2 + $0x10] sm:$0xff] %v4145_v56  ;;  %4114 = vmatprep.subr.bf16.mxu1 %v5427_v42  ;;  %v5467_v34 = vcombine.high %v784_v28, %v788_v31  ;;  %v796_v17 = vld [vmem:[#allocation6 + $0xf78] sm:$0xff]  ;;  %v5464_v18 = vcombine.low %v783_v54, %v787_v26  ;;  %v799_v41 = vld [vmem:[#allocation6 + $0xf90] sm:$0xff] }
 0x26b   : > { %4152 = vst [vmem:[#allocation2 + $0x8] sm:$0xff] %v4144_v37  ;;  %4154 = vst [vmem:[#allocation2 + $0x18] sm:$0xff] %v4146_v59  ;;  %v5466_v38 = vcombine.low %v784_v28, %v788_v31  ;;  %v5473_v39 = vcombine.high %v791_v35, %v795_v36  ;;  %v5475_v40 = vcombine.high %v792_v15, %v796_v17  ;;  %v803_v42 = vld [vmem:[#allocation6 + $0xfb0] sm:$0xff]  ;;  %v804_v47 = vld [vmem:[#allocation6 + $0xfb8] sm:$0xff] }
 0x26c   : > { %v5472_v27 = vcombine.low %v791_v35, %v795_v36  ;;  %v5474_v25 = vcombine.low %v792_v15, %v796_v17  ;;  %v5481_v48 = vcombine.high %v799_v41, %v803_v42  ;;  %v5483_v49 = vcombine.high %v800_v44, %v804_v47  ;;  %v811_v51 = vld [vmem:[#allocation6 + $0xff0] sm:$0xff]  ;;  %v808_v43 = vld [vmem:[#allocation6 + $0xfd8] sm:$0xff] }
 0x26d   : > { %3943 = vmatpush1.bf16.msra.mxu0 %v5424_v57  ;;  %4115 = vmatpush1.bf16.msra.mxu1 %v5426_v60  ;;  %v812_v52 = vld [vmem:[#allocation6 + $0xff8] sm:$0xff]  ;;  %v5480_v29 = vcombine.low %v799_v41, %v803_v42  ;;  %v5482_v30 = vcombine.low %v800_v44, %v804_v47  ;;  %v5489_v56 = vcombine.high %v807_v50, %v811_v51  ;;  %v833_v60 = vsub.s32 4, %v6355_v55 }
 0x26e   : > { %3944 = vmatprep.subr.bf16.mxu0 %v5433_v61  ;;  %4116 = vmatprep.subr.bf16.mxu1 %v5435_v62  ;;  %v5491_v37 = vcombine.high %v808_v43, %v812_v52  ;;  %v5488_v57 = vcombine.low %v807_v50, %v811_v51  ;;  %v5490_v59 = vcombine.low %v808_v43, %v812_v52  ;;  %v841_v61 = vsub.s32 6, %v6355_v55 }
 0x26f   : > { %v837_v62 = vsub.s32 5, %v6355_v55  ;;  %v834_v0 = vrot.slane %v6358_v9, %v833_v60 }
 0x270   : > { %v842_v3 = vrot.slane %v6358_v9, %v841_v61 }
 0x271   : > { %3945 = vmatpush1.bf16.msra.mxu0 %v5432_v4  ;;  %4117 = vmatpush1.bf16.msra.mxu1 %v5434_v5  ;;  %v838_v4 = vrot.slane %v6358_v9, %v837_v62 }
 0x272   : > { %3946 = vmatprep.subr.bf16.mxu0 %v5441_v6  ;;  %4118 = vmatprep.subr.bf16.mxu1 %v5443_v7  ;;  %v846_v7 = vrot.slane %v6358_v9, %v845_v63 }
 0x275   : > { %3947 = vmatpush1.bf16.msra.mxu0 %v5440_v46  ;;  %4119 = vmatpush1.bf16.msra.mxu1 %v5442_v12 }
 0x276   : > { %3948 = vmatprep.subr.bf16.mxu0 %v5449_v13  ;;  %4120 = vmatprep.subr.bf16.mxu1 %v5451_v14 }
 0x279   : > { %3949 = vmatpush1.bf16.msra.mxu0 %v5448_v22  ;;  %4121 = vmatpush1.bf16.msra.mxu1 %v5450_v23 }
 0x27a   : > { %3950 = vmatprep.subr.bf16.mxu0 %v5457_v24  ;;  %4122 = vmatprep.subr.bf16.mxu1 %v5459_v53 }
 0x27d   : > { %3951 = vmatpush1.bf16.msra.mxu0 %v5456_v32  ;;  %4123 = vmatpush1.bf16.msra.mxu1 %v5458_v33 }
 0x27e   : > { %3952 = vmatprep.subr.bf16.mxu0 %v5465_v58  ;;  %4124 = vmatprep.subr.bf16.mxu1 %v5467_v34 }
 0x281   : > { %3953 = vmatpush1.bf16.msra.mxu0 %v5464_v18  ;;  %4125 = vmatpush1.bf16.msra.mxu1 %v5466_v38 }
 0x282   : > { %3954 = vmatprep.subr.bf16.mxu0 %v5473_v39  ;;  %4126 = vmatprep.subr.bf16.mxu1 %v5475_v40 }
 0x285   : > { %3955 = vmatpush1.bf16.msra.mxu0 %v5472_v27  ;;  %4127 = vmatpush1.bf16.msra.mxu1 %v5474_v25 }
 0x286   : > { %3956 = vmatprep.subr.bf16.mxu0 %v5481_v48  ;;  %4128 = vmatprep.subr.bf16.mxu1 %v5483_v49 }
 0x289   : > { %3957 = vmatpush1.bf16.msra.mxu0 %v5480_v29  ;;  %4129 = vmatpush1.bf16.msra.mxu1 %v5482_v30 }
 0x28a   : > { %3958 = vmatprep.subr.bf16.mxu0 %v5489_v56  ;;  %4130 = vmatprep.subr.bf16.mxu1 %v5491_v37 }
 0x28d   : > { %3959 = vmatpush1.bf16.msra.mxu0 %v5488_v57  ;;  %4131 = vmatpush1.bf16.msra.mxu1 %v5490_v59 }
 0x290   : > { %3961 = vmatmul.mubr.bf16.vlgmr.msra.gmra.mrb[4].mxu0 %v6337_v1  ;;  %4133 = vmatmul.mubr.bf16.vlgmr.msra.gmra.mrb[4].mxu1 %v6337_v1 }
 0x363   : > { %v3962_v2 = vpop.f32.mrb[4].mxu0  ;;  %v4134_v5 = vpop.f32.mrb[4].mxu1 }
 0x364   : > { %v3964_v6 = vpop.f32.mrb[5].mxu0  ;;  %v4136_v1 = vpop.f32.mrb[5].mxu1  ;;  %v5658_v10 = vadd.f32 %v3962_v2, %v834_v0  ;;  %v5662_v12 = vadd.f32 %v4134_v5, %v842_v3 }
 0x365   : > { %v3966_v8 = vpop.f32.mrb[6].mxu0  ;;  %v4138_v45 = vpop.f32.mrb[6].mxu1  ;;  %v5659_v13 = vadd.f32 %v3964_v6, %v838_v4  ;;  %v5663_v19 = vadd.f32 %v4136_v1, %v846_v7 }
 0x366   : > { %v5660_v11 = vadd.f32 %v3966_v8, %v834_v0  ;;  %v3968_v46 = vpop.f32.mrb[7].mxu0  ;;  %v5664_v55 = vadd.f32 %v4138_v45, %v842_v3  ;;  %v4140_v16 = vpop.f32.mrb[7].mxu1 }
 0x367   : > { %v5661_v14 = vadd.f32 %v3968_v46, %v838_v4  ;;  %v5665_v21 = vadd.f32 %v4140_v16, %v846_v7 }
 0x368   : > { %v4147_v20 = vpack.c.bf16 %v5660_v11, %v5658_v10  ;;  %v4149_v22 = vpack.c.bf16 %v5664_v55, %v5662_v12 }
 0x369   : > { %v4148_v23 = vpack.c.bf16 %v5661_v14, %v5659_v13  ;;  %v4150_v24 = vpack.c.bf16 %v5665_v21, %v5663_v19 }
 0x36a   : > { %4155 = vst [vmem:[#allocation2 + $0x20] sm:$0xff] %v4147_v20  ;;  %4157 = vst [vmem:[#allocation2 + $0x30] sm:$0xff] %v4149_v22 }
 0x36b   : > { %4156 = vst [vmem:[#allocation2 + $0x28] sm:$0xff] %v4148_v23  ;;  %4158 = vst [vmem:[#allocation2 + $0x38] sm:$0xff] %v4150_v24 }
 0x36c PF: > { %p5492_p7 = scmp.ne.s32.totalorder %s6062_s18, 1 }
 0x36d   : > { %v5802_v9 = vld [vmem:[#allocation9 + $0x40] sm:$0xff] (!%p5492_p7)   ;;  %v5806_v28 = vld [vmem:[#allocation9 + $0x48] sm:$0xff] (!%p5492_p7)   ;;  %v5810_v58 = vld [vmem:[#allocation9 + $0x50] sm:$0xff] (!%p5492_p7)  }
 0x36e   : > { %4162 = sbr.rel (%p5492_p7) target bundleno = 1165 (0x48d), region = 68  ;;  %v5803_v53 = vld [vmem:[#allocation9 + $0xc0] sm:$0xff] (!%p5492_p7)   ;;  %5562 = vmatprep.subr.bf16.mxu0 (!%p5492_p7), %v5802_v9  ;;  %v5807_v31 = vld [vmem:[#allocation9 + $0xc8] sm:$0xff] (!%p5492_p7)   ;;  %v5811_v34 = vld [vmem:[#allocation9 + $0xd0] sm:$0xff] (!%p5492_p7)  }
 0x36f   : > { %v5804_v54 = vld [vmem:[#allocation9] sm:$0xff] (!%p5492_p7)   ;;  %5584 = vmatprep.subr.bf16.mxu1 (!%p5492_p7), %v5803_v53  ;;  %v5808_v32 = vld [vmem:[#allocation9 + $0x8] sm:$0xff] (!%p5492_p7)   ;;  %v5812_v35 = vld [vmem:[#allocation9 + $0x10] sm:$0xff] (!%p5492_p7)  }
 0x370   : > { %v5805_v26 = vld [vmem:[#allocation9 + $0x80] sm:$0xff] (!%p5492_p7)   ;;  %5563 = vmatpush3.bf16.msra.mxu0 (!%p5492_p7), %v5804_v54  ;;  %v5809_v33 = vld [vmem:[#allocation9 + $0x88] sm:$0xff] (!%p5492_p7)   ;;  %v5813_v36 = vld [vmem:[#allocation9 + $0x90] sm:$0xff] (!%p5492_p7)  }
 0x371   : > { %5585 = vmatpush3.bf16.msra.mxu1 (!%p5492_p7), %v5805_v26  ;;  %5564 = vmatprep.subr.bf16.mxu0 (!%p5492_p7), %v5806_v28  ;;  %v5814_v15 = vld [vmem:[#allocation9 + $0x58] sm:$0xff] (!%p5492_p7)   ;;  %v5818_v39 = vld [vmem:[#allocation9 + $0x60] sm:$0xff] (!%p5492_p7)   ;;  %v5822_v44 = vld [vmem:[#allocation9 + $0x68] sm:$0xff] (!%p5492_p7)  }
 0x372   : > { %5586 = vmatprep.subr.bf16.mxu1 (!%p5492_p7), %v5807_v31  ;;  %v5815_v17 = vld [vmem:[#allocation9 + $0xd8] sm:$0xff] (!%p5492_p7)   ;;  %v5819_v40 = vld [vmem:[#allocation9 + $0xe0] sm:$0xff] (!%p5492_p7)   ;;  %v5823_v47 = vld [vmem:[#allocation9 + $0xe8] sm:$0xff] (!%p5492_p7)  }
 0x373   : > { %v5816_v18 = vld [vmem:[#allocation9 + $0x18] sm:$0xff] (!%p5492_p7)   ;;  %v5820_v41 = vld [vmem:[#allocation9 + $0x20] sm:$0xff] (!%p5492_p7)   ;;  %v5824_v27 = vld [vmem:[#allocation9 + $0x28] sm:$0xff] (!%p5492_p7)  }
 0x374   : > { %5565 = vmatpush3.bf16.msra.mxu0 (!%p5492_p7), %v5808_v32  ;;  %v5817_v38 = vld [vmem:[#allocation9 + $0x98] sm:$0xff] (!%p5492_p7)   ;;  %v5821_v42 = vld [vmem:[#allocation9 + $0xa0] sm:$0xff] (!%p5492_p7)   ;;  %v5825_v25 = vld [vmem:[#allocation9 + $0xa8] sm:$0xff] (!%p5492_p7)  }
 0x375   : > { %5587 = vmatpush3.bf16.msra.mxu1 %v5809_v33  ;;  %5566 = vmatprep.subr.bf16.mxu0 %v5810_v58  ;;  %v5826_v48 = vld [vmem:[#allocation9 + $0x70] sm:$0xff]   ;;  %v5830_v43 = vld [vmem:[#allocation9 + $0x78] sm:$0xff]   ;;  %v4164_v56 = vld [vmem:[#allocation2 + $0x8] sm:$0xff] }
 0x376   : > { %5588 = vmatprep.subr.bf16.mxu1 %v5811_v34  ;;  %v5827_v49 = vld [vmem:[#allocation9 + $0xf0] sm:$0xff]   ;;  %v5831_v52 = vld [vmem:[#allocation9 + $0xf8] sm:$0xff]   ;;  %4722 = vmatprep.mubr.bf16.mxu0 %v4164_v56  ;;  %v4165_v59 = vld [vmem:[#allocation2 + $0x10] sm:$0xff] }
 0x377   : > { %v5828_v50 = vld [vmem:[#allocation9 + $0x30] sm:$0xff]   ;;  %v5832_v29 = vld [vmem:[#allocation9 + $0x38] sm:$0xff]   ;;  %v5834_v60 = vld [vmem:[#allocation9 + $0x140] sm:$0xff]  }
 0x378   : > { %5567 = vmatpush3.bf16.msra.mxu0 %v5812_v35  ;;  %v5829_v51 = vld [vmem:[#allocation9 + $0xb0] sm:$0xff]   ;;  %v5833_v30 = vld [vmem:[#allocation9 + $0xb8] sm:$0xff]   ;;  %v5835_v61 = vld [vmem:[#allocation9 + $0x1c0] sm:$0xff]  }
 0x379   : > { %5589 = vmatpush3.bf16.msra.mxu1 %v5813_v36  ;;  %5568 = vmatprep.subr.bf16.mxu0 %v5814_v15  ;;  %v4166_v37 = vld [vmem:[#allocation2 + $0x18] sm:$0xff]  ;;  %v4163_v57 = vld [vmem:[#allocation2] sm:$0xff]  ;;  %v5836_v62 = vld [vmem:[#allocation9 + $0x100] sm:$0xff]  }
 0x37a   : > { %5590 = vmatprep.subr.bf16.mxu1 %v5815_v17  ;;  %4763 = vmatprep.mubr.bf16.mxu1 %v4166_v37  ;;  %v5837_v63 = vld [vmem:[#allocation9 + $0x180] sm:$0xff]   ;;  %v5838_v0 = vld [vmem:[#allocation9 + $0x148] sm:$0xff]   ;;  %v5842_v5 = vld [vmem:[#allocation9 + $0x150] sm:$0xff]  }
 0x37b   : > { %v5839_v2 = vld [vmem:[#allocation9 + $0x1c8] sm:$0xff]   ;;  %v5843_v6 = vld [vmem:[#allocation9 + $0x1d0] sm:$0xff]   ;;  %v5846_v8 = vld [vmem:[#allocation9 + $0x158] sm:$0xff]  }
 0x37c   : > { %5569 = vmatpush3.bf16.msra.mxu0 %v5816_v18  ;;  %v5840_v3 = vld [vmem:[#allocation9 + $0x108] sm:$0xff]   ;;  %v5844_v7 = vld [vmem:[#allocation9 + $0x110] sm:$0xff]   ;;  %v5847_v10 = vld [vmem:[#allocation9 + $0x1d8] sm:$0xff]  }
 0x37d   : > { %5591 = vmatpush3.bf16.msra.mxu1 %v5817_v38  ;;  %5570 = vmatprep.subr.bf16.mxu0 %v5818_v39  ;;  %v5841_v4 = vld [vmem:[#allocation9 + $0x188] sm:$0xff]   ;;  %v5845_v1 = vld [vmem:[#allocation9 + $0x190] sm:$0xff]   ;;  %v5848_v11 = vld [vmem:[#allocation9 + $0x118] sm:$0xff]  }
 0x37e   : > { %5592 = vmatprep.subr.bf16.mxu1 %v5819_v40  ;;  %v5849_v45 = vld [vmem:[#allocation9 + $0x198] sm:$0xff]   ;;  %v5850_v46 = vld [vmem:[#allocation9 + $0x160] sm:$0xff]   ;;  %v5854_v14 = vld [vmem:[#allocation9 + $0x168] sm:$0xff]  }
 0x37f   : > { %v5851_v12 = vld [vmem:[#allocation9 + $0x1e0] sm:$0xff]   ;;  %v5855_v16 = vld [vmem:[#allocation9 + $0x1e8] sm:$0xff]   ;;  %v5858_v21 = vld [vmem:[#allocation9 + $0x170] sm:$0xff]  }
 0x380   : > { %5571 = vmatpush3.bf16.msra.mxu0 %v5820_v41  ;;  %v5852_v13 = vld [vmem:[#allocation9 + $0x120] sm:$0xff]   ;;  %v5856_v19 = vld [vmem:[#allocation9 + $0x128] sm:$0xff]   ;;  %v5859_v22 = vld [vmem:[#allocation9 + $0x1f0] sm:$0xff]  }
 0x381   : > { %5593 = vmatpush3.bf16.msra.mxu1 %v5821_v42  ;;  %5572 = vmatprep.subr.bf16.mxu0 %v5822_v44  ;;  %v5853_v55 = vld [vmem:[#allocation9 + $0x1a0] sm:$0xff]   ;;  %v5857_v20 = vld [vmem:[#allocation9 + $0x1a8] sm:$0xff]   ;;  %v5860_v23 = vld [vmem:[#allocation9 + $0x130] sm:$0xff]  }
 0x382   : > { %5594 = vmatprep.subr.bf16.mxu1 %v5823_v47  ;;  %v5861_v24 = vld [vmem:[#allocation9 + $0x1b0] sm:$0xff]   ;;  %v5862_v9 = vld [vmem:[#allocation9 + $0x178] sm:$0xff]   ;;  %v4168_v28 = vld [vmem:[#allocation2 + $0x28] sm:$0xff] }
 0x383   : > { %v5863_v53 = vld [vmem:[#allocation9 + $0x1f8] sm:$0xff]   ;;  %v4170_v31 = vld [vmem:[#allocation2 + $0x38] sm:$0xff]  ;;  %v4169_v33 = vld [vmem:[#allocation2 + $0x30] sm:$0xff] }
 0x384   : > { %5573 = vmatpush3.bf16.msra.mxu0 %v5824_v27  ;;  %v5864_v54 = vld [vmem:[#allocation9 + $0x138] sm:$0xff]   ;;  %v5493_v35 = vld [vmem:[#allocation11] ss:$0 sm:$0xff] }
 0x385   : > { %5595 = vmatpush3.bf16.msra.mxu1 %v5825_v25  ;;  %5574 = vmatprep.subr.bf16.mxu0 %v5826_v48  ;;  %v5865_v26 = vld [vmem:[#allocation9 + $0x1b8] sm:$0xff]  }
 0x386   : > { %5596 = vmatprep.subr.bf16.mxu1 %v5827_v49  ;;  %v4167_v32 = vld [vmem:[#allocation2 + $0x20] sm:$0xff] }
 0x388   : > { %5575 = vmatpush3.bf16.msra.mxu0 %v5828_v50 }
 0x389   : > { %5597 = vmatpush3.bf16.msra.mxu1 %v5829_v51  ;;  %5576 = vmatprep.subr.bf16.mxu0 %v5830_v43 }
 0x38a   : > { %5598 = vmatprep.subr.bf16.mxu1 %v5831_v52 }
 0x38c   : > { %5577 = vmatpush3.bf16.msra.mxu0 %v5832_v29 }
 0x38d   : > { %5599 = vmatpush3.bf16.msra.mxu1 %v5833_v30  ;;  %5606 = vmatprep.subr.bf16.mxu0 %v5834_v60 }
 0x38e   : > { %5628 = vmatprep.subr.bf16.mxu1 %v5835_v61 }
 0x38f   : > { %4723 = vmatmul.mubr.bf16.vlgmr.msra.gmra.mrb[0].mxu0 %v4163_v57 }
 0x390   : > { %4764 = vmatmul.mubr.bf16.vlgmr.msra.gmra.mrb[0].mxu1 %v4165_v59  ;;  %5607 = vmatpush3.bf16.msra.mxu0 %v5836_v62 }
 0x391   : > { %5629 = vmatpush3.bf16.msra.mxu1 %v5837_v63  ;;  %5608 = vmatprep.subr.bf16.mxu0 %v5838_v0 }
 0x392   : > { %5630 = vmatprep.subr.bf16.mxu1 %v5839_v2  ;;  %4804 = vmatprep.mubr.bf16.mxu0 %v4168_v28 }
 0x393   : > { %4845 = vmatprep.mubr.bf16.mxu1 %v4170_v31 }
 0x394   : > { %5609 = vmatpush3.bf16.msra.mxu0 %v5840_v3 }
 0x395   : > { %5631 = vmatpush3.bf16.msra.mxu1 %v5841_v4  ;;  %5610 = vmatprep.subr.bf16.mxu0 %v5842_v5 }
 0x396   : > { %5632 = vmatprep.subr.bf16.mxu1 %v5843_v6 }
 0x398   : > { %5611 = vmatpush3.bf16.msra.mxu0 %v5844_v7 }
 0x399   : > { %5633 = vmatpush3.bf16.msra.mxu1 %v5845_v1  ;;  %5612 = vmatprep.subr.bf16.mxu0 %v5846_v8 }
 0x39a   : > { %5634 = vmatprep.subr.bf16.mxu1 %v5847_v10 }
 0x39c   : > { %5613 = vmatpush3.bf16.msra.mxu0 %v5848_v11 }
 0x39d   : > { %5635 = vmatpush3.bf16.msra.mxu1 %v5849_v45  ;;  %5614 = vmatprep.subr.bf16.mxu0 %v5850_v46 }
 0x39e   : > { %5636 = vmatprep.subr.bf16.mxu1 %v5851_v12 }
 0x3a0   : > { %5615 = vmatpush3.bf16.msra.mxu0 %v5852_v13 }
 0x3a1   : > { %5637 = vmatpush3.bf16.msra.mxu1 %v5853_v55  ;;  %5616 = vmatprep.subr.bf16.mxu0 %v5854_v14 }
 0x3a2   : > { %5638 = vmatprep.subr.bf16.mxu1 %v5855_v16 }
 0x3a4   : > { %5617 = vmatpush3.bf16.msra.mxu0 %v5856_v19 }
 0x3a5   : > { %5639 = vmatpush3.bf16.msra.mxu1 %v5857_v20  ;;  %5618 = vmatprep.subr.bf16.mxu0 %v5858_v21 }
 0x3a6   : > { %5640 = vmatprep.subr.bf16.mxu1 %v5859_v22 }
 0x3a8   : > { %5619 = vmatpush3.bf16.msra.mxu0 %v5860_v23 }
 0x3a9   : > { %5641 = vmatpush3.bf16.msra.mxu1 %v5861_v24  ;;  %5620 = vmatprep.subr.bf16.mxu0 %v5862_v9 }
 0x3aa   : > { %5642 = vmatprep.subr.bf16.mxu1 %v5863_v53 }
 0x3ac   : > { %5621 = vmatpush3.bf16.msra.mxu0 %v5864_v54 }
 0x3ad   : > { %5643 = vmatpush3.bf16.msra.mxu1 %v5865_v26 }
 0x3af   : > { %4805 = vmatmul.mubr.bf16.vlgmr.msra.gmra.mrb[4].mxu0 %v4167_v32 }
 0x3b0   : > { %4846 = vmatmul.mubr.bf16.vlgmr.msra.gmra.mrb[4].mxu1 %v4169_v33 }
 0x462   : > { %v5578_v58 = vpop.f32.mrb[0].mxu0 }
 0x463   : > { %v5600_v34 = vpop.f32.mrb[0].mxu1  ;;  %v5579_v36 = vpop.f32.mrb[1].mxu0 }
 0x464   : > { %v5580_v15 = vadd.f32 %v5579_v36, %v5578_v58  ;;  %v5601_v17 = vpop.f32.mrb[1].mxu1  ;;  %v5581_v18 = vpop.f32.mrb[2].mxu0 }
 0x465   : > { %v5602_v38 = vadd.f32 %v5601_v17, %v5600_v34  ;;  %v5603_v39 = vpop.f32.mrb[2].mxu1  ;;  %v5582_v40 = vpop.f32.mrb[3].mxu0 }
 0x466   : > { %v4725_v41 = vadd.f32 %v5580_v15, %v5493_v35  ;;  %v5583_v42 = vadd.f32 %v5582_v40, %v5581_v18  ;;  %v5604_v44 = vpop.f32.mrb[3].mxu1 }
 0x467   : > { %v5605_v47 = vadd.f32 %v5604_v44, %v5603_v39 }
 0x468   : > { %v4766_v27 = vadd.f32 %v5602_v38, %v4725_v41  ;;  %v4728_v25 = vadd.f32 %v5583_v42, %v5493_v35 }
 0x46a   : > { %v4769_v48 = vadd.f32 %v5605_v47, %v4728_v25 }
 0x482   : > { %v5622_v49 = vpop.f32.mrb[4].mxu0 }
 0x483   : > { %v5644_v50 = vpop.f32.mrb[4].mxu1  ;;  %v5623_v51 = vpop.f32.mrb[5].mxu0 }
 0x484   : > { %v5624_v43 = vadd.f32 %v5623_v51, %v5622_v49  ;;  %v5645_v52 = vpop.f32.mrb[5].mxu1  ;;  %v5625_v29 = vpop.f32.mrb[6].mxu0 }
 0x485   : > { %v5646_v30 = vadd.f32 %v5645_v52, %v5644_v50  ;;  %v5647_v56 = vpop.f32.mrb[6].mxu1  ;;  %v5626_v37 = vpop.f32.mrb[7].mxu0 }
 0x486   : > { %v4807_v57 = vadd.f32 %v5624_v43, %v4766_v27  ;;  %v5627_v59 = vadd.f32 %v5626_v37, %v5625_v29  ;;  %v5648_v60 = vpop.f32.mrb[7].mxu1 }
 0x487   : > { %v5649_v61 = vadd.f32 %v5648_v60, %v5647_v56 }
 0x488   : > { %v4848_v62 = vadd.f32 %v5646_v30, %v4807_v57  ;;  %v4810_v63 = vadd.f32 %v5627_v59, %v4769_v48 }
 0x48a   : > { %4854 = vst [vmem:[#allocation12] sm:$0xff] %v4848_v62  ;;  %v4851_v0 = vadd.f32 %v5649_v61, %v4810_v63 }
 0x48c   : > { %4855 = vst [vmem:[#allocation12 + $0x8] sm:$0xff] %v4851_v0 }
 0x48d PF: > { %p6380_p8 = scmp.eq.s32.totalorder %s4958_s21, 1  ;;  %s6081_s22 = smov [#allocation12]  }
 0x48e   : > { %s4865_s23 = sshll.u32 %s6081_s22, 4  ;;  %s4866_s23 = int_to_ptr.vmem [resolvable:$true] %s4865_s23 }
 0x48f   : > { %s6006_s28 = scalar_lea.vmem %s4866_s23, 256  ;;  %p6013_p12 = scmp.lt.s32.totalorder %s4866_s23, %s4866_s23 }
 0x490   : > { %p6007_p9 = scmp.ne.s32.totalorder %s4866_s23, %s6006_s28  ;;  %p6014_p13 = scmp.lt.s32.totalorder %s6006_s28, %s6006_s28 }
 0x492   : > { %p6008_p10 = pnand %p6007_p9, %p6380_p8  ;;  %p6015_p0 = por %p6014_p13, %p6013_p12 }
 0x494   : > { %p6009_p11 = pneg %p6008_p10 }
 0x496   : > { %p6016_p1 = pnand %p6015_p0, %p6009_p11 }
 0x498   : > { %6019 = shalt.err (!%p6016_p1)
}
 0x499   : > { %s6020_s21 = scalar_lea.hbm %s6420_s5, 256 }
 0x49a   : > { %p6021_p4 = scmp.ne.s32.totalorder %s6420_s5, %s6020_s21  ;;  %p6026_p6 = scmp.lt.u32.totalorder %s6020_s21, %s6420_s5 }
 0x49c   : > { %p6022_p2 = pnand %p6021_p4, %p6380_p8 }
 0x49e   : > { %p6023_p3 = pneg %p6022_p2 }
 0x4a0   : > { %p6028_p5 = pnand %p6026_p6, %p6023_p3 }
 0x4a2   : > { %6031 = shalt.err (!%p6028_p5)
}
 0x4a3   : > { %s6082_s10 = smov 128   ;;  %s6083_s11 = smov 8  }
 0x4a4   : > { %5735 = dma.vmem_to_hbm [thread:$0]  (%p6380_p8), %s4866_s23, 256, %s6420_s5, [#allocation5], %s6082_s10, %s6082_s10, %s6083_s11  }
 0x4a5   : > { %6057 = dma.done.wait (%p6380_p8), [#allocation5], 256  }
 0x4a6   : > { %6059 = vsyncadd (%p6380_p8), [#allocation5], 4294967040 }
 0x4a7 PF: > { %s19_s20 = sadd.s32 1, %s6070_s20   ;;  %s6431_s18 = smov %s6066_s19 }
 0x4a8   : > { %p16_p7 = scmp.ge.s32.totalorder %s19_s20, 4   ;;  %s6432_s19 = smov %s6434_s15 }
 0x4aa   :  { %18 = sbr.rel (!%p16_p7) target bundleno = 5 (0x5), region = 95 }
 0x4b1   :  { %4881 = vsyncpa [#allocation4], 1 }
 0x4b2   :  { %4883 = vsyncpa [#allocation4 + $0x1], 1 }
 0x4b3   :  { %4884 = vsyncpa [#allocation7], 1 }
 0x4b4   :  { %4885 = vsyncpa [#allocation10], 1 }
 0x4b5   :  { %4886 = vsyncpa [#allocation5], 1 }
 0x4b6   :  { %4888 = vsyncpa [#allocation5 + $0x1], 1 }

</bundles_post_ra>
